<compile_context>
chip_gen: v6e
topology: v6e:2x2x1
jax: 0.10.0
libtpu: 0.0.40
codegen_flags: <defaults>
</compile_context>

<pallas_src>
import jax
import jax.numpy as jnp
from jax import lax
from jax.experimental import pallas as pl
from jax.experimental.pallas import tpu as pltpu

EPS = 1e-5                       # nn.BatchNorm2d default eps
LANE = 128                       # TPU lane width
VMEM_LIMIT = 32 * 1024 * 1024    # safe scoped-VMEM limit on v5e/v6e/v7x


def _round_up(v, m):
    return (v + m - 1) // m * m


# --------------------------------------------------------------------------
# Pass 1: 3x3 conv (9 shifted GEMMs) + per-channel sum / sum-of-squares
# --------------------------------------------------------------------------
def _make_conv_stats_kernel(h, w):
    wp = w + 2            # padded row length
    mv = h * wp           # output rows per image (incl. 2 garbage cols / row)

    def kernel(x_ref, w_ref, y_ref, s_ref):
        # zero the cross-image stats accumulator on the first grid step
        @pl.when(pl.program_id(0) == 0)
        def _():
            s_ref[...] = jnp.zeros_like(s_ref)

        # conv3x3(stride=1, pad=1) as a sum of 9 shifted matmuls over the
        # flattened, halo-padded image (bf16 operands, f32 accumulation).
        acc = None
        for kh in range(3):
            for kw in range(3):
                off = kh * wp + kw
                xs = x_ref[0, off:off + mv, :]                      # (mv, Cin)
                d = jnp.dot(xs, w_ref[3 * kh + kw],
                            preferred_element_type=jnp.float32)     # (mv, Pp)
                acc = d if acc is None else acc + d
        y_ref[0] = acc

        # per-channel sum / sum-of-squares over *valid* columns only
        col = lax.broadcasted_iota(jnp.int32, (mv, acc.shape[-1]), 0) % wp
        ym = jnp.where(col < w, acc, 0.0)
        s_ref[...] += jnp.concatenate(
            [jnp.sum(ym, axis=0, keepdims=True),
             jnp.sum(ym * acc, axis=0, keepdims=True)], axis=0)

    return kernel


def _conv3x3_stats(xflat, w_taps, h, w):
    """xflat: (N, (h+3)*(w+2), Cin) bf16 ; w_taps: (9, Cin, Pp) bf16."""
    n, mp, cin = xflat.shape
    pp = w_taps.shape[-1]
    mv = h * (w + 2)
    return pl.pallas_call(
        _make_conv_stats_kernel(h, w),
        out_shape=(jax.ShapeDtypeStruct((n, mv, pp), jnp.float32),
                   jax.ShapeDtypeStruct((2, pp), jnp.float32)),
        grid=(n,),
        in_specs=[pl.BlockSpec((1, mp, cin), lambda i: (i, 0, 0)),
                  pl.BlockSpec((9, cin, pp), lambda i: (0, 0, 0))],
        out_specs=(pl.BlockSpec((1, mv, pp), lambda i: (i, 0, 0)),
                   pl.BlockSpec((2, pp), lambda i: (0, 0))),
        compiler_params=pltpu.CompilerParams(
            dimension_semantics=("arbitrary",),   # stats reduce across images
            vmem_limit_bytes=VMEM_LIMIT),
    )(xflat, w_taps)


# --------------------------------------------------------------------------
# Pass 2: normalize (sum-sq identity) + FiLM (+ residual) + ReLU
# --------------------------------------------------------------------------
def _make_norm_kernel(inv_count, with_residual):
    def kernel(y_ref, s_ref, g_ref, b_ref, *rest):
        if with_residual:
            r_ref, o_ref = rest
        else:
            (o_ref,) = rest
        mean = s_ref[0:1, :] * inv_count
        var = s_ref[1:2, :] * inv_count - mean * mean       # sum-sq identity
        a = g_ref[...] * lax.rsqrt(var + EPS)               # fused BN*FiLM scale
        c = b_ref[...] - mean * a                           # fused BN*FiLM shift
        z = y_ref[0] * a + c
        if with_residual:
            z = z + r_ref[0]
        o_ref[0] = jnp.maximum(z, 0.0)

    return kernel


def _norm_film_relu(y, stats, g, b, count, residual=None):
    n, mv, pp = y.shape
    in_specs = [pl.BlockSpec((1, mv, pp), lambda i: (i, 0, 0)),
                pl.BlockSpec((2, pp), lambda i: (0, 0)),
                pl.BlockSpec((1, pp), lambda i: (0, 0)),
                pl.BlockSpec((1, pp), lambda i: (0, 0))]
    args = [y, stats, g, b]
    if residual is not None:
        in_specs.append(pl.BlockSpec((1, mv, pp), lambda i: (i, 0, 0)))
        args.append(residual)
    return pl.pallas_call(
        _make_norm_kernel(1.0 / float(count), residual is not None),
        out_shape=jax.ShapeDtypeStruct((n, mv, pp), jnp.float32),
        grid=(n,),
        in_specs=in_specs,
        out_specs=pl.BlockSpec((1, mv, pp), lambda i: (i, 0, 0)),
        compiler_params=pltpu.CompilerParams(
            dimension_semantics=("parallel",),    # megacore-shardable on v7x
            vmem_limit_bytes=VMEM_LIMIT),
    )(*args)


# --------------------------------------------------------------------------
# Glue (plain JAX, pure layout): padding / flattening / parameter packing
# --------------------------------------------------------------------------
def _flatten_conv_input(x_nhwc):
    """Zero-pad rows (1,2) / cols (1,1) and flatten rows for the shifted GEMMs."""
    n, h, w, _ = x_nhwc.shape
    xp = jnp.pad(x_nhwc, ((0, 0), (1, 2), (1, 1), (0, 0)))
    return xp.reshape(n, (h + 3) * (w + 2), x_nhwc.shape[-1]).astype(jnp.bfloat16)


def _conv_weight_taps(w_oihw, pp):
    """(O, I, 3, 3) -> (9, I, Pp) bf16 with taps ordered kh*3+kw, O padded to Pp."""
    o, i = w_oihw.shape[0], w_oihw.shape[1]
    w9 = jnp.transpose(w_oihw, (2, 3, 1, 0)).reshape(9, i, o)
    return jnp.pad(w9, ((0, 0), (0, 0), (0, pp - o))).astype(jnp.bfloat16)


def _pad_vec(v, pp):
    return jnp.pad(v, (0, pp - v.shape[0])).reshape(1, pp).astype(jnp.float32)


def init_basic_block_params(key, in_planes, planes):
    """Deterministic synthetic parameters. Conv weights in PyTorch OIHW layout."""
    k1, k2, k3, k4, k5, k6 = jax.random.split(key, 6)
    s1 = (2.0 / (in_planes * 9)) ** 0.5
    s2 = (2.0 / (planes * 9)) ** 0.5
    return {
        "w1": jax.random.normal(k1, (planes, in_planes, 3, 3), jnp.float32) * s1,
        "w2": jax.random.normal(k2, (planes, planes, 3, 3), jnp.float32) * s2,
        # TODO(synk): conv_task.forward calls film() without factor/bias (would raise
        # in PyTorch); deterministic per-channel FiLM factor/bias are synthesized.
        "g1": 1.0 + 0.1 * jax.random.normal(k3, (planes,), jnp.float32),
        "b1": 0.1 * jax.random.normal(k4, (planes,), jnp.float32),
        "g2": 1.0 + 0.1 * jax.random.normal(k5, (planes,), jnp.float32),
        "b2": 0.1 * jax.random.normal(k6, (planes,), jnp.float32),
    }


@jax.jit
def basic_block_forward(x_nchw, params):
    """BasicBlock(in_planes, planes, stride=1, shortcut=0).forward — NCHW in/out."""
    # TODO(synk): stride > 1 and shortcut == 1 (AvgPool2d(2) + zero-channel concat),
    # and the surrounding ResNet composition (pre_layers_conv / film_generator /
    # avgpool / per-task linear heads) are not implemented; this reproduces the
    # default BasicBlock(stride=1, shortcut=0) hot path.
    n, cin, h, w = x_nchw.shape
    planes = params["w1"].shape[0]
    pp = _round_up(planes, LANE)
    count = n * h * w
    x_nhwc = jnp.transpose(x_nchw, (0, 2, 3, 1)).astype(jnp.float32)

    # ---- conv_task #1: conv3x3 -> BN(batch stats, affine=False) -> FiLM -> ReLU ----
    y1, s1 = _conv3x3_stats(_flatten_conv_input(x_nhwc),
                            _conv_weight_taps(params["w1"], pp), h, w)
    h1 = _norm_film_relu(y1, s1, _pad_vec(params["g1"], pp),
                         _pad_vec(params["b1"], pp), count)

    # Repack h1 (drop garbage cols / channel padding) as the next conv's input.
    # TODO(synk): this single HBM round trip could be removed by fusing the
    # conv1 epilogue into conv2's GEMM with pltpu.emit_pipeline.
    h1_img = h1.reshape(n, h, w + 2, pp)[:, :, :w, :planes]

    # ---- conv_task #2: conv3x3 -> BN -> FiLM, then += residual, ReLU ----
    y2, s2 = _conv3x3_stats(_flatten_conv_input(h1_img),
                            _conv_weight_taps(params["w2"], pp), h, w)
    residual = jnp.pad(x_nhwc, ((0, 0), (0, 0), (0, 2), (0, pp - cin)))
    residual = residual.reshape(n, h * (w + 2), pp)
    out = _norm_film_relu(y2, s2, _pad_vec(params["g2"], pp),
                          _pad_vec(params["b2"], pp), count, residual)

    out = out.reshape(n, h, w + 2, pp)[:, :, :w, :planes]
    return jnp.transpose(out, (0, 3, 1, 2))


# --------------------------------------------------------------------------
# Pure-JAX reference (sanity check only)
# --------------------------------------------------------------------------
def _reference_forward(x, params):
    def conv(z, wgt):
        return lax.conv_general_dilated(
            z, wgt, window_strides=(1, 1), padding=((1, 1), (1, 1)),
            dimension_numbers=("NCHW", "OIHW", "NCHW"),
            precision=lax.Precision.HIGHEST)

    def bn_film(z, g, b):
        mean = jnp.mean(z, axis=(0, 2, 3), keepdims=True)
        var = jnp.mean((z - mean) ** 2, axis=(0, 2, 3), keepdims=True)
        zn = (z - mean) * lax.rsqrt(var + EPS)
        return zn * g.reshape(1, -1, 1, 1) + b.reshape(1, -1, 1, 1)

    y = bn_film(conv(x, params["w1"]), params["g1"], params["b1"])
    y = jnp.maximum(y, 0.0)
    y = bn_film(conv(y, params["w2"]), params["g2"], params["b2"])
    return jnp.maximum(y + x, 0.0)


if __name__ == "__main__":
    key = jax.random.PRNGKey(0)
    kx, kp = jax.random.split(key)
    x = jax.random.normal(kx, (2, 4, 16, 16), jnp.float32)   # NCHW, in_planes=planes=4
    params = init_basic_block_params(kp, in_planes=4, planes=4)

    out = jax.block_until_ready(basic_block_forward(x, params))

    assert out.shape == (2, 4, 16, 16) and out.dtype == jnp.float32
    assert bool(jnp.all(jnp.isfinite(out)))

    ref = _reference_forward(x, params)
    max_err = float(jnp.max(jnp.abs(out - ref)))
    # bf16 MXU operands (per the perf review) -> slightly relaxed tolerance.
    assert jnp.allclose(out, ref, atol=5e-2, rtol=5e-2), f"max abs err = {max_err}"

    print("KERNEL_OK")
</pallas_src>

<mosaic_0001>
module attributes {stable_mosaic.version = 11 : i64} {
  func.func @kernel(%arg0: i32, %arg1: memref<1x288x128xf32, #tpu.memory_space<vmem>>, %arg2: memref<2x128xf32, #tpu.memory_space<vmem>>, %arg3: memref<1x128xf32, #tpu.memory_space<vmem>>, %arg4: memref<1x128xf32, #tpu.memory_space<vmem>>, %arg5: memref<1x288x128xf32, #tpu.memory_space<vmem>>) attributes {dimension_semantics = [#tpu.dimension_semantics<parallel>], iteration_bounds = array<i64: 2>, scalar_prefetch = 0 : i64, scratch_operands = 0 : i64, tpu.core_type = #tpu.core_type<tc>, window_params = [{transform_indices = @transform_0, window_bounds = array<i64: 1, 288, 128>}, {pipeline_mode = #tpu.pipeline_mode<synchronous>, transform_indices = @transform_1, window_bounds = array<i64: 2, 128>}, {pipeline_mode = #tpu.pipeline_mode<synchronous>, transform_indices = @transform_2, window_bounds = array<i64: 1, 128>}, {pipeline_mode = #tpu.pipeline_mode<synchronous>, transform_indices = @transform_3, window_bounds = array<i64: 1, 128>}, {transform_indices = @transform_4, window_bounds = array<i64: 1, 288, 128>}]} {
    %c0 = arith.constant 0 : index
    %c0_0 = arith.constant 0 : index
    %0 = vector.load %arg2[%c0, %c0_0] : memref<2x128xf32, #tpu.memory_space<vmem>>, vector<1x128xf32>
    %cst = arith.constant 0.001953125 : f32
    %1 = vector.broadcast %cst : f32 to vector<1x128xf32>
    %2 = arith.mulf %0, %1 : vector<1x128xf32>
    %c1 = arith.constant 1 : index
    %c0_1 = arith.constant 0 : index
    %3 = vector.load %arg2[%c1, %c0_1] : memref<2x128xf32, #tpu.memory_space<vmem>>, vector<1x128xf32>
    %cst_2 = arith.constant 0.001953125 : f32
    %4 = vector.broadcast %cst_2 : f32 to vector<1x128xf32>
    %5 = arith.mulf %3, %4 : vector<1x128xf32>
    %6 = arith.mulf %2, %2 : vector<1x128xf32>
    %7 = arith.subf %5, %6 : vector<1x128xf32>
    %c0_3 = arith.constant 0 : index
    %c0_4 = arith.constant 0 : index
    %8 = vector.load %arg3[%c0_3, %c0_4] : memref<1x128xf32, #tpu.memory_space<vmem>>, vector<1x128xf32>
    %cst_5 = arith.constant 9.99999974E-6 : f32
    %9 = vector.broadcast %cst_5 : f32 to vector<1x128xf32>
    %10 = arith.addf %7, %9 : vector<1x128xf32>
    %11 = math.rsqrt %10 : vector<1x128xf32>
    %12 = arith.mulf %8, %11 : vector<1x128xf32>
    %c0_6 = arith.constant 0 : index
    %c0_7 = arith.constant 0 : index
    %13 = vector.load %arg4[%c0_6, %c0_7] : memref<1x128xf32, #tpu.memory_space<vmem>>, vector<1x128xf32>
    %14 = arith.mulf %2, %12 : vector<1x128xf32>
    %15 = arith.subf %13, %14 : vector<1x128xf32>
    %c0_8 = arith.constant 0 : index
    %c0_9 = arith.constant 0 : index
    %c0_10 = arith.constant 0 : index
    %16 = vector.load %arg1[%c0_8, %c0_9, %c0_10] : memref<1x288x128xf32, #tpu.memory_space<vmem>>, vector<1x288x128xf32>
    %17 = vector.shape_cast %16 : vector<1x288x128xf32> to vector<288x128xf32>
    %18 = vector.broadcast %12 : vector<1x128xf32> to vector<288x128xf32>
    %19 = arith.mulf %17, %18 : vector<288x128xf32>
    %20 = vector.broadcast %15 : vector<1x128xf32> to vector<288x128xf32>
    %21 = arith.addf %19, %20 : vector<288x128xf32>
    %cst_11 = arith.constant 0.000000e+00 : f32
    %22 = vector.broadcast %cst_11 : f32 to vector<288x128xf32>
    %23 = arith.maximumf %21, %22 : vector<288x128xf32>
    %c0_12 = arith.constant 0 : index
    %c0_13 = arith.constant 0 : index
    %c0_14 = arith.constant 0 : index
    %24 = vector.load %arg5[%c0_12, %c0_13, %c0_14] : memref<1x288x128xf32, #tpu.memory_space<vmem>>, vector<1x288x128xf32>
    %25 = vector.shape_cast %24 : vector<1x288x128xf32> to vector<288x128xf32>
    %26 = vector.shape_cast %23 : vector<288x128xf32> to vector<1x288x128xf32>
    tpu.vector_store %arg5[%c0_12, %c0_13, %c0_14], %26 {strides = array<i32>} : memref<1x288x128xf32, #tpu.memory_space<vmem>>, vector<1x288x128xf32>,
    return
  }
  func.func @transform_0(%arg0: i32) -> (i32, i32, i32) {
    %c0_i32 = arith.constant 0 : i32
    %c0_i32_0 = arith.constant 0 : i32
    %c0_i32_1 = arith.constant 0 : i32
    return %arg0, %c0_i32, %c0_i32_0 : i32, i32, i32
  }
  func.func @transform_1(%arg0: i32) -> (i32, i32) {
    %c0_i32 = arith.constant 0 : i32
    %c0_i32_0 = arith.constant 0 : i32
    %c0_i32_1 = arith.constant 0 : i32
    return %c0_i32, %c0_i32_0 : i32, i32
  }
  func.func @transform_2(%arg0: i32) -> (i32, i32) {
    %c0_i32 = arith.constant 0 : i32
    %c0_i32_0 = arith.constant 0 : i32
    %c0_i32_1 = arith.constant 0 : i32
    return %c0_i32, %c0_i32_0 : i32, i32
  }
  func.func @transform_3(%arg0: i32) -> (i32, i32) {
    %c0_i32 = arith.constant 0 : i32
    %c0_i32_0 = arith.constant 0 : i32
    %c0_i32_1 = arith.constant 0 : i32
    return %c0_i32, %c0_i32_0 : i32, i32
  }
  func.func @transform_4(%arg0: i32) -> (i32, i32, i32) {
    %c0_i32 = arith.constant 0 : i32
    %c0_i32_0 = arith.constant 0 : i32
    %c0_i32_1 = arith.constant 0 : i32
    return %arg0, %c0_i32, %c0_i32_0 : i32, i32, i32
  }
}

module attributes {stable_mosaic.version = 11 : i64} {
  func.func @kernel(%arg0: i32, %arg1: memref<1x342x4xbf16, #tpu.memory_space<vmem>>, %arg2: memref<9x4x128xbf16, #tpu.memory_space<vmem>>, %arg3: memref<1x288x128xf32, #tpu.memory_space<vmem>>, %arg4: memref<2x128xf32, #tpu.memory_space<vmem>>) attributes {dimension_semantics = [#tpu.dimension_semantics<arbitrary>], iteration_bounds = array<i64: 2>, scalar_prefetch = 0 : i64, scratch_operands = 0 : i64, tpu.core_type = #tpu.core_type<tc>, window_params = [{transform_indices = @transform_0, window_bounds = array<i64: 1, 342, 4>}, {pipeline_mode = #tpu.pipeline_mode<synchronous>, transform_indices = @transform_1, window_bounds = array<i64: 9, 4, 128>}, {transform_indices = @transform_2, window_bounds = array<i64: 1, 288, 128>}, {pipeline_mode = #tpu.pipeline_mode<synchronous>, transform_indices = @transform_3, window_bounds = array<i64: 2, 128>}]} {
    %c0_i32 = arith.constant 0 : i32
    %0 = arith.cmpi eq, %arg0, %c0_i32 : i32
    %1 = arith.extui %0 : i1 to i32
    %c0_i32_0 = arith.constant 0 : i32
    %2 = arith.cmpi ne, %1, %c0_i32_0 : i32
    scf.if %2 {
      %cst_62 = arith.constant 0.000000e+00 : f32
      %89 = vector.broadcast %cst_62 : f32 to vector<2x128xf32>
      %c0_63 = arith.constant 0 : index
      %c0_64 = arith.constant 0 : index
      %90 = vector.load %arg4[%c0_63, %c0_64] : memref<2x128xf32, #tpu.memory_space<vmem>>, vector<2x128xf32>
      tpu.vector_store %arg4[%c0_63, %c0_64], %89 {strides = array<i32>} : memref<2x128xf32, #tpu.memory_space<vmem>>, vector<2x128xf32>,
    } else {
    }
    %c0 = arith.constant 0 : index
    %c0_1 = arith.constant 0 : index
    %c0_2 = arith.constant 0 : index
    %3 = vector.load %arg1[%c0, %c0_1, %c0_2] : memref<1x342x4xbf16, #tpu.memory_space<vmem>>, vector<1x288x4xbf16>
    %4 = vector.shape_cast %3 : vector<1x288x4xbf16> to vector<288x4xbf16>
    %c0_3 = arith.constant 0 : index
    %c0_4 = arith.constant 0 : index
    %c0_5 = arith.constant 0 : index
    %5 = vector.load %arg2[%c0_3, %c0_4, %c0_5] : memref<9x4x128xbf16, #tpu.memory_space<vmem>>, vector<1x4x128xbf16>
    %6 = vector.shape_cast %5 : vector<1x4x128xbf16> to vector<4x128xbf16>
    %cst = arith.constant dense<0.000000e+00> : vector<288x128xf32>
    %7 = tpu.matmul %4, %6, %cst {dimension_numbers = #tpu.dot_dimension_numbers<[1], [0], [0], [1], [0, 0, 1, 1], [], []>} : vector<288x4xbf16>, vector<4x128xbf16>, vector<288x128xf32> -> vector<288x128xf32>
    %c0_6 = arith.constant 0 : index
    %c1 = arith.constant 1 : index
    %c0_7 = arith.constant 0 : index
    %8 = vector.load %arg1[%c0_6, %c1, %c0_7] : memref<1x342x4xbf16, #tpu.memory_space<vmem>>, vector<1x288x4xbf16>
    %9 = vector.shape_cast %8 : vector<1x288x4xbf16> to vector<288x4xbf16>
    %c1_8 = arith.constant 1 : index
    %c0_9 = arith.constant 0 : index
    %c0_10 = arith.constant 0 : index
    %10 = vector.load %arg2[%c1_8, %c0_9, %c0_10] : memref<9x4x128xbf16, #tpu.memory_space<vmem>>, vector<1x4x128xbf16>
    %11 = vector.shape_cast %10 : vector<1x4x128xbf16> to vector<4x128xbf16>
    %cst_11 = arith.constant dense<0.000000e+00> : vector<288x128xf32>
    %12 = tpu.matmul %9, %11, %cst_11 {dimension_numbers = #tpu.dot_dimension_numbers<[1], [0], [0], [1], [0, 0, 1, 1], [], []>} : vector<288x4xbf16>, vector<4x128xbf16>, vector<288x128xf32> -> vector<288x128xf32>
    %13 = arith.addf %7, %12 : vector<288x128xf32>
    %c0_12 = arith.constant 0 : index
    %c2 = arith.constant 2 : index
    %c0_13 = arith.constant 0 : index
    %14 = vector.load %arg1[%c0_12, %c2, %c0_13] : memref<1x342x4xbf16, #tpu.memory_space<vmem>>, vector<1x288x4xbf16>
    %15 = vector.shape_cast %14 : vector<1x288x4xbf16> to vector<288x4xbf16>
    %c2_14 = arith.constant 2 : index
    %c0_15 = arith.constant 0 : index
    %c0_16 = arith.constant 0 : index
    %16 = vector.load %arg2[%c2_14, %c0_15, %c0_16] : memref<9x4x128xbf16, #tpu.memory_space<vmem>>, vector<1x4x128xbf16>
    %17 = vector.shape_cast %16 : vector<1x4x128xbf16> to vector<4x128xbf16>
    %cst_17 = arith.constant dense<0.000000e+00> : vector<288x128xf32>
    %18 = tpu.matmul %15, %17, %cst_17 {dimension_numbers = #tpu.dot_dimension_numbers<[1], [0], [0], [1], [0, 0, 1, 1], [], []>} : vector<288x4xbf16>, vector<4x128xbf16>, vector<288x128xf32> -> vector<288x128xf32>
    %19 = arith.addf %13, %18 : vector<288x128xf32>
    %c0_18 = arith.constant 0 : index
    %c18 = arith.constant 18 : index
    %c0_19 = arith.constant 0 : index
    %20 = vector.load %arg1[%c0_18, %c18, %c0_19] : memref<1x342x4xbf16, #tpu.memory_space<vmem>>, vector<1x288x4xbf16>
    %21 = vector.shape_cast %20 : vector<1x288x4xbf16> to vector<288x4xbf16>
    %c3 = arith.constant 3 : index
    %c0_20 = arith.constant 0 : index
    %c0_21 = arith.constant 0 : index
    %22 = vector.load %arg2[%c3, %c0_20, %c0_21] : memref<9x4x128xbf16, #tpu.memory_space<vmem>>, vector<1x4x128xbf16>
    %23 = vector.shape_cast %22 : vector<1x4x128xbf16> to vector<4x128xbf16>
    %cst_22 = arith.constant dense<0.000000e+00> : vector<288x128xf32>
    %24 = tpu.matmul %21, %23, %cst_22 {dimension_numbers = #tpu.dot_dimension_numbers<[1], [0], [0], [1], [0, 0, 1, 1], [], []>} : vector<288x4xbf16>, vector<4x128xbf16>, vector<288x128xf32> -> vector<288x128xf32>
    %25 = arith.addf %19, %24 : vector<288x128xf32>
    %c0_23 = arith.constant 0 : index
    %c19 = arith.constant 19 : index
    %c0_24 = arith.constant 0 : index
    %26 = vector.load %arg1[%c0_23, %c19, %c0_24] : memref<1x342x4xbf16, #tpu.memory_space<vmem>>, vector<1x288x4xbf16>
    %27 = vector.shape_cast %26 : vector<1x288x4xbf16> to vector<288x4xbf16>
    %c4 = arith.constant 4 : index
    %c0_25 = arith.constant 0 : index
    %c0_26 = arith.constant 0 : index
    %28 = vector.load %arg2[%c4, %c0_25, %c0_26] : memref<9x4x128xbf16, #tpu.memory_space<vmem>>, vector<1x4x128xbf16>
    %29 = vector.shape_cast %28 : vector<1x4x128xbf16> to vector<4x128xbf16>
    %cst_27 = arith.constant dense<0.000000e+00> : vector<288x128xf32>
    %30 = tpu.matmul %27, %29, %cst_27 {dimension_numbers = #tpu.dot_dimension_numbers<[1], [0], [0], [1], [0, 0, 1, 1], [], []>} : vector<288x4xbf16>, vector<4x128xbf16>, vector<288x128xf32> -> vector<288x128xf32>
    %31 = arith.addf %25, %30 : vector<288x128xf32>
    %c0_28 = arith.constant 0 : index
    %c20 = arith.constant 20 : index
    %c0_29 = arith.constant 0 : index
    %32 = vector.load %arg1[%c0_28, %c20, %c0_29] : memref<1x342x4xbf16, #tpu.memory_space<vmem>>, vector<1x288x4xbf16>
    %33 = vector.shape_cast %32 : vector<1x288x4xbf16> to vector<288x4xbf16>
    %c5 = arith.constant 5 : index
    %c0_30 = arith.constant 0 : index
    %c0_31 = arith.constant 0 : index
    %34 = vector.load %arg2[%c5, %c0_30, %c0_31] : memref<9x4x128xbf16, #tpu.memory_space<vmem>>, vector<1x4x128xbf16>
    %35 = vector.shape_cast %34 : vector<1x4x128xbf16> to vector<4x128xbf16>
    %cst_32 = arith.constant dense<0.000000e+00> : vector<288x128xf32>
    %36 = tpu.matmul %33, %35, %cst_32 {dimension_numbers = #tpu.dot_dimension_numbers<[1], [0], [0], [1], [0, 0, 1, 1], [], []>} : vector<288x4xbf16>, vector<4x128xbf16>, vector<288x128xf32> -> vector<288x128xf32>
    %37 = arith.addf %31, %36 : vector<288x128xf32>
    %c0_33 = arith.constant 0 : index
    %c36 = arith.constant 36 : index
    %c0_34 = arith.constant 0 : index
    %38 = vector.load %arg1[%c0_33, %c36, %c0_34] : memref<1x342x4xbf16, #tpu.memory_space<vmem>>, vector<1x288x4xbf16>
    %39 = vector.shape_cast %38 : vector<1x288x4xbf16> to vector<288x4xbf16>
    %c6 = arith.constant 6 : index
    %c0_35 = arith.constant 0 : index
    %c0_36 = arith.constant 0 : index
    %40 = vector.load %arg2[%c6, %c0_35, %c0_36] : memref<9x4x128xbf16, #tpu.memory_space<vmem>>, vector<1x4x128xbf16>
    %41 = vector.shape_cast %40 : vector<1x4x128xbf16> to vector<4x128xbf16>
    %cst_37 = arith.constant dense<0.000000e+00> : vector<288x128xf32>
    %42 = tpu.matmul %39, %41, %cst_37 {dimension_numbers = #tpu.dot_dimension_numbers<[1], [0], [0], [1], [0, 0, 1, 1], [], []>} : vector<288x4xbf16>, vector<4x128xbf16>, vector<288x128xf32> -> vector<288x128xf32>
    %43 = arith.addf %37, %42 : vector<288x128xf32>
    %c0_38 = arith.constant 0 : index
    %c37 = arith.constant 37 : index
    %c0_39 = arith.constant 0 : index
    %44 = vector.load %arg1[%c0_38, %c37, %c0_39] : memref<1x342x4xbf16, #tpu.memory_space<vmem>>, vector<1x288x4xbf16>
    %45 = vector.shape_cast %44 : vector<1x288x4xbf16> to vector<288x4xbf16>
    %c7 = arith.constant 7 : index
    %c0_40 = arith.constant 0 : index
    %c0_41 = arith.constant 0 : index
    %46 = vector.load %arg2[%c7, %c0_40, %c0_41] : memref<9x4x128xbf16, #tpu.memory_space<vmem>>, vector<1x4x128xbf16>
    %47 = vector.shape_cast %46 : vector<1x4x128xbf16> to vector<4x128xbf16>
    %cst_42 = arith.constant dense<0.000000e+00> : vector<288x128xf32>
    %48 = tpu.matmul %45, %47, %cst_42 {dimension_numbers = #tpu.dot_dimension_numbers<[1], [0], [0], [1], [0, 0, 1, 1], [], []>} : vector<288x4xbf16>, vector<4x128xbf16>, vector<288x128xf32> -> vector<288x128xf32>
    %49 = arith.addf %43, %48 : vector<288x128xf32>
    %c0_43 = arith.constant 0 : index
    %c38 = arith.constant 38 : index
    %c0_44 = arith.constant 0 : index
    %50 = vector.load %arg1[%c0_43, %c38, %c0_44] : memref<1x342x4xbf16, #tpu.memory_space<vmem>>, vector<1x288x4xbf16>
    %51 = vector.shape_cast %50 : vector<1x288x4xbf16> to vector<288x4xbf16>
    %c8 = arith.constant 8 : index
    %c0_45 = arith.constant 0 : index
    %c0_46 = arith.constant 0 : index
    %52 = vector.load %arg2[%c8, %c0_45, %c0_46] : memref<9x4x128xbf16, #tpu.memory_space<vmem>>, vector<1x4x128xbf16>
    %53 = vector.shape_cast %52 : vector<1x4x128xbf16> to vector<4x128xbf16>
    %cst_47 = arith.constant dense<0.000000e+00> : vector<288x128xf32>
    %54 = tpu.matmul %51, %53, %cst_47 {dimension_numbers = #tpu.dot_dimension_numbers<[1], [0], [0], [1], [0, 0, 1, 1], [], []>} : vector<288x4xbf16>, vector<4x128xbf16>, vector<288x128xf32> -> vector<288x128xf32>
    %55 = arith.addf %49, %54 : vector<288x128xf32>
    %c0_48 = arith.constant 0 : index
    %c0_49 = arith.constant 0 : index
    %c0_50 = arith.constant 0 : index
    %56 = vector.load %arg3[%c0_48, %c0_49, %c0_50] : memref<1x288x128xf32, #tpu.memory_space<vmem>>, vector<1x288x128xf32>
    %57 = vector.shape_cast %56 : vector<1x288x128xf32> to vector<288x128xf32>
    %58 = vector.shape_cast %55 : vector<288x128xf32> to vector<1x288x128xf32>
    tpu.vector_store %arg3[%c0_48, %c0_49, %c0_50], %58 {strides = array<i32>} : memref<1x288x128xf32, #tpu.memory_space<vmem>>, vector<1x288x128xf32>,
    %59 = tpu.iota {dimensions = array<i32: 0>} : vector<288x128xi32>
    %c18_i32 = arith.constant 18 : i32
    %c0_i32_51 = arith.constant 0 : i32
    %60 = arith.cmpi eq, %c18_i32, %c0_i32_51 : i32
    %c1_i32 = arith.constant 1 : i32
    %61 = arith.select %60, %c1_i32, %c18_i32 : i32
    %62 = vector.broadcast %61 : i32 to vector<288x128xi32>
    %63 = arith.remsi %59, %62 : vector<288x128xi32>
    %c0_i32_52 = arith.constant 0 : i32
    %64 = vector.broadcast %c0_i32_52 : i32 to vector<288x128xi32>
    %65 = arith.cmpi ne, %63, %64 : vector<288x128xi32>
    %c0_i32_53 = arith.constant 0 : i32
    %66 = vector.broadcast %c0_i32_53 : i32 to vector<288x128xi32>
    %67 = arith.cmpi slt, %63, %66 : vector<288x128xi32>
    %c0_i32_54 = arith.constant 0 : i32
    %68 = arith.cmpi slt, %61, %c0_i32_54 : i32
    %69 = vector.broadcast %68 : i1 to vector<288x128xi1>
    %70 = vector.broadcast %69 : vector<288x128xi1> to vector<288x128xi1>
    %71 = arith.xori %67, %70 : vector<288x128xi1>
    %72 = arith.andi %71, %65 : vector<288x128xi1>
    %73 = vector.broadcast %61 : i32 to vector<288x128xi32>
    %74 = arith.addi %63, %73 : vector<288x128xi32>
    %75 = arith.select %72, %74, %63 : vector<288x128xi1>, vector<288x128xi32>
    %c16_i32 = arith.constant 16 : i32
    %76 = vector.broadcast %c16_i32 : i32 to vector<288x128xi32>
    %77 = arith.cmpi slt, %75, %76 : vector<288x128xi32>
    %cst_55 = arith.constant 0.000000e+00 : f32
    %78 = vector.broadcast %cst_55 : f32 to vector<288x128xf32>
    %79 = arith.select %77, %55, %78 : vector<288x128xi1>, vector<288x128xf32>
    %c0_56 = arith.constant 0 : index
    %c0_57 = arith.constant 0 : index
    %80 = vector.load %arg4[%c0_56, %c0_57] : memref<2x128xf32, #tpu.memory_space<vmem>>, vector<2x128xf32>
    %cst_58 = arith.constant dense<0.000000e+00> : vector<128xf32>
    %81 = vector.multi_reduction <add>, %79, %cst_58 [0] : vector<288x128xf32> to vector<128xf32>
    %82 = vector.shape_cast %81 : vector<128xf32> to vector<1x128xf32>
    %83 = arith.mulf %79, %55 : vector<288x128xf32>
    %cst_59 = arith.constant dense<0.000000e+00> : vector<128xf32>
    %84 = vector.multi_reduction <add>, %83, %cst_59 [0] : vector<288x128xf32> to vector<128xf32>
    %85 = vector.shape_cast %84 : vector<128xf32> to vector<1x128xf32>
    %86 = tpu.concatenate %82, %85 in 0 : vector<1x128xf32>, vector<1x128xf32> -> vector<2x128xf32>
    %87 = arith.addf %80, %86 : vector<2x128xf32>
    %c0_60 = arith.constant 0 : index
    %c0_61 = arith.constant 0 : index
    %88 = vector.load %arg4[%c0_60, %c0_61] : memref<2x128xf32, #tpu.memory_space<vmem>>, vector<2x128xf32>
    tpu.vector_store %arg4[%c0_60, %c0_61], %87 {strides = array<i32>} : memref<2x128xf32, #tpu.memory_space<vmem>>, vector<2x128xf32>,
    return
  }
  func.func @transform_0(%arg0: i32) -> (i32, i32, i32) {
    %c0_i32 = arith.constant 0 : i32
    %c0_i32_0 = arith.constant 0 : i32
    %c0_i32_1 = arith.constant 0 : i32
    return %arg0, %c0_i32, %c0_i32_0 : i32, i32, i32
  }
  func.func @transform_1(%arg0: i32) -> (i32, i32, i32) {
    %c0_i32 = arith.constant 0 : i32
    %c0_i32_0 = arith.constant 0 : i32
    %c0_i32_1 = arith.constant 0 : i32
    %c0_i32_2 = arith.constant 0 : i32
    return %c0_i32, %c0_i32_0, %c0_i32_1 : i32, i32, i32
  }
  func.func @transform_2(%arg0: i32) -> (i32, i32, i32) {
    %c0_i32 = arith.constant 0 : i32
    %c0_i32_0 = arith.constant 0 : i32
    %c0_i32_1 = arith.constant 0 : i32
    return %arg0, %c0_i32, %c0_i32_0 : i32, i32, i32
  }
  func.func @transform_3(%arg0: i32) -> (i32, i32) {
    %c0_i32 = arith.constant 0 : i32
    %c0_i32_0 = arith.constant 0 : i32
    %c0_i32_1 = arith.constant 0 : i32
    return %c0_i32, %c0_i32_0 : i32, i32
  }
}

module attributes {stable_mosaic.version = 11 : i64} {
  func.func @kernel(%arg0: i32, %arg1: memref<1x288x128xf32, #tpu.memory_space<vmem>>, %arg2: memref<2x128xf32, #tpu.memory_space<vmem>>, %arg3: memref<1x128xf32, #tpu.memory_space<vmem>>, %arg4: memref<1x128xf32, #tpu.memory_space<vmem>>, %arg5: memref<1x288x128xf32, #tpu.memory_space<vmem>>, %arg6: memref<1x288x128xf32, #tpu.memory_space<vmem>>) attributes {dimension_semantics = [#tpu.dimension_semantics<parallel>], iteration_bounds = array<i64: 2>, scalar_prefetch = 0 : i64, scratch_operands = 0 : i64, tpu.core_type = #tpu.core_type<tc>, window_params = [{transform_indices = @transform_0, window_bounds = array<i64: 1, 288, 128>}, {pipeline_mode = #tpu.pipeline_mode<synchronous>, transform_indices = @transform_1, window_bounds = array<i64: 2, 128>}, {pipeline_mode = #tpu.pipeline_mode<synchronous>, transform_indices = @transform_2, window_bounds = array<i64: 1, 128>}, {pipeline_mode = #tpu.pipeline_mode<synchronous>, transform_indices = @transform_3, window_bounds = array<i64: 1, 128>}, {transform_indices = @transform_4, window_bounds = array<i64: 1, 288, 128>}, {transform_indices = @transform_5, window_bounds = array<i64: 1, 288, 128>}]} {
    %c0 = arith.constant 0 : index
    %c0_0 = arith.constant 0 : index
    %0 = vector.load %arg2[%c0, %c0_0] : memref<2x128xf32, #tpu.memory_space<vmem>>, vector<1x128xf32>
    %cst = arith.constant 0.001953125 : f32
    %1 = vector.broadcast %cst : f32 to vector<1x128xf32>
    %2 = arith.mulf %0, %1 : vector<1x128xf32>
    %c1 = arith.constant 1 : index
    %c0_1 = arith.constant 0 : index
    %3 = vector.load %arg2[%c1, %c0_1] : memref<2x128xf32, #tpu.memory_space<vmem>>, vector<1x128xf32>
    %cst_2 = arith.constant 0.001953125 : f32
    %4 = vector.broadcast %cst_2 : f32 to vector<1x128xf32>
    %5 = arith.mulf %3, %4 : vector<1x128xf32>
    %6 = arith.mulf %2, %2 : vector<1x128xf32>
    %7 = arith.subf %5, %6 : vector<1x128xf32>
    %c0_3 = arith.constant 0 : index
    %c0_4 = arith.constant 0 : index
    %8 = vector.load %arg3[%c0_3, %c0_4] : memref<1x128xf32, #tpu.memory_space<vmem>>, vector<1x128xf32>
    %cst_5 = arith.constant 9.99999974E-6 : f32
    %9 = vector.broadcast %cst_5 : f32 to vector<1x128xf32>
    %10 = arith.addf %7, %9 : vector<1x128xf32>
    %11 = math.rsqrt %10 : vector<1x128xf32>
    %12 = arith.mulf %8, %11 : vector<1x128xf32>
    %c0_6 = arith.constant 0 : index
    %c0_7 = arith.constant 0 : index
    %13 = vector.load %arg4[%c0_6, %c0_7] : memref<1x128xf32, #tpu.memory_space<vmem>>, vector<1x128xf32>
    %14 = arith.mulf %2, %12 : vector<1x128xf32>
    %15 = arith.subf %13, %14 : vector<1x128xf32>
    %c0_8 = arith.constant 0 : index
    %c0_9 = arith.constant 0 : index
    %c0_10 = arith.constant 0 : index
    %16 = vector.load %arg1[%c0_8, %c0_9, %c0_10] : memref<1x288x128xf32, #tpu.memory_space<vmem>>, vector<1x288x128xf32>
    %17 = vector.shape_cast %16 : vector<1x288x128xf32> to vector<288x128xf32>
    %18 = vector.broadcast %12 : vector<1x128xf32> to vector<288x128xf32>
    %19 = arith.mulf %17, %18 : vector<288x128xf32>
    %20 = vector.broadcast %15 : vector<1x128xf32> to vector<288x128xf32>
    %21 = arith.addf %19, %20 : vector<288x128xf32>
    %c0_11 = arith.constant 0 : index
    %c0_12 = arith.constant 0 : index
    %c0_13 = arith.constant 0 : index
    %22 = vector.load %arg5[%c0_11, %c0_12, %c0_13] : memref<1x288x128xf32, #tpu.memory_space<vmem>>, vector<1x288x128xf32>
    %23 = vector.shape_cast %22 : vector<1x288x128xf32> to vector<288x128xf32>
    %24 = arith.addf %21, %23 : vector<288x128xf32>
    %cst_14 = arith.constant 0.000000e+00 : f32
    %25 = vector.broadcast %cst_14 : f32 to vector<288x128xf32>
    %26 = arith.maximumf %24, %25 : vector<288x128xf32>
    %c0_15 = arith.constant 0 : index
    %c0_16 = arith.constant 0 : index
    %c0_17 = arith.constant 0 : index
    %27 = vector.load %arg6[%c0_15, %c0_16, %c0_17] : memref<1x288x128xf32, #tpu.memory_space<vmem>>, vector<1x288x128xf32>
    %28 = vector.shape_cast %27 : vector<1x288x128xf32> to vector<288x128xf32>
    %29 = vector.shape_cast %26 : vector<288x128xf32> to vector<1x288x128xf32>
    tpu.vector_store %arg6[%c0_15, %c0_16, %c0_17], %29 {strides = array<i32>} : memref<1x288x128xf32, #tpu.memory_space<vmem>>, vector<1x288x128xf32>,
    return
  }
  func.func @transform_0(%arg0: i32) -> (i32, i32, i32) {
    %c0_i32 = arith.constant 0 : i32
    %c0_i32_0 = arith.constant 0 : i32
    %c0_i32_1 = arith.constant 0 : i32
    return %arg0, %c0_i32, %c0_i32_0 : i32, i32, i32
  }
  func.func @transform_1(%arg0: i32) -> (i32, i32) {
    %c0_i32 = arith.constant 0 : i32
    %c0_i32_0 = arith.constant 0 : i32
    %c0_i32_1 = arith.constant 0 : i32
    return %c0_i32, %c0_i32_0 : i32, i32
  }
  func.func @transform_2(%arg0: i32) -> (i32, i32) {
    %c0_i32 = arith.constant 0 : i32
    %c0_i32_0 = arith.constant 0 : i32
    %c0_i32_1 = arith.constant 0 : i32
    return %c0_i32, %c0_i32_0 : i32, i32
  }
  func.func @transform_3(%arg0: i32) -> (i32, i32) {
    %c0_i32 = arith.constant 0 : i32
    %c0_i32_0 = arith.constant 0 : i32
    %c0_i32_1 = arith.constant 0 : i32
    return %c0_i32, %c0_i32_0 : i32, i32
  }
  func.func @transform_4(%arg0: i32) -> (i32, i32, i32) {
    %c0_i32 = arith.constant 0 : i32
    %c0_i32_0 = arith.constant 0 : i32
    %c0_i32_1 = arith.constant 0 : i32
    return %arg0, %c0_i32, %c0_i32_0 : i32, i32, i32
  }
  func.func @transform_5(%arg0: i32) -> (i32, i32, i32) {
    %c0_i32 = arith.constant 0 : i32
    %c0_i32_0 = arith.constant 0 : i32
    %c0_i32_1 = arith.constant 0 : i32
    return %arg0, %c0_i32, %c0_i32_0 : i32, i32, i32
  }
}

</mosaic_0001>

<bundles_post_ra>
// kernel: basic_block_forward.5
= control target key start
LH: loop header
LB: loop body
LE: loop exit
PB: predicated region body
PF: predicated region fallthrough
CT: control target
= control target key end

     0   :  { %s511_s15 = smov 0   ;;  %s699_s0 = inlined_call_operand.vmem [shape: f32[2,288,128], index: 0, kind: input, shape index: {}]   ;;  %s700_s1 = inlined_call_operand.vmem [shape: f32[2,128], index: 1, kind: input, shape index: {}]   ;;  %s701_s2 = inlined_call_operand.vmem [shape: f32[1,128], index: 2, kind: input, shape index: {}]   ;;  %s702_s3 = inlined_call_operand.vmem [shape: f32[1,128], index: 3, kind: input, shape index: {}]   ;;  %s703_s4 = inlined_call_operand.vmem [shape: f32[2,288,128], index: 4, kind: output, shape index: {}]  }
   0x1 LB: > { %s458_s16 = sadd.s32 4294967295, %s484_s15   ;;  %p462_p0 = scmp.ge.s32.totalorder %s484_s15, 1  ;;  %s484_s15 = sphi %s511_s15, %s14_s15  }
   0x2   : > { %p162_p1 = scmp.lt.s32.totalorder %s484_s15, 3 }
   0x4   : > { %p163_p2 = pnand %p462_p0, %p162_p1 }
   0x5   : > { %p188_p3 = scmp.lt.s32.totalorder (!%p163_p2), %s458_s16, 1 }
   0x6   : > { %166 = sbr.rel (%p163_p2) target bundleno = 71 (0x47), region = 36 }
   0xb   : > { %v198_v0 = vld [vmem:[%s700_s1] sm:$0x1]  ;;  %v200_v1 = vld [vmem:[%s700_s1 + $0x1] sm:$0x1]  ;;  %s705_s16 = smov (!%p188_p3, %s458_s16), 1  ;;  %v248_v7 = vlaneseq }
   0xc   : > { %v199_v2 = vmul.f32 0.001953125, %v198_v0  ;;  %v201_v3 = vmul.f32 0.001953125, %v200_v1  ;;  %s467_s21 = smul.u32 288, %s705_s16  ;;  %v204_v9 = vld [vmem:[%s701_s2] sm:$0x1] }
   0xd   : > { %v249_v8 = vshrl.u32 %v248_v7, 7  ;;  %v208_v13 = vld [vmem:[%s702_s3] sm:$0x1] }
   0xe   : > { %v202_v4 = vmul.f32 %v199_v2, %v199_v2  ;;  %s533_s24 = scalar_lea.vmem %s699_s0, %s467_s21  ;;  %s582_s5 = scalar_lea.vmem %s703_s4, %s467_s21 }
   0xf   : > { %v250_v10 = vsub.s32 0, %v249_v8  ;;  %v211_v14 = vld [vmem:[%s533_s24] sm:$0xff]  ;;  %v212_v15 = vld [vmem:[%s533_s24 + $0x8] sm:$0xff]  ;;  %v213_v16 = vld [vmem:[%s533_s24 + $0x10] sm:$0xff] }
  0x10   : > { %v203_v5 = vsub.f32 %v201_v3, %v202_v4  ;;  %v214_v17 = vld [vmem:[%s533_s24 + $0x18] sm:$0xff]  ;;  %v215_v18 = vld [vmem:[%s533_s24 + $0x20] sm:$0xff]  ;;  %v216_v21 = vld [vmem:[%s533_s24 + $0x28] sm:$0xff] }
  0x11   : > { %v217_v22 = vld [vmem:[%s533_s24 + $0x30] sm:$0xff]  ;;  %v218_v23 = vld [vmem:[%s533_s24 + $0x38] sm:$0xff]  ;;  %v219_v24 = vld [vmem:[%s533_s24 + $0x40] sm:$0xff] }
  0x12   : > { %v205_v6 = vadd.f32 1e-05, %v203_v5  ;;  %v220_v25 = vld [vmem:[%s533_s24 + $0x48] sm:$0xff]  ;;  %v221_v26 = vld [vmem:[%s533_s24 + $0x50] sm:$0xff]  ;;  %v222_v31 = vld [vmem:[%s533_s24 + $0x58] sm:$0xff] }
  0x13   : > { %v223_v32 = vld [vmem:[%s533_s24 + $0x60] sm:$0xff]  ;;  %v224_v33 = vld [vmem:[%s533_s24 + $0x68] sm:$0xff]  ;;  %v225_v58 = vld [vmem:[%s533_s24 + $0x70] sm:$0xff] }
  0x14   : > { %476 = vrsqrt.f32 %v205_v6  ;;  %v226_v59 = vld [vmem:[%s533_s24 + $0x78] sm:$0xff]  ;;  %v227_v4 = vld [vmem:[%s533_s24 + $0x80] sm:$0xff] }
  0x21   : > { %v477_v11 = vpop.eup %476 }
  0x22   : > { %v207_v12 = vmul.f32 %v477_v11, %v204_v9  ;;  %v228_v9 = vld [vmem:[%s533_s24 + $0x88] sm:$0xff]  ;;  %v230_v11 = vld [vmem:[%s533_s24 + $0x98] sm:$0xff] }
  0x24   : > { %v209_v19 = vmul.f32 %v207_v12, %v199_v2  ;;  %v546_v20 = vrot.slane %v207_v12, %v250_v10 }
  0x26   : > { %v210_v27 = vsub.f32 %v208_v13, %v209_v19  ;;  %v253_v28 = vmul.f32 %v546_v20, %v211_v14  ;;  %v254_v29 = vmul.f32 %v546_v20, %v212_v15  ;;  %v255_v30 = vmul.f32 %v546_v20, %v213_v16  ;;  %v231_v16 = vld [vmem:[%s533_s24 + $0xa0] sm:$0xff] }
  0x27   : > { %v256_v34 = vmul.f32 %v546_v20, %v214_v17  ;;  %v257_v35 = vmul.f32 %v546_v20, %v215_v18  ;;  %v258_v36 = vmul.f32 %v546_v20, %v216_v21  ;;  %v259_v37 = vmul.f32 %v546_v20, %v217_v22  ;;  %v232_v17 = vld [vmem:[%s533_s24 + $0xa8] sm:$0xff] }
  0x28   : > { %v564_v38 = vrot.slane %v210_v27, %v250_v10  ;;  %v260_v39 = vmul.f32 %v546_v20, %v218_v23  ;;  %v261_v40 = vmul.f32 %v546_v20, %v219_v24  ;;  %v262_v41 = vmul.f32 %v546_v20, %v220_v25  ;;  %v229_v10 = vld [vmem:[%s533_s24 + $0x90] sm:$0xff] }
  0x29   : > { %v263_v42 = vmul.f32 %v546_v20, %v221_v26  ;;  %v264_v43 = vmul.f32 %v546_v20, %v222_v31  ;;  %v265_v44 = vmul.f32 %v546_v20, %v223_v32  ;;  %v266_v45 = vmul.f32 %v546_v20, %v224_v33  ;;  %v233_v27 = vld [vmem:[%s533_s24 + $0xb0] sm:$0xff] }
  0x2a   : > { %v295_v46 = vadd.f32 %v564_v38, %v253_v28  ;;  %v296_v47 = vadd.f32 %v564_v38, %v254_v29  ;;  %v297_v48 = vadd.f32 %v564_v38, %v255_v30  ;;  %v298_v49 = vadd.f32 %v564_v38, %v256_v34  ;;  %v234_v28 = vld [vmem:[%s533_s24 + $0xb8] sm:$0xff] }
  0x2b   : > { %v299_v50 = vadd.f32 %v564_v38, %v257_v35  ;;  %v300_v51 = vadd.f32 %v564_v38, %v258_v36  ;;  %v301_v52 = vadd.f32 %v564_v38, %v259_v37  ;;  %v302_v53 = vadd.f32 %v564_v38, %v260_v39  ;;  %v235_v37 = vld [vmem:[%s533_s24 + $0xc0] sm:$0xff] }
  0x2c   : > { %v331_v54 = vmax.f32 %v295_v46, 0.0  ;;  %v332_v55 = vmax.f32 %v296_v47, 0.0  ;;  %v333_v56 = vmax.f32 %v297_v48, 0.0  ;;  %v334_v57 = vmax.f32 %v298_v49, 0.0 }
  0x2d   : > { %v335_v60 = vmax.f32 %v299_v50, 0.0  ;;  %v336_v61 = vmax.f32 %v300_v51, 0.0  ;;  %v337_v62 = vmax.f32 %v301_v52, 0.0  ;;  %v338_v63 = vmax.f32 %v302_v53, 0.0  ;;  %v239_v50 = vld [vmem:[%s533_s24 + $0xe0] sm:$0xff]  ;;  %v240_v51 = vld [vmem:[%s533_s24 + $0xe8] sm:$0xff] }
  0x2e   : > { %367 = vst [vmem:[%s582_s5] sm:$0xff] %v331_v54  ;;  %368 = vst [vmem:[%s582_s5 + $0x8] sm:$0xff] %v332_v55  ;;  %v303_v0 = vadd.f32 %v564_v38, %v261_v40  ;;  %v304_v1 = vadd.f32 %v564_v38, %v262_v41  ;;  %v305_v2 = vadd.f32 %v564_v38, %v263_v42 }
  0x2f   : > { %369 = vst [vmem:[%s582_s5 + $0x10] sm:$0xff] %v333_v56  ;;  %370 = vst [vmem:[%s582_s5 + $0x18] sm:$0xff] %v334_v57  ;;  %v306_v3 = vadd.f32 %v564_v38, %v264_v43  ;;  %v307_v5 = vadd.f32 %v564_v38, %v265_v44  ;;  %v308_v6 = vadd.f32 %v564_v38, %v266_v45  ;;  %v236_v43 = vld [vmem:[%s533_s24 + $0xc8] sm:$0xff]  ;;  %v237_v44 = vld [vmem:[%s533_s24 + $0xd0] sm:$0xff] }
  0x30   : > { %371 = vst [vmem:[%s582_s5 + $0x20] sm:$0xff] %v335_v60  ;;  %372 = vst [vmem:[%s582_s5 + $0x28] sm:$0xff] %v336_v61  ;;  %v267_v7 = vmul.f32 %v546_v20, %v225_v58  ;;  %v268_v8 = vmul.f32 %v546_v20, %v226_v59  ;;  %v339_v12 = vmax.f32 %v303_v0, 0.0  ;;  %v340_v13 = vmax.f32 %v304_v1, 0.0  ;;  %v238_v45 = vld [vmem:[%s533_s24 + $0xd8] sm:$0xff]  ;;  %v241_v60 = vld [vmem:[%s533_s24 + $0xf0] sm:$0xff] }
  0x31   : > { %373 = vst [vmem:[%s582_s5 + $0x30] sm:$0xff] %v337_v62  ;;  %374 = vst [vmem:[%s582_s5 + $0x38] sm:$0xff] %v338_v63  ;;  %v341_v14 = vmax.f32 %v305_v2, 0.0  ;;  %v342_v15 = vmax.f32 %v306_v3, 0.0  ;;  %v343_v18 = vmax.f32 %v307_v5, 0.0  ;;  %v344_v19 = vmax.f32 %v308_v6, 0.0 }
  0x32   : > { %v309_v21 = vadd.f32 %v564_v38, %v267_v7  ;;  %v310_v22 = vadd.f32 %v564_v38, %v268_v8  ;;  %375 = vst [vmem:[%s582_s5 + $0x40] sm:$0xff] %v339_v12  ;;  %376 = vst [vmem:[%s582_s5 + $0x48] sm:$0xff] %v340_v13  ;;  %v269_v23 = vmul.f32 %v546_v20, %v227_v4  ;;  %v242_v61 = vld [vmem:[%s533_s24 + $0xf8] sm:$0xff]  ;;  %v243_v6 = vld [vmem:[%s533_s24 + $0x100] sm:$0xff] }
  0x33   : > { %377 = vst [vmem:[%s582_s5 + $0x50] sm:$0xff] %v341_v14  ;;  %378 = vst [vmem:[%s582_s5 + $0x58] sm:$0xff] %v342_v15  ;;  %v270_v24 = vmul.f32 %v546_v20, %v228_v9  ;;  %v271_v25 = vmul.f32 %v546_v20, %v229_v10  ;;  %v272_v26 = vmul.f32 %v546_v20, %v230_v11  ;;  %v244_v11 = vld [vmem:[%s533_s24 + $0x108] sm:$0xff]  ;;  %v245_v12 = vld [vmem:[%s533_s24 + $0x110] sm:$0xff] }
  0x34   : > { %379 = vst [vmem:[%s582_s5 + $0x60] sm:$0xff] %v343_v18  ;;  %380 = vst [vmem:[%s582_s5 + $0x68] sm:$0xff] %v344_v19  ;;  %v345_v29 = vmax.f32 %v309_v21, 0.0  ;;  %v346_v30 = vmax.f32 %v310_v22, 0.0  ;;  %v273_v31 = vmul.f32 %v546_v20, %v231_v16  ;;  %v274_v32 = vmul.f32 %v546_v20, %v232_v17  ;;  %v246_v13 = vld [vmem:[%s533_s24 + $0x118] sm:$0xff] }
  0x35   : > { %v311_v33 = vadd.f32 %v564_v38, %v269_v23  ;;  %v312_v34 = vadd.f32 %v564_v38, %v270_v24  ;;  %v313_v35 = vadd.f32 %v564_v38, %v271_v25  ;;  %v314_v36 = vadd.f32 %v564_v38, %v272_v26 }
  0x36   : > { %381 = vst [vmem:[%s582_s5 + $0x70] sm:$0xff] %v345_v29  ;;  %382 = vst [vmem:[%s582_s5 + $0x78] sm:$0xff] %v346_v30  ;;  %v315_v39 = vadd.f32 %v564_v38, %v273_v31  ;;  %v316_v40 = vadd.f32 %v564_v38, %v274_v32  ;;  %v275_v41 = vmul.f32 %v546_v20, %v233_v27 }
  0x37   : > { %v276_v42 = vmul.f32 %v546_v20, %v234_v28  ;;  %v347_v46 = vmax.f32 %v311_v33, 0.0  ;;  %v348_v47 = vmax.f32 %v312_v34, 0.0  ;;  %v349_v48 = vmax.f32 %v313_v35, 0.0 }
  0x38   : > { %v350_v49 = vmax.f32 %v314_v36, 0.0  ;;  %v351_v52 = vmax.f32 %v315_v39, 0.0  ;;  %v352_v53 = vmax.f32 %v316_v40, 0.0  ;;  %v317_v54 = vadd.f32 %v564_v38, %v275_v41 }
  0x39   : > { %v318_v55 = vadd.f32 %v564_v38, %v276_v42  ;;  %383 = vst [vmem:[%s582_s5 + $0x80] sm:$0xff] %v347_v46  ;;  %384 = vst [vmem:[%s582_s5 + $0x88] sm:$0xff] %v348_v47  ;;  %v277_v56 = vmul.f32 %v546_v20, %v235_v37  ;;  %v278_v57 = vmul.f32 %v546_v20, %v236_v43 }
  0x3a   : > { %385 = vst [vmem:[%s582_s5 + $0x90] sm:$0xff] %v349_v48  ;;  %386 = vst [vmem:[%s582_s5 + $0x98] sm:$0xff] %v350_v49  ;;  %v279_v58 = vmul.f32 %v546_v20, %v237_v44  ;;  %v280_v59 = vmul.f32 %v546_v20, %v238_v45  ;;  %v353_v62 = vmax.f32 %v317_v54, 0.0  ;;  %v281_v0 = vmul.f32 %v546_v20, %v239_v50 }
  0x3b   : > { %387 = vst [vmem:[%s582_s5 + $0xa0] sm:$0xff] %v351_v52  ;;  %388 = vst [vmem:[%s582_s5 + $0xa8] sm:$0xff] %v352_v53  ;;  %v354_v63 = vmax.f32 %v318_v55, 0.0  ;;  %v282_v1 = vmul.f32 %v546_v20, %v240_v51  ;;  %v319_v2 = vadd.f32 %v564_v38, %v277_v56  ;;  %v320_v3 = vadd.f32 %v564_v38, %v278_v57 }
  0x3c   : > { %v321_v4 = vadd.f32 %v564_v38, %v279_v58  ;;  %v322_v5 = vadd.f32 %v564_v38, %v280_v59  ;;  %389 = vst [vmem:[%s582_s5 + $0xb0] sm:$0xff] %v353_v62  ;;  %v323_v7 = vadd.f32 %v564_v38, %v281_v0  ;;  %v283_v9 = vmul.f32 %v546_v20, %v241_v60 }
  0x3d   : > { %390 = vst [vmem:[%s582_s5 + $0xb8] sm:$0xff] %v354_v63  ;;  %v324_v8 = vadd.f32 %v564_v38, %v282_v1  ;;  %v284_v10 = vmul.f32 %v546_v20, %v242_v61  ;;  %v355_v14 = vmax.f32 %v319_v2, 0.0  ;;  %v356_v15 = vmax.f32 %v320_v3, 0.0 }
  0x3e   : > { %v357_v16 = vmax.f32 %v321_v4, 0.0  ;;  %v358_v17 = vmax.f32 %v322_v5, 0.0  ;;  %v359_v18 = vmax.f32 %v323_v7, 0.0  ;;  %v325_v21 = vadd.f32 %v564_v38, %v283_v9 }
  0x3f   : > { %v360_v19 = vmax.f32 %v324_v8, 0.0  ;;  %v326_v22 = vadd.f32 %v564_v38, %v284_v10  ;;  %391 = vst [vmem:[%s582_s5 + $0xc0] sm:$0xff] %v355_v14  ;;  %392 = vst [vmem:[%s582_s5 + $0xc8] sm:$0xff] %v356_v15  ;;  %v285_v23 = vmul.f32 %v546_v20, %v243_v6  ;;  %v286_v24 = vmul.f32 %v546_v20, %v244_v11 }
  0x40   : > { %393 = vst [vmem:[%s582_s5 + $0xd0] sm:$0xff] %v357_v16  ;;  %394 = vst [vmem:[%s582_s5 + $0xd8] sm:$0xff] %v358_v17  ;;  %v287_v25 = vmul.f32 %v546_v20, %v245_v12  ;;  %v288_v26 = vmul.f32 %v546_v20, %v246_v13  ;;  %v361_v27 = vmax.f32 %v325_v21, 0.0 }
  0x41   : > { %395 = vst [vmem:[%s582_s5 + $0xe0] sm:$0xff] %v359_v18  ;;  %396 = vst [vmem:[%s582_s5 + $0xe8] sm:$0xff] %v360_v19  ;;  %v362_v28 = vmax.f32 %v326_v22, 0.0  ;;  %v327_v29 = vadd.f32 %v564_v38, %v285_v23  ;;  %v328_v30 = vadd.f32 %v564_v38, %v286_v24 }
  0x42   : > { %v329_v31 = vadd.f32 %v564_v38, %v287_v25  ;;  %v330_v32 = vadd.f32 %v564_v38, %v288_v26  ;;  %397 = vst [vmem:[%s582_s5 + $0xf0] sm:$0xff] %v361_v27 }
  0x43   : > { %398 = vst [vmem:[%s582_s5 + $0xf8] sm:$0xff] %v362_v28  ;;  %v363_v33 = vmax.f32 %v327_v29, 0.0  ;;  %v364_v34 = vmax.f32 %v328_v30, 0.0 }
  0x44   : > { %v365_v20 = vmax.f32 %v329_v31, 0.0  ;;  %v366_v35 = vmax.f32 %v330_v32, 0.0 }
  0x45   : > { %399 = vst [vmem:[%s582_s5 + $0x100] sm:$0xff] %v363_v33  ;;  %400 = vst [vmem:[%s582_s5 + $0x108] sm:$0xff] %v364_v34 }
  0x46   : > { %401 = vst [vmem:[%s582_s5 + $0x110] sm:$0xff] %v365_v20  ;;  %402 = vst [vmem:[%s582_s5 + $0x118] sm:$0xff] %v366_v35 }
  0x47 PF: > { %s14_s15 = sadd.s32 1, %s484_s15  }
  0x48   : > { %p11_p4 = scmp.ge.s32.totalorder %s14_s15, 4  }
  0x4a   :  { %13 = sbr.rel (!%p11_p4) target bundleno = 1 (0x1), region = 66 }

// kernel: basic_block_forward.7
= control target key start
LH: loop header
LB: loop body
LE: loop exit
PB: predicated region body
PF: predicated region fallthrough
CT: control target
= control target key end

     0   :  { %s648_s18 = smov 0   ;;  %s875_s0 = inlined_call_operand.vmem [shape: f32[2,288,128], index: 0, kind: input, shape index: {}]   ;;  %s876_s1 = inlined_call_operand.vmem [shape: f32[2,128], index: 1, kind: input, shape index: {}]   ;;  %s877_s2 = inlined_call_operand.vmem [shape: f32[1,128], index: 2, kind: input, shape index: {}]   ;;  %s878_s3 = inlined_call_operand.vmem [shape: f32[1,128], index: 3, kind: input, shape index: {}]   ;;  %s879_s4 = inlined_call_operand.vmem [shape: f32[2,288,128], index: 4, kind: input, shape index: {}]   ;;  %s880_s5 = inlined_call_operand.vmem [shape: f32[2,288,128], index: 5, kind: output, shape index: {}]  }
   0x1 LB: > { %s589_s19 = sadd.s32 4294967295, %s616_s18   ;;  %p593_p0 = scmp.ge.s32.totalorder %s616_s18, 1  ;;  %s616_s18 = sphi %s648_s18, %s15_s18  }
   0x2   : > { %p197_p1 = scmp.lt.s32.totalorder %s616_s18, 3 }
   0x4   : > { %p198_p2 = pnand %p593_p0, %p197_p1 }
   0x5   : > { %p230_p3 = scmp.lt.s32.totalorder (!%p198_p2), %s589_s19, 1 }
   0x6   : > { %201 = sbr.rel (%p198_p2) target bundleno = 82 (0x52), region = 40 }
   0xb   : > { %v245_v0 = vld [vmem:[%s876_s1] sm:$0x1]  ;;  %v247_v1 = vld [vmem:[%s876_s1 + $0x1] sm:$0x1]  ;;  %s882_s19 = smov (!%p230_p3, %s589_s19), 1  ;;  %v295_v7 = vlaneseq }
   0xc   : > { %v246_v2 = vmul.f32 0.001953125, %v245_v0  ;;  %v248_v3 = vmul.f32 0.001953125, %v247_v1  ;;  %s662_s24 = smul.u32 288, %s882_s19  ;;  %v251_v9 = vld [vmem:[%s877_s2] sm:$0x1] }
   0xd   : > { %v296_v8 = vshrl.u32 %v295_v7, 7  ;;  %v255_v13 = vld [vmem:[%s878_s3] sm:$0x1] }
   0xe   : > { %v249_v4 = vmul.f32 %v246_v2, %v246_v2  ;;  %s668_s27 = scalar_lea.vmem %s875_s0, %s662_s24  ;;  %s690_s9 = scalar_lea.vmem %s879_s4, %s662_s24 }
   0xf   : > { %v297_v10 = vsub.s32 0, %v296_v8  ;;  %v258_v14 = vld [vmem:[%s668_s27] sm:$0xff]  ;;  %v259_v15 = vld [vmem:[%s668_s27 + $0x8] sm:$0xff]  ;;  %v260_v16 = vld [vmem:[%s668_s27 + $0x10] sm:$0xff]  ;;  %s734_s12 = scalar_lea.vmem %s880_s5, %s662_s24 }
  0x10   : > { %v250_v5 = vsub.f32 %v248_v3, %v249_v4  ;;  %v261_v17 = vld [vmem:[%s668_s27 + $0x18] sm:$0xff]  ;;  %v262_v18 = vld [vmem:[%s668_s27 + $0x20] sm:$0xff]  ;;  %v263_v21 = vld [vmem:[%s668_s27 + $0x28] sm:$0xff] }
  0x11   : > { %v264_v22 = vld [vmem:[%s668_s27 + $0x30] sm:$0xff]  ;;  %v265_v23 = vld [vmem:[%s668_s27 + $0x38] sm:$0xff]  ;;  %v266_v24 = vld [vmem:[%s668_s27 + $0x40] sm:$0xff] }
  0x12   : > { %v252_v6 = vadd.f32 1e-05, %v250_v5  ;;  %v267_v25 = vld [vmem:[%s668_s27 + $0x48] sm:$0xff]  ;;  %v268_v26 = vld [vmem:[%s668_s27 + $0x50] sm:$0xff]  ;;  %v269_v31 = vld [vmem:[%s668_s27 + $0x58] sm:$0xff] }
  0x13   : > { %v270_v32 = vld [vmem:[%s668_s27 + $0x60] sm:$0xff]  ;;  %v271_v33 = vld [vmem:[%s668_s27 + $0x68] sm:$0xff]  ;;  %v380_v44 = vld [vmem:[%s690_s9 + $0x10] sm:$0xff] }
  0x14   : > { %608 = vrsqrt.f32 %v252_v6  ;;  %v378_v39 = vld [vmem:[%s690_s9] sm:$0xff]  ;;  %v379_v40 = vld [vmem:[%s690_s9 + $0x8] sm:$0xff]  ;;  %v381_v45 = vld [vmem:[%s690_s9 + $0x18] sm:$0xff] }
  0x15   : > { %v382_v46 = vld [vmem:[%s690_s9 + $0x20] sm:$0xff]  ;;  %v383_v55 = vld [vmem:[%s690_s9 + $0x28] sm:$0xff]  ;;  %v384_v56 = vld [vmem:[%s690_s9 + $0x30] sm:$0xff] }
  0x16   : > { %v385_v57 = vld [vmem:[%s690_s9 + $0x38] sm:$0xff]  ;;  %v386_v6 = vld [vmem:[%s690_s9 + $0x40] sm:$0xff]  ;;  %v387_v7 = vld [vmem:[%s690_s9 + $0x48] sm:$0xff] }
  0x21   : > { %v609_v11 = vpop.eup %608 }
  0x22   : > { %v254_v12 = vmul.f32 %v609_v11, %v251_v9 }
  0x24   : > { %v256_v19 = vmul.f32 %v254_v12, %v246_v2  ;;  %v681_v20 = vrot.slane %v254_v12, %v297_v10  ;;  %v272_v12 = vld [vmem:[%s668_s27 + $0x70] sm:$0xff] }
  0x26   : > { %v257_v27 = vsub.f32 %v255_v13, %v256_v19  ;;  %v300_v28 = vmul.f32 %v681_v20, %v258_v14  ;;  %v301_v29 = vmul.f32 %v681_v20, %v259_v15  ;;  %v302_v30 = vmul.f32 %v681_v20, %v260_v16  ;;  %v273_v13 = vld [vmem:[%s668_s27 + $0x78] sm:$0xff] }
  0x27   : > { %v303_v34 = vmul.f32 %v681_v20, %v261_v17  ;;  %v304_v35 = vmul.f32 %v681_v20, %v262_v18  ;;  %v305_v36 = vmul.f32 %v681_v20, %v263_v21  ;;  %v306_v37 = vmul.f32 %v681_v20, %v264_v22  ;;  %v388_v18 = vld [vmem:[%s690_s9 + $0x50] sm:$0xff]  ;;  %v389_v19 = vld [vmem:[%s690_s9 + $0x58] sm:$0xff] }
  0x28   : > { %v705_v38 = vrot.slane %v257_v27, %v297_v10  ;;  %v307_v41 = vmul.f32 %v681_v20, %v265_v23  ;;  %v308_v42 = vmul.f32 %v681_v20, %v266_v24  ;;  %v309_v43 = vmul.f32 %v681_v20, %v267_v25  ;;  %v390_v25 = vld [vmem:[%s690_s9 + $0x60] sm:$0xff] }
  0x29   : > { %v310_v47 = vmul.f32 %v681_v20, %v268_v26  ;;  %v311_v48 = vmul.f32 %v681_v20, %v269_v31  ;;  %v312_v49 = vmul.f32 %v681_v20, %v270_v32  ;;  %v313_v50 = vmul.f32 %v681_v20, %v271_v33  ;;  %v391_v26 = vld [vmem:[%s690_s9 + $0x68] sm:$0xff] }
  0x2a   : > { %v342_v51 = vadd.f32 %v705_v38, %v300_v28  ;;  %v343_v52 = vadd.f32 %v705_v38, %v301_v29  ;;  %v344_v53 = vadd.f32 %v705_v38, %v302_v30  ;;  %v345_v54 = vadd.f32 %v705_v38, %v303_v34 }
  0x2b   : > { %v346_v58 = vadd.f32 %v705_v38, %v304_v35  ;;  %v347_v59 = vadd.f32 %v705_v38, %v305_v36  ;;  %v348_v60 = vadd.f32 %v705_v38, %v306_v37  ;;  %v349_v61 = vadd.f32 %v705_v38, %v307_v41  ;;  %v392_v35 = vld [vmem:[%s690_s9 + $0x70] sm:$0xff]  ;;  %v393_v36 = vld [vmem:[%s690_s9 + $0x78] sm:$0xff]  ;;  %v274_v37 = vld [vmem:[%s668_s27 + $0x80] sm:$0xff] }
  0x2c   : > { %v414_v62 = vadd.f32 %v378_v39, %v342_v51  ;;  %v415_v63 = vadd.f32 %v379_v40, %v343_v52  ;;  %v416_v0 = vadd.f32 %v380_v44, %v344_v53  ;;  %v417_v1 = vadd.f32 %v381_v45, %v345_v54  ;;  %v276_v44 = vld [vmem:[%s668_s27 + $0x90] sm:$0xff]  ;;  %v277_v45 = vld [vmem:[%s668_s27 + $0x98] sm:$0xff]  ;;  %v279_v51 = vld [vmem:[%s668_s27 + $0xa8] sm:$0xff] }
  0x2d   : > { %v418_v2 = vadd.f32 %v382_v46, %v346_v58  ;;  %v419_v3 = vadd.f32 %v383_v55, %v347_v59  ;;  %v420_v4 = vadd.f32 %v384_v56, %v348_v60  ;;  %v421_v5 = vadd.f32 %v385_v57, %v349_v61  ;;  %v394_v57 = vld [vmem:[%s690_s9 + $0x80] sm:$0xff]  ;;  %v280_v61 = vld [vmem:[%s668_s27 + $0xb0] sm:$0xff] }
  0x2e   : > { %v450_v8 = vmax.f32 %v414_v62, 0.0  ;;  %v451_v9 = vmax.f32 %v415_v63, 0.0  ;;  %v452_v10 = vmax.f32 %v416_v0, 0.0  ;;  %v453_v11 = vmax.f32 %v417_v1, 0.0  ;;  %v281_v62 = vld [vmem:[%s668_s27 + $0xb8] sm:$0xff]  ;;  %v395_v1 = vld [vmem:[%s690_s9 + $0x88] sm:$0xff] }
  0x2f   : > { %v454_v14 = vmax.f32 %v418_v2, 0.0  ;;  %v455_v15 = vmax.f32 %v419_v3, 0.0  ;;  %v456_v16 = vmax.f32 %v420_v4, 0.0  ;;  %v457_v17 = vmax.f32 %v421_v5, 0.0  ;;  %v396_v2 = vld [vmem:[%s690_s9 + $0x90] sm:$0xff]  ;;  %v397_v3 = vld [vmem:[%s690_s9 + $0x98] sm:$0xff] }
  0x30   : > { %486 = vst [vmem:[%s734_s12] sm:$0xff] %v450_v8  ;;  %487 = vst [vmem:[%s734_s12 + $0x8] sm:$0xff] %v451_v9  ;;  %v350_v21 = vadd.f32 %v705_v38, %v308_v42  ;;  %v351_v22 = vadd.f32 %v705_v38, %v309_v43  ;;  %v352_v23 = vadd.f32 %v705_v38, %v310_v47  ;;  %v275_v43 = vld [vmem:[%s668_s27 + $0x88] sm:$0xff] }
  0x31   : > { %488 = vst [vmem:[%s734_s12 + $0x10] sm:$0xff] %v452_v10  ;;  %489 = vst [vmem:[%s734_s12 + $0x18] sm:$0xff] %v453_v11  ;;  %v353_v24 = vadd.f32 %v705_v38, %v311_v48  ;;  %v354_v27 = vadd.f32 %v705_v38, %v312_v49  ;;  %v355_v28 = vadd.f32 %v705_v38, %v313_v50  ;;  %v278_v50 = vld [vmem:[%s668_s27 + $0xa0] sm:$0xff]  ;;  %v399_v11 = vld [vmem:[%s690_s9 + $0xa8] sm:$0xff] }
  0x32   : > { %490 = vst [vmem:[%s734_s12 + $0x20] sm:$0xff] %v454_v14  ;;  %491 = vst [vmem:[%s734_s12 + $0x28] sm:$0xff] %v455_v15  ;;  %v314_v29 = vmul.f32 %v681_v20, %v272_v12  ;;  %v315_v30 = vmul.f32 %v681_v20, %v273_v13  ;;  %v422_v31 = vadd.f32 %v386_v6, %v350_v21  ;;  %v398_v10 = vld [vmem:[%s690_s9 + $0xa0] sm:$0xff]  ;;  %v400_v21 = vld [vmem:[%s690_s9 + $0xb0] sm:$0xff] }
  0x33   : > { %492 = vst [vmem:[%s734_s12 + $0x30] sm:$0xff] %v456_v16  ;;  %493 = vst [vmem:[%s734_s12 + $0x38] sm:$0xff] %v457_v17  ;;  %v423_v32 = vadd.f32 %v387_v7, %v351_v22  ;;  %v424_v33 = vadd.f32 %v388_v18, %v352_v23  ;;  %v425_v34 = vadd.f32 %v389_v19, %v353_v24  ;;  %v401_v22 = vld [vmem:[%s690_s9 + $0xb8] sm:$0xff]  ;;  %v282_v23 = vld [vmem:[%s668_s27 + $0xc0] sm:$0xff] }
  0x34   : > { %v426_v39 = vadd.f32 %v390_v25, %v354_v27  ;;  %v427_v40 = vadd.f32 %v391_v26, %v355_v28  ;;  %v356_v41 = vadd.f32 %v705_v38, %v314_v29  ;;  %v357_v42 = vadd.f32 %v705_v38, %v315_v30  ;;  %v283_v28 = vld [vmem:[%s668_s27 + $0xc8] sm:$0xff]  ;;  %v284_v29 = vld [vmem:[%s668_s27 + $0xd0] sm:$0xff]  ;;  %v285_v30 = vld [vmem:[%s668_s27 + $0xd8] sm:$0xff] }
  0x35   : > { %v458_v46 = vmax.f32 %v422_v31, 0.0  ;;  %v459_v47 = vmax.f32 %v423_v32, 0.0  ;;  %v460_v48 = vmax.f32 %v424_v33, 0.0  ;;  %v461_v49 = vmax.f32 %v425_v34, 0.0 }
  0x36   : > { %v462_v52 = vmax.f32 %v426_v39, 0.0  ;;  %v463_v53 = vmax.f32 %v427_v40, 0.0  ;;  %v428_v54 = vadd.f32 %v392_v35, %v356_v41  ;;  %v429_v55 = vadd.f32 %v393_v36, %v357_v42  ;;  %v286_v35 = vld [vmem:[%s668_s27 + $0xe0] sm:$0xff]  ;;  %v287_v36 = vld [vmem:[%s668_s27 + $0xe8] sm:$0xff] }
  0x37   : > { %494 = vst [vmem:[%s734_s12 + $0x40] sm:$0xff] %v458_v46  ;;  %495 = vst [vmem:[%s734_s12 + $0x48] sm:$0xff] %v459_v47  ;;  %v316_v56 = vmul.f32 %v681_v20, %v274_v37  ;;  %v317_v58 = vmul.f32 %v681_v20, %v275_v43  ;;  %v318_v59 = vmul.f32 %v681_v20, %v276_v44  ;;  %v402_v43 = vld [vmem:[%s690_s9 + $0xc0] sm:$0xff]  ;;  %v288_v47 = vld [vmem:[%s668_s27 + $0xf0] sm:$0xff] }
  0x38   : > { %496 = vst [vmem:[%s734_s12 + $0x50] sm:$0xff] %v460_v48  ;;  %497 = vst [vmem:[%s734_s12 + $0x58] sm:$0xff] %v461_v49  ;;  %v319_v60 = vmul.f32 %v681_v20, %v277_v45  ;;  %v464_v63 = vmax.f32 %v428_v54, 0.0  ;;  %v465_v0 = vmax.f32 %v429_v55, 0.0  ;;  %v320_v4 = vmul.f32 %v681_v20, %v278_v50  ;;  %v289_v48 = vld [vmem:[%s668_s27 + $0xf8] sm:$0xff] }
  0x39   : > { %498 = vst [vmem:[%s734_s12 + $0x60] sm:$0xff] %v462_v52  ;;  %499 = vst [vmem:[%s734_s12 + $0x68] sm:$0xff] %v463_v53  ;;  %v321_v5 = vmul.f32 %v681_v20, %v279_v51  ;;  %v358_v6 = vadd.f32 %v705_v38, %v316_v56  ;;  %v359_v7 = vadd.f32 %v705_v38, %v317_v58  ;;  %v403_v51 = vld [vmem:[%s690_s9 + $0xc8] sm:$0xff]  ;;  %v404_v52 = vld [vmem:[%s690_s9 + $0xd0] sm:$0xff] }
  0x3a   : > { %v360_v8 = vadd.f32 %v705_v38, %v318_v59  ;;  %v361_v9 = vadd.f32 %v705_v38, %v319_v60  ;;  %500 = vst [vmem:[%s734_s12 + $0x70] sm:$0xff] %v464_v63  ;;  %501 = vst [vmem:[%s734_s12 + $0x78] sm:$0xff] %v465_v0  ;;  %v362_v12 = vadd.f32 %v705_v38, %v320_v4  ;;  %v405_v53 = vld [vmem:[%s690_s9 + $0xd8] sm:$0xff]  ;;  %v406_v60 = vld [vmem:[%s690_s9 + $0xe0] sm:$0xff] }
  0x3b   : > { %v363_v13 = vadd.f32 %v705_v38, %v321_v5  ;;  %v322_v14 = vmul.f32 %v681_v20, %v280_v61  ;;  %v323_v15 = vmul.f32 %v681_v20, %v281_v62  ;;  %v430_v16 = vadd.f32 %v394_v57, %v358_v6  ;;  %v407_v61 = vld [vmem:[%s690_s9 + $0xe8] sm:$0xff]  ;;  %v408_v6 = vld [vmem:[%s690_s9 + $0xf0] sm:$0xff] }
  0x3c   : > { %v431_v17 = vadd.f32 %v395_v1, %v359_v7  ;;  %v432_v18 = vadd.f32 %v396_v2, %v360_v8  ;;  %v433_v19 = vadd.f32 %v397_v3, %v361_v9  ;;  %v434_v24 = vadd.f32 %v398_v10, %v362_v12  ;;  %v409_v7 = vld [vmem:[%s690_s9 + $0xf8] sm:$0xff]  ;;  %v290_v8 = vld [vmem:[%s668_s27 + $0x100] sm:$0xff] }
  0x3d   : > { %v435_v25 = vadd.f32 %v399_v11, %v363_v13  ;;  %v364_v26 = vadd.f32 %v705_v38, %v322_v14  ;;  %v365_v27 = vadd.f32 %v705_v38, %v323_v15  ;;  %v466_v31 = vmax.f32 %v430_v16, 0.0  ;;  %v291_v13 = vld [vmem:[%s668_s27 + $0x108] sm:$0xff]  ;;  %v292_v14 = vld [vmem:[%s668_s27 + $0x110] sm:$0xff]  ;;  %v293_v15 = vld [vmem:[%s668_s27 + $0x118] sm:$0xff] }
  0x3e   : > { %v467_v32 = vmax.f32 %v431_v17, 0.0  ;;  %v468_v33 = vmax.f32 %v432_v18, 0.0  ;;  %v469_v34 = vmax.f32 %v433_v19, 0.0  ;;  %v470_v37 = vmax.f32 %v434_v24, 0.0 }
  0x3f   : > { %v471_v39 = vmax.f32 %v435_v25, 0.0  ;;  %v436_v40 = vadd.f32 %v400_v21, %v364_v26  ;;  %v437_v41 = vadd.f32 %v401_v22, %v365_v27  ;;  %502 = vst [vmem:[%s734_s12 + $0x80] sm:$0xff] %v466_v31  ;;  %v324_v42 = vmul.f32 %v681_v20, %v282_v23  ;;  %v410_v26 = vld [vmem:[%s690_s9 + $0x100] sm:$0xff] }
  0x40   : > { %503 = vst [vmem:[%s734_s12 + $0x88] sm:$0xff] %v467_v32  ;;  %504 = vst [vmem:[%s734_s12 + $0x90] sm:$0xff] %v468_v33  ;;  %v325_v44 = vmul.f32 %v681_v20, %v283_v28  ;;  %v326_v45 = vmul.f32 %v681_v20, %v284_v29  ;;  %v327_v46 = vmul.f32 %v681_v20, %v285_v30  ;;  %v411_v32 = vld [vmem:[%s690_s9 + $0x108] sm:$0xff]  ;;  %v412_v33 = vld [vmem:[%s690_s9 + $0x110] sm:$0xff] }
  0x41   : > { %505 = vst [vmem:[%s734_s12 + $0x98] sm:$0xff] %v469_v34  ;;  %506 = vst [vmem:[%s734_s12 + $0xa0] sm:$0xff] %v470_v37  ;;  %v472_v49 = vmax.f32 %v436_v40, 0.0  ;;  %v473_v50 = vmax.f32 %v437_v41, 0.0  ;;  %v328_v54 = vmul.f32 %v681_v20, %v286_v35  ;;  %v329_v55 = vmul.f32 %v681_v20, %v287_v36  ;;  %v413_v34 = vld [vmem:[%s690_s9 + $0x118] sm:$0xff] }
  0x42   : > { %507 = vst [vmem:[%s734_s12 + $0xa8] sm:$0xff] %v471_v39  ;;  %v366_v56 = vadd.f32 %v705_v38, %v324_v42  ;;  %v367_v57 = vadd.f32 %v705_v38, %v325_v44  ;;  %v368_v58 = vadd.f32 %v705_v38, %v326_v45  ;;  %v369_v59 = vadd.f32 %v705_v38, %v327_v46 }
  0x43   : > { %508 = vst [vmem:[%s734_s12 + $0xb0] sm:$0xff] %v472_v49  ;;  %509 = vst [vmem:[%s734_s12 + $0xb8] sm:$0xff] %v473_v50  ;;  %v370_v62 = vadd.f32 %v705_v38, %v328_v54  ;;  %v371_v63 = vadd.f32 %v705_v38, %v329_v55  ;;  %v330_v0 = vmul.f32 %v681_v20, %v288_v47 }
  0x44   : > { %v331_v1 = vmul.f32 %v681_v20, %v289_v48  ;;  %v438_v2 = vadd.f32 %v402_v43, %v366_v56  ;;  %v439_v3 = vadd.f32 %v403_v51, %v367_v57  ;;  %v440_v4 = vadd.f32 %v404_v52, %v368_v58 }
  0x45   : > { %v441_v5 = vadd.f32 %v405_v53, %v369_v59  ;;  %v442_v9 = vadd.f32 %v406_v60, %v370_v62  ;;  %v443_v10 = vadd.f32 %v407_v61, %v371_v63  ;;  %v372_v11 = vadd.f32 %v705_v38, %v330_v0 }
  0x46   : > { %v373_v12 = vadd.f32 %v705_v38, %v331_v1  ;;  %v474_v16 = vmax.f32 %v438_v2, 0.0  ;;  %v475_v17 = vmax.f32 %v439_v3, 0.0  ;;  %v476_v18 = vmax.f32 %v440_v4, 0.0 }
  0x47   : > { %v477_v19 = vmax.f32 %v441_v5, 0.0  ;;  %v478_v21 = vmax.f32 %v442_v9, 0.0  ;;  %v479_v22 = vmax.f32 %v443_v10, 0.0  ;;  %v444_v23 = vadd.f32 %v408_v6, %v372_v11 }
  0x48   : > { %v445_v24 = vadd.f32 %v409_v7, %v373_v12  ;;  %510 = vst [vmem:[%s734_s12 + $0xc0] sm:$0xff] %v474_v16  ;;  %511 = vst [vmem:[%s734_s12 + $0xc8] sm:$0xff] %v475_v17  ;;  %v332_v25 = vmul.f32 %v681_v20, %v290_v8  ;;  %v333_v27 = vmul.f32 %v681_v20, %v291_v13 }
  0x49   : > { %512 = vst [vmem:[%s734_s12 + $0xd0] sm:$0xff] %v476_v18  ;;  %513 = vst [vmem:[%s734_s12 + $0xd8] sm:$0xff] %v477_v19  ;;  %v334_v28 = vmul.f32 %v681_v20, %v292_v14  ;;  %v335_v29 = vmul.f32 %v681_v20, %v293_v15  ;;  %v480_v30 = vmax.f32 %v444_v23, 0.0 }
  0x4a   : > { %514 = vst [vmem:[%s734_s12 + $0xe0] sm:$0xff] %v478_v21  ;;  %515 = vst [vmem:[%s734_s12 + $0xe8] sm:$0xff] %v479_v22  ;;  %v481_v31 = vmax.f32 %v445_v24, 0.0  ;;  %v374_v35 = vadd.f32 %v705_v38, %v332_v25  ;;  %v375_v36 = vadd.f32 %v705_v38, %v333_v27 }
  0x4b   : > { %v376_v37 = vadd.f32 %v705_v38, %v334_v28  ;;  %v377_v39 = vadd.f32 %v705_v38, %v335_v29  ;;  %516 = vst [vmem:[%s734_s12 + $0xf0] sm:$0xff] %v480_v30 }
  0x4c   : > { %517 = vst [vmem:[%s734_s12 + $0xf8] sm:$0xff] %v481_v31  ;;  %v446_v20 = vadd.f32 %v410_v26, %v374_v35  ;;  %v447_v40 = vadd.f32 %v411_v32, %v375_v36 }
  0x4d   : > { %v448_v41 = vadd.f32 %v412_v33, %v376_v37  ;;  %v449_v42 = vadd.f32 %v413_v34, %v377_v39 }
  0x4e   : > { %v482_v43 = vmax.f32 %v446_v20, 0.0  ;;  %v483_v44 = vmax.f32 %v447_v40, 0.0 }
  0x4f   : > { %v484_v45 = vmax.f32 %v448_v41, 0.0  ;;  %v485_v46 = vmax.f32 %v449_v42, 0.0 }
  0x50   : > { %518 = vst [vmem:[%s734_s12 + $0x100] sm:$0xff] %v482_v43  ;;  %519 = vst [vmem:[%s734_s12 + $0x108] sm:$0xff] %v483_v44 }
  0x51   : > { %520 = vst [vmem:[%s734_s12 + $0x110] sm:$0xff] %v484_v45  ;;  %521 = vst [vmem:[%s734_s12 + $0x118] sm:$0xff] %v485_v46 }
  0x52 PF: > { %s15_s18 = sadd.s32 1, %s616_s18  }
  0x53   : > { %p12_p4 = scmp.ge.s32.totalorder %s15_s18, 4  }
  0x55   :  { %14 = sbr.rel (!%p12_p4) target bundleno = 1 (0x1), region = 73 }

// kernel: basic_block_forward.4
= control target key start
LH: loop header
LB: loop body
LE: loop exit
PB: predicated region body
PF: predicated region fallthrough
CT: control target
= control target key end

     0   :  { %s5469_s12 = smov 0   ;;  %s8205_s0 = inlined_call_operand.vmem [shape: bf16[2,342,4], index: 0, kind: input, shape index: {}]   ;;  %s8206_s1 = inlined_call_operand.vmem [shape: bf16[9,4,128], index: 1, kind: input, shape index: {}]   ;;  %s8207_s2 = inlined_call_operand.vmem [shape: f32[2,288,128], index: 2, kind: output, shape index: {0}]   ;;  %s8208_s3 = inlined_call_operand.vmem [shape: f32[2,128], index: 3, kind: output, shape index: {1}]  }
   0x1 LB: > { %s4528_s13 = sadd.s32 4294967295, %s5446_s12   ;;  %p4532_p0 = scmp.ge.s32.totalorder %s5446_s12, 1  ;;  %s5446_s12 = sphi %s5469_s12, %s14_s12  }
   0x2   : > { %p135_p1 = scmp.lt.s32.totalorder %s5446_s12, 3 }
   0x4   : > { %p136_p2 = pnand %p4532_p0, %p135_p1 }
   0x6   : > { %139 = sbr.rel (%p136_p2) target bundleno = 602 (0x25a), region = 28 }
   0xb   : > { %p159_p3 = scmp.lt.s32.totalorder %s4528_s13, 1  ;;  %p4535_p4 = scmp.ne.s32.totalorder %s4528_s13, 0 }
   0xd   : > { %s160_s14 = scalar_select %p159_p3, %s4528_s13, 1 }
   0xe   : > { %173 = sbr.rel (%p4535_p4) target bundleno = 21 (0x15), region = 32 }
   0xf   : > { %s5295_s15 = smul.u32 172, %s160_s14 }
  0x10   : > { %s5296_s16 = smul.u32 288, %s160_s14 }
  0x11   : > { %s5480_s19 = scalar_lea.vmem %s8205_s0, %s5295_s15 }
  0x12   : > { %s5485_s22 = scalar_lea.vmem %s8207_s2, %s5296_s16 }
  0x13   : > { %v5448_v0 = vmov 0.0  }
  0x14   : > { %174 = vst [vmem:[%s8208_s3] sm:$0x3] %v5448_v0 }
  0x15 PF: > { %v4536_v1 = vld [vmem:[%s8206_s1 + $0x2] sm:$0x3]  ;;  %vm512_vm0 = vcmask 1041408   ;;  %v5495_v3 = vld [vmem:[%s5480_s19 + $0x8] sm:$0xff]   ;;  %v5501_v5 = vld [vmem:[%s5480_s19 + $0x4] sm:$0xf] }
  0x16   : > { %v175_v2 = vld [vmem:[%s5480_s19] sm:$0xf]  ;;  %5285 = vmatprep.subr.msk.bf16.mxu0 %vm512_vm0, %v4536_v1  ;;  %5286 = vmatprep.subr.msk.bf16.mxu1 %vm512_vm0, %v4536_v1  ;;  %v514_v4 = vsel %vm512_vm0, %v4536_v1, 0  ;;  %vm308_vm1 = vsmask.f32 7424  ;;  %v317_v7 = vshll.u32 %v5495_v3, 16 }
  0x17   : > { %4942 = vmatpush3.bf16.msra.mxu0 %v514_v4  ;;  %5284 = vmatpush3.bf16.msra.mxu1 %v514_v4  ;;  %v5504_v6 = vcombine.low %v175_v2, %v5501_v5  ;;  %v321_v8 = vshrl.u32 %v5495_v3, 16  ;;  %v5511_v12 = vld [vmem:[%s5480_s19 + $0x50] sm:$0xff]   ;;  %vm457_vm2 = vcmask 31744   ;;  %v5514_v13 = vld [vmem:[%s5480_s19 + $0x58] sm:$0xff]   ;;  %v4592_v14 = vld [vmem:[%s8206_s1 + $0x4] sm:$0x3] }
  0x18   : > { %v319_v11 = vrot.slane %v317_v7, 1  ;;  %v389_v16 = vshll.u32 %v5511_v12, 16  ;;  %v393_v17 = vshrl.u32 %v5511_v12, 16  ;;  %5288 = vmatprep.subr.msk.bf16.mxu0 %vm512_vm0, %v4592_v14  ;;  %v5523_v18 = vld [vmem:[%s5480_s19 + $0x10] sm:$0xff]   ;;  %v397_v20 = vshll.u32 %v5514_v13, 16  ;;  %v5531_v25 = vld [vmem:[%s5480_s19 + $0x60] sm:$0xff]  }
  0x19   : > { %v310_v9 = vshrl.u32 %v5504_v6, 16  ;;  %v312_v10 = vshll.u32 %v5504_v6, 16  ;;  %v401_v21 = vshrl.u32 %v5514_v13, 16  ;;  %v325_v24 = vshll.u32 %v5523_v18, 16  ;;  %v211_v27 = vld [vmem:[%s8206_s1] sm:$0x3] }
  0x1a   : > { %v323_v19 = vor.u32 %v321_v8, %v319_v11  ;;  %v5527_v23 = vrot.slane %v389_v16, 1  ;;  %v1008_v26 = vsel %vm512_vm0, %v4592_v14, 0  ;;  %v399_v28 = vrot.slane %v397_v20, 1  ;;  %5287 = vmatprep.subr.msk.bf16.mxu1 %vm512_vm0, %v211_v27  ;;  %v5543_v34 = vld [vmem:[%s5480_s19 + $0x18] sm:$0xff]   ;;  %v5546_v35 = vld [vmem:[%s5480_s19 + $0x68] sm:$0xff]   ;;  %v5555_v43 = vld [vmem:[%s5480_s19 + $0x20] sm:$0xff]  }
  0x1b   : > { %v314_v15 = vrot.slane %v312_v10, 1  ;;  %v730_v29 = vsel %vm512_vm0, %v211_v27, 0  ;;  %v327_v32 = vrot.slane %v325_v24, 1  ;;  %v405_v33 = vshll.u32 %v5531_v25, 16  ;;  %v5558_v44 = vld [vmem:[%s5480_s19 + $0x70] sm:$0xff]   ;;  %v5570_v55 = vld [vmem:[%s5480_s19 + $0x28] sm:$0xff]  }
  0x1c   : > { %v395_v31 = vor.u32 %v393_v17, %v5527_v23  ;;  %v403_v36 = vor.u32 %v401_v21, %v399_v28  ;;  %v329_v37 = vshrl.u32 %v5523_v18, 16  ;;  %v409_v38 = vshrl.u32 %v5531_v25, 16  ;;  %v5574_v57 = vld [vmem:[%s5480_s19 + $0x78] sm:$0xff]   ;;  %v5585_v8 = vld [vmem:[%s5480_s19 + $0x30] sm:$0xff]   ;;  %v5589_v10 = vld [vmem:[%s5480_s19 + $0x80] sm:$0xff]  }
  0x1d   : > { %v315_v22 = vor.u32 %v314_v15, %v310_v9  ;;  %v328_v40 = vsel %vm308_vm1, %v323_v19, %v327_v32  ;;  %v407_v41 = vrot.slane %v405_v33, 1  ;;  %v333_v42 = vshll.u32 %v5543_v34, 16  ;;  %v5596_v21 = vld [vmem:[%s5480_s19 + $0x38] sm:$0xff]  }
  0x1e   : > { %v400_v39 = vsel %vm308_vm1, %v395_v31, %v399_v28  ;;  %v331_v45 = vor.u32 %v329_v37, %v327_v32  ;;  %v413_v46 = vshll.u32 %v5546_v35, 16  ;;  %v337_v47 = vshrl.u32 %v5543_v34, 16  ;;  %v5614_v37 = vld [vmem:[%s5480_s19 + $0x48] sm:$0xff]  }
  0x1f   : > { %v320_v30 = vsel %vm308_vm1, %v315_v22, %v319_v11  ;;  %4963 = vmatprep.mubr.msk.bf16.mxu1 %vm457_vm2, %v400_v39  ;;  %v408_v48 = vsel %vm308_vm1, %v403_v36, %v407_v41  ;;  %v335_v49 = vrot.slane %v333_v42, 1  ;;  %v411_v50 = vor.u32 %v409_v38, %v407_v41  ;;  %v5611_v36 = vld [vmem:[%s5480_s19 + $0x40] sm:$0xff]  }
  0x20   : > { %4943 = vmatprep.mubr.msk.bf16.mxu0 %vm457_vm2, %v320_v30  ;;  %v341_v51 = vshll.u32 %v5555_v43, 16  ;;  %4964 = vmatmul.mubr.msk.bf16.vlgmr.msra.gmra.mxu1 %vm457_vm2, %v408_v48  ;;  %v415_v52 = vrot.slane %v413_v46, 1  ;;  %v417_v53 = vshrl.u32 %v5546_v35, 16  ;;  %v421_v54 = vshll.u32 %v5558_v44, 16 }
  0x21   : > { %4944 = vmatmul.mubr.msk.bf16.vlgmr.msra.gmra.mxu0 %vm457_vm2, %v328_v40  ;;  %v345_v56 = vshrl.u32 %v5555_v43, 16  ;;  %4980 = vmatpush3.bf16.msra.mxu1 %v730_v29  ;;  %v336_v58 = vsel %vm308_vm1, %v331_v45, %v335_v49  ;;  %v339_v59 = vor.u32 %v337_v47, %v335_v49  ;;  %v425_v61 = vshrl.u32 %v5558_v44, 16  ;;  %v5395_v40 = vld [vmem:[%s5480_s19 + $0x90] ss:$0 sps:$4 sm:$0x11]  }
  0x22   : > { %5018 = vmatpush3.bf16.msra.mxu0 %v1008_v26  ;;  %v343_v60 = vrot.slane %v341_v51, 1  ;;  %4947 = vmatprep.mubr.msk.bf16.mxu0 %vm457_vm2, %v336_v58  ;;  %v416_v62 = vsel %vm308_vm1, %v411_v50, %v415_v52  ;;  %v419_v63 = vor.u32 %v417_v53, %v415_v52  ;;  %v423_v0 = vrot.slane %v421_v54, 1  ;;  %v5602_v26 = vld [vmem:[%s5480_s19 + $0x88] sm:$0xff]   ;;  %v4612_v52 = vld [vmem:[%s8206_s1 + $0x6] sm:$0x3] }
  0x23   : > { %v349_v1 = vshll.u32 %v5570_v55, 16  ;;  %4967 = vmatprep.mubr.msk.bf16.mxu1 %vm457_vm2, %v416_v62  ;;  %v429_v7 = vshll.u32 %v5574_v57, 16  ;;  %v353_v9 = vshrl.u32 %v5570_v55, 16  ;;  %v433_v15 = vshrl.u32 %v5574_v57, 16  ;;  %5289 = vmatprep.subr.msk.bf16.mxu1 %vm512_vm0, %v4612_v52  ;;  %v4650_v58 = vld [vmem:[%s8206_s1 + $0x8] sm:$0x3] }
  0x24   : > { %v344_v2 = vsel %vm308_vm1, %v339_v59, %v343_v60  ;;  %v347_v4 = vor.u32 %v345_v56, %v343_v60  ;;  %v427_v14 = vor.u32 %v425_v61, %v423_v0  ;;  %v424_v16 = vsel %vm308_vm1, %v419_v63, %v423_v0  ;;  %5290 = vmatprep.subr.msk.bf16.mxu0 %vm512_vm0, %v4650_v58 }
  0x25   : > { %v351_v11 = vrot.slane %v349_v1, 1  ;;  %v431_v17 = vrot.slane %v429_v7, 1  ;;  %v357_v19 = vshll.u32 %v5585_v8, 16  ;;  %v437_v20 = vshll.u32 %v5589_v10, 16 }
  0x26   : > { %v361_v24 = vshrl.u32 %v5585_v8, 16  ;;  %v365_v31 = vshll.u32 %v5596_v21, 16  ;;  %v441_v32 = vshrl.u32 %v5589_v10, 16  ;;  %v445_v33 = vshll.u32 %v5602_v26, 16 }
  0x27   : > { %v352_v22 = vsel %vm308_vm1, %v347_v4, %v351_v11  ;;  %v432_v27 = vsel %vm308_vm1, %v427_v14, %v431_v17  ;;  %v355_v28 = vor.u32 %v353_v9, %v351_v11  ;;  %v359_v29 = vrot.slane %v357_v19, 1 }
  0x28   : > { %4968 = vmatmul.mubr.msk.bf16.gmra.mxu1 %vm457_vm2, %v424_v16  ;;  %v439_v30 = vrot.slane %v437_v20, 1  ;;  %v435_v38 = vor.u32 %v433_v15, %v431_v17  ;;  %v367_v41 = vrot.slane %v365_v31, 1  ;;  %v447_v45 = vrot.slane %v445_v33, 1 }
  0x29   : > { %4948 = vmatmul.mubr.msk.bf16.gmra.mxu0 %vm457_vm2, %v344_v2  ;;  %4971 = vmatprep.mubr.msk.bf16.mxu1 %vm457_vm2, %v432_v27  ;;  %v363_v39 = vor.u32 %v361_v24, %v359_v29  ;;  %v373_v46 = vshll.u32 %v5611_v36, 16  ;;  %v360_v47 = vsel %vm308_vm1, %v355_v28, %v359_v29  ;;  %v369_v48 = vshrl.u32 %v5596_v21, 16  ;;  %v909_v2 = vld [vmem:[%s5480_s19] sm:$0xe] }
  0x2a   : > { %4951 = vmatprep.mubr.msk.bf16.mxu0 %vm457_vm2, %v352_v22  ;;  %v443_v42 = vor.u32 %v441_v32, %v439_v30  ;;  %v377_v50 = vshrl.u32 %v5611_v36, 16  ;;  %v381_v51 = vshll.u32 %v5614_v37, 16  ;;  %v440_v53 = vsel %vm308_vm1, %v435_v38, %v439_v30  ;;  %v5682_v32 = vld [vmem:[%s8206_s1 + $0xc] sm:$0x3] }
  0x2b   : > { %v368_v49 = vsel %vm308_vm1, %v363_v39, %v367_v41  ;;  %v449_v54 = vshrl.u32 %v5602_v26, 16  ;;  %v453_v56 = vshll.u32 %v5395_v40, 16  ;;  %v375_v60 = vrot.slane %v373_v46, 1  ;;  %v5720_v46 = vld [vmem:[%s5480_s19 + $0x10] sm:$0xff]  }
  0x2c   : > { %v448_v59 = vsel %vm308_vm1, %v443_v42, %v447_v45  ;;  %v371_v61 = vor.u32 %v369_v48, %v367_v41  ;;  %v383_v63 = vrot.slane %v381_v51, 1  ;;  %v385_v7 = vshrl.u32 %v5614_v37, 16 }
  0x2d   : > { %v379_v62 = vor.u32 %v377_v50, %v375_v60  ;;  %v451_v0 = vor.u32 %v449_v54, %v447_v45  ;;  %v455_v1 = vrot.slane %v453_v56, 1  ;;  %v4593_v11 = vcombine.low %v909_v2, %v5501_v5  ;;  %v5717_v45 = vld [vmem:[%s5480_s19 + $0xc] sm:$0xf] }
  0x2e   : > { %v376_v4 = vsel %vm308_vm1, %v371_v61, %v375_v60  ;;  %v387_v15 = vor.u32 %v385_v7, %v383_v63  ;;  %v917_v16 = vrot.slane %v5495_v3, 1  ;;  %v949_v17 = vrot.slane %v5602_v26, 1  ;;  %v5739_v54 = vld [vmem:[%s5480_s19 + $0x28] sm:$0xff]   ;;  %v5754_v61 = vld [vmem:[%s5480_s19 + $0x38] sm:$0xff]  }
  0x2f   : > { %v384_v9 = vsel %vm308_vm1, %v379_v62, %v383_v63  ;;  %v456_v14 = vsel %vm308_vm1, %v451_v0, %v455_v1  ;;  %v916_v19 = vrot.slane %v4593_v11, 1  ;;  %v951_v20 = vrot.slane %v5395_v40, 1  ;;  %v5762_v0 = vld [vmem:[%s5480_s19 + $0x40] sm:$0xff]   ;;  %v5767_v2 = vld [vmem:[%s5480_s19 + $0x48] sm:$0xff]  }
  0x30   : > { %4972 = vmatmul.mubr.msk.bf16.gmra.mxu1 %vm457_vm2, %v440_v53  ;;  %vm915_vm3 = vcmask 1046528   ;;  %v392_v22 = vsel %vm308_vm1, %v387_v15, %v5527_v23  ;;  %v1447_v27 = vsel %vm512_vm0, %v4612_v52, 0  ;;  %v919_v28 = vrot.slane %v5523_v18, 1 }
  0x31   : > { %4952 = vmatmul.mubr.msk.bf16.gmra.mxu0 %vm457_vm2, %v360_v47  ;;  %4975 = vmatprep.mubr.msk.bf16.mxu1 %vm457_vm2, %v448_v59  ;;  %v5655_v5 = vsel %vm915_vm3, %v949_v17, %v951_v20  ;;  %v918_v24 = vsel %vm915_vm3, %v916_v19, %v917_v16  ;;  %v921_v23 = vrot.slane %v5543_v34, 1  ;;  %v1894_v30 = vsel %vm512_vm0, %v4650_v58, 0  ;;  %v5748_v59 = vld [vmem:[%s5480_s19 + $0x30] sm:$0xff]  }
  0x32   : > { %4955 = vmatprep.mubr.msk.bf16.mxu0 %vm457_vm2, %v368_v49  ;;  %v920_v29 = vsel %vm915_vm3, %v917_v16, %v919_v28  ;;  %v929_v39 = vrot.slane %v5596_v21, 1  ;;  %v931_v41 = vrot.slane %v5611_v36, 1  ;;  %v5725_v49 = vld [vmem:[%s5480_s19 + $0x18] sm:$0xff]   ;;  %vm2115_vm4 = vcmask 1045504  }
  0x33   : > { %v922_v31 = vsel %vm915_vm3, %v919_v28, %v921_v23  ;;  %v935_v51 = vrot.slane %v5511_v12, 1  ;;  %v2119_v52 = vrot.slane %v5725_v49, 2  ;;  %v937_v53 = vrot.slane %v5514_v13, 1  ;;  %v5800_v28 = vld [vmem:[%s5480_s19 + $0x58] sm:$0xff]  }
  0x34   : > { %v932_v42 = vsel %vm915_vm3, %v929_v39, %v931_v41  ;;  %v2123_v62 = vrot.slane %v5739_v54, 2  ;;  %v2125_v1 = vrot.slane %v5748_v59, 2  ;;  %v2127_v7 = vrot.slane %v5754_v61, 2 }
  0x35   : > { %v2131_v15 = vrot.slane %v5767_v2, 2  ;;  %v939_v16 = vrot.slane %v5531_v25, 1  ;;  %v941_v19 = vrot.slane %v5546_v35, 1  ;;  %vm1668_vm5 = vsmask.f32 6400 }
  0x36   : > { %v5778_v11 = vsel %vm2115_vm4, %v2125_v1, %v2127_v7  ;;  %vm3315_vm6 = vcmask 1044480   ;;  %vm2868_vm7 = vsmask.f32 5376 }
  0x38   : > { %4976 = vmatmul.mubr.msk.bf16.gmra.mxu1 %vm457_vm2, %v456_v14  ;;  %v2129_v14 = vrot.slane %v5762_v0, 2 }
  0x39   : > { %4956 = vmatmul.mubr.msk.bf16.gmra.mxu0 %vm457_vm2, %v376_v4  ;;  %4981 = vmatprep.mubr.msk.bf16.mxu1 %vm457_vm2, %v5504_v6  ;;  %v5667_v6 = vld [vmem:[%s8206_s1 + $0xa] sm:$0x3] }
  0x3a   : > { %4959 = vmatprep.mubr.msk.bf16.mxu0 %vm457_vm2, %v384_v9  ;;  %v5774_v9 = vsel %vm2115_vm4, %v2123_v62, %v2125_v1  ;;  %v5788_v20 = vsel %vm2115_vm4, %v2127_v7, %v2129_v14  ;;  %v1690_v7 = vshll.u32 %v5725_v49, 16 }
  0x40   : > { %4982 = vmatmul.mubr.msk.bf16.vlgmr.msra.gmra.mxu1 %vm457_vm2, %v5495_v3  ;;  %v923_v3 = vrot.slane %v5555_v43, 1 }
  0x41   : > { %4960 = vmatmul.mubr.msk.bf16.gmra.mxu0 %vm457_vm2, %v392_v22  ;;  %5056 = vmatpush3.bf16.msra.mxu1 %v1447_v27  ;;  %v5791_v22 = vsel %vm2115_vm4, %v2129_v14, %v2131_v15  ;;  %v940_v27 = vsel %vm915_vm3, %v937_v53, %v939_v16 }
  0x42   : > { %5019 = vmatprep.mubr.msk.bf16.mxu0 %vm457_vm2, %v918_v24  ;;  %4985 = vmatprep.mubr.msk.bf16.mxu1 %vm457_vm2, %v5523_v18  ;;  %v925_v18 = vrot.slane %v5570_v55, 1  ;;  %v924_v33 = vsel %vm915_vm3, %v921_v23, %v923_v3  ;;  %v5796_v24 = vld [vmem:[%s5480_s19 + $0x50] sm:$0xff]  }
  0x43   : > { %5291 = vmatprep.subr.msk.bf16.mxu1 %vm512_vm0, %v5667_v6  ;;  %v2133_v23 = vrot.slane %v5796_v24, 2 }
  0x44   : > { %v926_v38 = vsel %vm915_vm3, %v923_v3, %v925_v18  ;;  %v945_v3 = vrot.slane %v5574_v57, 1 }
  0x48   : > { %4986 = vmatmul.mubr.msk.bf16.gmra.mxu1 %vm457_vm2, %v5543_v34  ;;  %v927_v34 = vrot.slane %v5585_v8, 1 }
  0x49   : > { %5020 = vmatmul.mubr.msk.bf16.vlgmr.msra.gmra.mxu0 %vm457_vm2, %v920_v29  ;;  %4989 = vmatprep.mubr.msk.bf16.mxu1 %vm457_vm2, %v5555_v43  ;;  %v2135_v29 = vrot.slane %v5800_v28, 2 }
  0x4a   : > { %5094 = vmatpush3.bf16.msra.mxu0 %v1894_v30  ;;  %5023 = vmatprep.mubr.msk.bf16.mxu0 %vm457_vm2, %v922_v31  ;;  %v928_v43 = vsel %vm915_vm3, %v925_v18, %v927_v34  ;;  %v930_v40 = vsel %vm915_vm3, %v927_v34, %v929_v39  ;;  %v5807_v30 = vsel %vm2115_vm4, %v2131_v15, %v2133_v23  ;;  %v1223_v18 = vld [vmem:[%s5480_s19 + $0x8] sm:$0xe] }
  0x4b   : > { %5292 = vmatprep.subr.msk.bf16.mxu0 %vm512_vm0, %v5682_v32  ;;  %v5812_v31 = vsel %vm2115_vm4, %v2133_v23, %v2135_v29  ;;  %v5825_v34 = vld [vmem:[%s5480_s19 + $0x68] sm:$0xff]  }
  0x50   : > { %4990 = vmatmul.mubr.msk.bf16.gmra.mxu1 %vm457_vm2, %v5570_v55  ;;  %v933_v55 = vrot.slane %v5614_v37, 1 }
  0x51   : > { %5024 = vmatmul.mubr.msk.bf16.gmra.mxu0 %vm457_vm2, %v924_v33  ;;  %4993 = vmatprep.mubr.msk.bf16.mxu1 %vm457_vm2, %v5585_v8  ;;  %v2109_v8 = vld [vmem:[%s5480_s19 + $0x8] sm:$0xc]  ;;  %v5821_v33 = vld [vmem:[%s5480_s19 + $0x60] sm:$0xff]  }
  0x52   : > { %5027 = vmatprep.mubr.msk.bf16.mxu0 %vm457_vm2, %v926_v38  ;;  %v934_v47 = vsel %vm915_vm3, %v931_v41, %v933_v55  ;;  %v4671_v48 = vcombine.low %v2109_v8, %v5717_v45  ;;  %v936_v63 = vsel %vm915_vm3, %v933_v55, %v935_v51  ;;  %v947_v41 = vrot.slane %v5589_v10, 1 }
  0x54   : > { %v2116_v50 = vrot.slane %v4671_v48, 2 }
  0x58   : > { %4994 = vmatmul.mubr.msk.bf16.gmra.mxu1 %vm457_vm2, %v5596_v21  ;;  %v2117_v21 = vrot.slane %v5720_v46, 2 }
  0x59   : > { %5028 = vmatmul.mubr.msk.bf16.gmra.mxu0 %vm457_vm2, %v928_v43  ;;  %4997 = vmatprep.mubr.msk.bf16.mxu1 %vm457_vm2, %v5611_v36  ;;  %v5730_v36 = vld [vmem:[%s5480_s19 + $0x20] sm:$0xff]   ;;  %v2137_v43 = vrot.slane %v5821_v33, 2 }
  0x5a   : > { %5031 = vmatprep.mubr.msk.bf16.mxu0 %vm457_vm2, %v930_v40  ;;  %v5742_v56 = vsel %vm2115_vm4, %v2116_v50, %v2117_v21  ;;  %v2121_v58 = vrot.slane %v5730_v36, 2  ;;  %v5751_v60 = vsel %vm2115_vm4, %v2117_v21, %v2119_v52  ;;  %v4613_v40 = vcombine.low %v1223_v18, %v5717_v45  ;;  %v5848_v50 = vld [vmem:[%s5480_s19 + $0x70] sm:$0xff]   ;;  %v5881_v18 = vld [vmem:[%s5480_s19 + $0x88] sm:$0xff]  }
  0x5b   : > { %v1678_v45 = vshrl.u32 %v5720_v46, 16  ;;  %v1356_v21 = vrot.slane %v5720_v46, 1  ;;  %v2141_v1 = vrot.slane %v5848_v50, 2  ;;  %v1360_v23 = vrot.slane %v5730_v36, 1 }
  0x5c   : > { %v5770_v4 = vsel %vm2115_vm4, %v2121_v58, %v2123_v62  ;;  %v1670_v55 = vshrl.u32 %v4613_v40, 16  ;;  %v1355_v48 = vrot.slane %v4613_v40, 1 }
  0x5d   : > { %v1680_v62 = vrot.slane %v1678_v45, 1  ;;  %v1708_v45 = vshll.u32 %v5739_v54, 16 }
  0x60   : > { %4998 = vmatmul.mubr.msk.bf16.gmra.mxu1 %vm457_vm2, %v5614_v37  ;;  %v5757_v37 = vsel %vm2115_vm4, %v2119_v52, %v2121_v58  ;;  %v950_v52 = vsel %vm915_vm3, %v947_v41, %v949_v17  ;;  %v1687_v17 = vshrl.u32 %v5725_v49, 16 }
  0x61   : > { %5032 = vmatmul.mubr.msk.bf16.gmra.mxu0 %vm457_vm2, %v932_v42  ;;  %5001 = vmatprep.mubr.msk.bf16.mxu1 %vm457_vm2, %v5511_v12  ;;  %v938_v12 = vsel %vm915_vm3, %v935_v51, %v937_v53  ;;  %v1673_v42 = vshll.u32 %v4613_v40, 16  ;;  %v948_v51 = vsel %vm915_vm3, %v945_v3, %v947_v41  ;;  %v5855_v53 = vld [vmem:[%s5480_s19 + $0x78] sm:$0xff]  }
  0x62   : > { %5035 = vmatprep.mubr.msk.bf16.mxu0 %vm457_vm2, %v934_v47  ;;  %v1681_v47 = vshll.u32 %v5720_v46, 16  ;;  %v1357_v46 = vsel %vm915_vm3, %v1355_v48, %v1356_v21  ;;  %v1714_v48 = vshrl.u32 %v5748_v59, 16 }
  0x63   : > { %v1675_v58 = vrot.slane %v1673_v42, 2  ;;  %v1705_v42 = vshrl.u32 %v5739_v54, 16 }
  0x68   : > { %5002 = vmatmul.mubr.msk.bf16.gmra.mxu1 %vm457_vm2, %v5514_v13  ;;  %v942_v13 = vsel %vm915_vm3, %v939_v16, %v941_v19 }
  0x69   : > { %5036 = vmatmul.mubr.msk.bf16.gmra.mxu0 %vm457_vm2, %v936_v63  ;;  %5005 = vmatprep.mubr.msk.bf16.mxu1 %vm457_vm2, %v5531_v25  ;;  %v943_v25 = vrot.slane %v5558_v44, 1  ;;  %v1683_v63 = vrot.slane %v1681_v47, 2 }
  0x6a   : > { %5039 = vmatprep.mubr.msk.bf16.mxu0 %vm457_vm2, %v938_v12 }
  0x6b   : > { %v944_v38 = vsel %vm915_vm3, %v941_v19, %v943_v25  ;;  %v946_v39 = vsel %vm915_vm3, %v943_v25, %v945_v3  ;;  %v1684_v16 = vor.u32 %v1683_v63, %v1680_v62  ;;  %v1696_v19 = vshrl.u32 %v5730_v36, 16 }
  0x6c   : > { %v1689_v25 = vrot.slane %v1687_v17, 1  ;;  %v1692_v3 = vrot.slane %v1690_v7, 2  ;;  %v2647_v62 = vsel %vm512_vm0, %v5682_v32, 0  ;;  %v1707_v63 = vrot.slane %v1705_v42, 1 }
  0x6d   : > { %v1716_v17 = vrot.slane %v1714_v48, 1 }
  0x70   : > { %5006 = vmatmul.mubr.msk.bf16.gmra.mxu1 %vm457_vm2, %v5546_v35  ;;  %v2139_v35 = vrot.slane %v5825_v34, 2 }
  0x71   : > { %5040 = vmatmul.mubr.msk.bf16.gmra.mxu0 %vm457_vm2, %v940_v27  ;;  %5009 = vmatprep.mubr.msk.bf16.mxu1 %vm457_vm2, %v5558_v44  ;;  %v5833_v44 = vsel %vm2115_vm4, %v2135_v29, %v2137_v43  ;;  %v1699_v27 = vshll.u32 %v5730_v36, 16  ;;  %v5878_v29 = vld [vmem:[%s5480_s19 + $0x80] sm:$0xff]  }
  0x72   : > { %5043 = vmatprep.mubr.msk.bf16.mxu0 %vm457_vm2, %v942_v13  ;;  %v5838_v8 = vsel %vm2115_vm4, %v2137_v43, %v2139_v35  ;;  %v5862_v12 = vsel %vm2115_vm4, %v2139_v35, %v2141_v1  ;;  %v1358_v13 = vrot.slane %v5725_v49, 1  ;;  %v2145_v43 = vrot.slane %v5878_v29, 2 }
  0x73   : > { %v2147_v35 = vrot.slane %v5881_v18, 2  ;;  %v2208_v49 = vsel %vm512_vm0, %v5667_v6, 0 }
  0x74   : > { %v1359_v40 = vsel %vm915_vm3, %v1356_v21, %v1358_v13  ;;  %v1361_v36 = vsel %vm915_vm3, %v1358_v13, %v1360_v23  ;;  %v1717_v21 = vshll.u32 %v5748_v59, 16  ;;  %v1723_v13 = vshrl.u32 %v5754_v61, 16 }
  0x75   : > { %v5904_v6 = vsel %vm2115_vm4, %v2145_v43, %v2147_v35 }
  0x78   : > { %5010 = vmatmul.mubr.msk.bf16.gmra.mxu1 %vm457_vm2, %v5574_v57  ;;  %v1672_v57 = vrot.slane %v1670_v55, 1  ;;  %v1693_v55 = vor.u32 %v1692_v3, %v1689_v25 }
  0x79   : > { %5044 = vmatmul.mubr.msk.bf16.gmra.mxu0 %vm457_vm2, %v944_v38  ;;  %5013 = vmatprep.mubr.msk.bf16.mxu1 %vm457_vm2, %v5589_v10  ;;  %v2143_v10 = vrot.slane %v5855_v53, 2  ;;  %v1698_v38 = vrot.slane %v1696_v19, 1 }
  0x7a   : > { %5047 = vmatprep.mubr.msk.bf16.mxu0 %vm457_vm2, %v946_v39  ;;  %v1676_v15 = vor.u32 %v1675_v58, %v1672_v57  ;;  %v1701_v39 = vrot.slane %v1699_v27, 2  ;;  %v5913_v57 = vld [vmem:[%s5480_s19 + $0x90] sm:$0xff]   ;;  %v1694_v58 = vsel %vm1668_vm5, %v1684_v16, %v1693_v55 }
  0x7b   : > { %v5868_v14 = vsel %vm2115_vm4, %v2141_v1, %v2143_v10  ;;  %v5893_v41 = vsel %vm2115_vm4, %v2143_v10, %v2145_v43  ;;  %v1710_v1 = vrot.slane %v1708_v45, 2  ;;  %v5921_v10 = vld [vmem:[%s5480_s19 + $0x98] ss:$0 sps:$4 sm:$0x33]   ;;  %v1368_v43 = vrot.slane %v5762_v0, 1 }
  0x7c   : > { %v1702_v47 = vor.u32 %v1701_v39, %v1698_v38  ;;  %v1735_v38 = vshll.u32 %v5762_v0, 16  ;;  %v1366_v39 = vrot.slane %v5754_v61, 1 }
  0x7d   : > { %v1711_v27 = vor.u32 %v1710_v1, %v1707_v63  ;;  %v5966_v63 = vld [vmem:[%s5480_s19 + $0x14] sm:$0xf]  ;;  %v3309_v1 = vld [vmem:[%s5480_s19 + $0x10] sm:$0x8] }
  0x7e   : > { %v1737_v42 = vrot.slane %v1735_v38, 2  ;;  %v1369_v48 = vsel %vm915_vm3, %v1366_v39, %v1368_v43 }
  0x80   : > { %5014 = vmatmul.mubr.msk.bf16.gmra.mxu1 %vm457_vm2, %v5602_v26  ;;  %v1685_v26 = vsel %vm1668_vm5, %v1676_v15, %v1684_v16  ;;  %v5929_v15 = vld [vmem:[%s8206_s1 + $0x10] sm:$0x3]  ;;  %v2151_v16 = vrot.slane %v5921_v10, 2 }
  0x81   : > { %5048 = vmatmul.mubr.msk.bf16.gmra.mxu0 %vm457_vm2, %v948_v51  ;;  %5057 = vmatprep.mubr.msk.bf16.mxu1 %vm457_vm2, %v1357_v46  ;;  %v1362_v51 = vrot.slane %v5739_v54, 1  ;;  %v1703_v46 = vsel %vm1668_vm5, %v1693_v55, %v1702_v47  ;;  %v1719_v54 = vrot.slane %v1717_v21, 2 }
  0x82   : > { %5051 = vmatprep.mubr.msk.bf16.mxu0 %vm457_vm2, %v950_v52  ;;  %v1364_v52 = vrot.slane %v5748_v59, 1  ;;  %v2149_v59 = vrot.slane %v5913_v57, 2 }
  0x83   : > { %v1363_v7 = vsel %vm915_vm3, %v1360_v23, %v1362_v51  ;;  %v1726_v23 = vshll.u32 %v5754_v61, 16  ;;  %v1720_v3 = vor.u32 %v1719_v54, %v1716_v17 }
  0x84   : > { %v1365_v32 = vsel %vm915_vm3, %v1362_v51, %v1364_v52  ;;  %v5935_v19 = vsel %vm2115_vm4, %v2147_v35, %v2149_v59  ;;  %v5941_v25 = vsel %vm2115_vm4, %v2149_v59, %v2151_v16  ;;  %v1725_v35 = vrot.slane %v1723_v13, 1  ;;  %v5971_v59 = vld [vmem:[%s5480_s19 + $0x18] sm:$0xff]   ;;  %v5976_v13 = vld [vmem:[%s5480_s19 + $0x20] sm:$0xff]  }
  0x85   : > { %v1367_v45 = vsel %vm915_vm3, %v1364_v52, %v1366_v39  ;;  %v1750_v51 = vshrl.u32 %v5796_v24, 16  ;;  %v1753_v52 = vshll.u32 %v5796_v24, 16  ;;  %v1759_v39 = vshrl.u32 %v5800_v28, 16 }
  0x88   : > { %5058 = vmatmul.mubr.msk.bf16.vlgmr.msra.gmra.mxu1 %vm457_vm2, %v1359_v40  ;;  %v1712_v40 = vsel %vm1668_vm5, %v1702_v47, %v1711_v27  ;;  %v1744_v47 = vshll.u32 %v5767_v2, 16 }
  0x89   : > { %5052 = vmatmul.mubr.msk.bf16.gmra.mxu0 %vm457_vm2, %v5655_v5  ;;  %v5901_v5 = vld [vmem:[%s8206_s1 + $0xe] sm:$0x3]  ;;  %5132 = vmatpush3.bf16.msra.mxu1 %v2208_v49  ;;  %v1728_v49 = vrot.slane %v1726_v23, 2  ;;  %v3317_v23 = vrot.slane %v5971_v59, 3 }
  0x8a   : > { %5095 = vmatprep.mubr.msk.bf16.mxu0 %vm457_vm2, %v1685_v26  ;;  %5061 = vmatprep.mubr.msk.bf16.mxu1 %vm457_vm2, %v1361_v36  ;;  %v1732_v26 = vshrl.u32 %v5762_v0, 16  ;;  %v1721_v36 = vsel %vm1668_vm5, %v1711_v27, %v1720_v3  ;;  %v1741_v0 = vshrl.u32 %v5767_v2, 16  ;;  %v1746_v54 = vrot.slane %v1744_v47, 2 }
  0x8b   : > { %5293 = vmatprep.subr.msk.bf16.mxu1 %vm512_vm0, %v5901_v5  ;;  %v1729_v61 = vor.u32 %v1728_v49, %v1725_v35  ;;  %v1755_v27 = vrot.slane %v1753_v52, 2  ;;  %v1768_v49 = vshrl.u32 %v5821_v33, 16 }
  0x8c   : > { %v1734_v55 = vrot.slane %v1732_v26, 1  ;;  %v1743_v17 = vrot.slane %v1741_v0, 1  ;;  %v8209_v26 = vrot.slane %v5976_v13, 3 }
  0x8e   : > { %v1738_v21 = vor.u32 %v1737_v42, %v1734_v55  ;;  %v1747_v38 = vor.u32 %v1746_v54, %v1743_v17  ;;  %v5995_v55 = vsel %vm3315_vm6, %v3317_v23, %v8209_v26  ;;  %v1374_v42 = vrot.slane %v5800_v28, 1 }
  0x8f   : > { %v1786_v17 = vshrl.u32 %v5848_v50, 16  ;;  %v1789_v54 = vshll.u32 %v5848_v50, 16 }
  0x90   : > { %5062 = vmatmul.mubr.msk.bf16.gmra.mxu1 %vm457_vm2, %v1363_v7  ;;  %v4749_v7 = vcombine.low %v3309_v1, %v5966_v63  ;;  %v1739_v16 = vsel %vm1668_vm5, %v1729_v61, %v1738_v21 }
  0x91   : > { %5096 = vmatmul.mubr.msk.bf16.vlgmr.msra.gmra.mxu0 %vm457_vm2, %v1694_v58  ;;  %5065 = vmatprep.mubr.msk.bf16.mxu1 %vm457_vm2, %v1365_v32  ;;  %v1370_v58 = vrot.slane %v5767_v2, 1  ;;  %v1752_v32 = vrot.slane %v1750_v51, 1  ;;  %v1770_v51 = vrot.slane %v1768_v49, 1  ;;  %v1807_v49 = vshll.u32 %v5878_v29, 16 }
  0x92   : > { %5170 = vmatpush3.bf16.msra.mxu0 %v2647_v62  ;;  %5099 = vmatprep.mubr.msk.bf16.mxu0 %vm457_vm2, %v1703_v46  ;;  %v1372_v62 = vrot.slane %v5796_v24, 1  ;;  %v1730_v46 = vsel %vm1668_vm5, %v1720_v3, %v1729_v61  ;;  %v3316_v24 = vrot.slane %v4749_v7, 3  ;;  %v1761_v61 = vrot.slane %v1759_v39, 1 }
  0x93   : > { %5294 = vmatprep.subr.msk.bf16.mxu0 %vm512_vm0, %v5929_v15  ;;  %v1371_v2 = vsel %vm915_vm3, %v1368_v43, %v1370_v58  ;;  %v1756_v43 = vor.u32 %v1755_v27, %v1752_v32  ;;  %v1380_v7 = vrot.slane %v5848_v50, 1  ;;  %v1798_v50 = vshll.u32 %v5855_v53, 16 }
  0x94   : > { %v1373_v3 = vsel %vm915_vm3, %v1370_v58, %v1372_v62  ;;  %v5987_v35 = vsel %vm3315_vm6, %v3316_v24, %v3317_v23  ;;  %v1375_v58 = vsel %vm915_vm3, %v1372_v62, %v1374_v42  ;;  %v1378_v62 = vrot.slane %v5825_v34, 1 }
  0x95   : > { %v1757_v47 = vsel %vm1668_vm5, %v1747_v38, %v1756_v43  ;;  %v1788_v24 = vrot.slane %v1786_v17, 1  ;;  %v1791_v23 = vrot.slane %v1789_v54, 2  ;;  %v1388_v17 = vrot.slane %v5913_v57, 1 }
  0x98   : > { %5066 = vmatmul.mubr.msk.bf16.gmra.mxu1 %vm457_vm2, %v1367_v45  ;;  %v1376_v45 = vrot.slane %v5821_v33, 1 }
  0x99   : > { %5100 = vmatmul.mubr.msk.bf16.gmra.mxu0 %vm457_vm2, %v1712_v40  ;;  %5069 = vmatprep.mubr.msk.bf16.mxu1 %vm457_vm2, %v1369_v48  ;;  %v1762_v40 = vshll.u32 %v5800_v28, 16  ;;  %v1748_v48 = vsel %vm1668_vm5, %v1738_v21, %v1747_v38  ;;  %v1777_v28 = vshrl.u32 %v5825_v34, 16  ;;  %v1381_v38 = vsel %vm915_vm3, %v1378_v62, %v1380_v7 }
  0x9a   : > { %5103 = vmatprep.mubr.msk.bf16.mxu0 %vm457_vm2, %v1721_v36  ;;  %v1771_v36 = vshll.u32 %v5821_v33, 16  ;;  %v1377_v1 = vsel %vm915_vm3, %v1374_v42, %v1376_v45  ;;  %v1780_v33 = vshll.u32 %v5825_v34, 16  ;;  %v1795_v34 = vshrl.u32 %v5855_v53, 16 }
  0x9b   : > { %v1764_v0 = vrot.slane %v1762_v40, 2  ;;  %v1779_v32 = vrot.slane %v1777_v28, 1  ;;  %v1792_v40 = vor.u32 %v1791_v23, %v1788_v24  ;;  %v1384_v42 = vrot.slane %v5878_v29, 1  ;;  %v5416_v24 = vld [vmem:[%s5480_s19 + $0x98] ss:$0 sps:$4 sm:$0x11]  }
  0x9c   : > { %v1773_v52 = vrot.slane %v1771_v36, 2  ;;  %v1782_v27 = vrot.slane %v1780_v33, 2  ;;  %v1382_v36 = vrot.slane %v5855_v53, 1  ;;  %v1813_v53 = vshrl.u32 %v5881_v18, 16 }
  0x9d   : > { %v1822_v28 = vshrl.u32 %v5913_v57, 16  ;;  %v1825_v33 = vshll.u32 %v5913_v57, 16  ;;  %v1831_v57 = vshrl.u32 %v5921_v10, 16 }
  0x9e   : > { %v1774_v21 = vor.u32 %v1773_v52, %v1770_v51  ;;  %v1783_v39 = vor.u32 %v1782_v27, %v1779_v32  ;;  %v1809_v51 = vrot.slane %v1807_v49, 2  ;;  %v1383_v52 = vsel %vm915_vm3, %v1380_v7, %v1382_v36 }
  0x9f   : > { %v1824_v32 = vrot.slane %v1822_v28, 1  ;;  %v1827_v27 = vrot.slane %v1825_v33, 2  ;;  %v6106_v28 = vld [vmem:[%s5480_s19 + $0x48] sm:$0xff]  }
  0xa0   : > { %5070 = vmatmul.mubr.msk.bf16.gmra.mxu1 %vm457_vm2, %v1371_v2 }
  0xa1   : > { %5104 = vmatmul.mubr.msk.bf16.gmra.mxu0 %vm457_vm2, %v1730_v46  ;;  %5073 = vmatprep.mubr.msk.bf16.mxu1 %vm457_vm2, %v1373_v3  ;;  %v1765_v46 = vor.u32 %v1764_v0, %v1761_v61  ;;  %v1379_v3 = vsel %vm915_vm3, %v1376_v45, %v1378_v62  ;;  %v1784_v45 = vsel %vm1668_vm5, %v1774_v21, %v1783_v39  ;;  %v1800_v61 = vrot.slane %v1798_v50, 2 }
  0xa2   : > { %5107 = vmatprep.mubr.msk.bf16.mxu0 %vm457_vm2, %v1739_v16  ;;  %v1793_v0 = vsel %vm1668_vm5, %v1783_v39, %v1792_v40  ;;  %v1815_v62 = vrot.slane %v1813_v53, 1  ;;  %v1390_v39 = vrot.slane %v5416_v24, 1  ;;  %v6090_v53 = vld [vmem:[%s5480_s19 + $0x38] sm:$0xff]  }
  0xa3   : > { %v1766_v16 = vsel %vm1668_vm5, %v1756_v43, %v1765_v46  ;;  %v1775_v2 = vsel %vm1668_vm5, %v1765_v46, %v1774_v21  ;;  %v1804_v43 = vshrl.u32 %v5878_v29, 16  ;;  %v1816_v29 = vshll.u32 %v5881_v18, 16 }
  0xa4   : > { %v1386_v21 = vrot.slane %v5881_v18, 1 }
  0xa5   : > { %v1818_v7 = vrot.slane %v1816_v29, 2  ;;  %v6102_v29 = vld [vmem:[%s5480_s19 + $0x40] sm:$0xff]  }
  0xa6   : > { %v1389_v23 = vsel %vm915_vm3, %v1386_v21, %v1388_v17 }
  0xa7   : > { %v1819_v18 = vor.u32 %v1818_v7, %v1815_v62 }
  0xa8   : > { %5074 = vmatmul.mubr.msk.bf16.gmra.mxu1 %vm457_vm2, %v1375_v58  ;;  %v1385_v58 = vsel %vm915_vm3, %v1382_v36, %v1384_v42 }
  0xa9   : > { %5108 = vmatmul.mubr.msk.bf16.gmra.mxu0 %vm457_vm2, %v1748_v48  ;;  %5077 = vmatprep.mubr.msk.bf16.mxu1 %vm457_vm2, %v1377_v1  ;;  %v1797_v48 = vrot.slane %v1795_v34, 1  ;;  %v2423_v34 = vld [vmem:[%s5480_s19 + $0x10] sm:$0xc] }
  0xaa   : > { %5111 = vmatprep.mubr.msk.bf16.mxu0 %vm457_vm2, %v1757_v47  ;;  %v1806_v47 = vrot.slane %v1804_v43, 1  ;;  %v6057_v36 = vcombine.low %v2423_v34, %v5966_v63 }
  0xab   : > { %v1801_v1 = vor.u32 %v1800_v61, %v1797_v48  ;;  %v2556_v48 = vrot.slane %v5971_v59, 2 }
  0xac   : > { %v1810_v46 = vor.u32 %v1809_v51, %v1806_v47  ;;  %v3094_v47 = vsel %vm512_vm0, %v5901_v5, 0  ;;  %v2558_v51 = vrot.slane %v5976_v13, 2  ;;  %v3408_v5 = vsel %vm512_vm0, %v5929_v15, 0 }
  0xad   : > { %v1802_v54 = vsel %vm1668_vm5, %v1792_v40, %v1801_v1  ;;  %v1833_v40 = vrot.slane %v1831_v57, 1 }
  0xae   : > { %v1820_v50 = vsel %vm1668_vm5, %v1810_v46, %v1819_v18 }
  0xb0   : > { %5078 = vmatmul.mubr.msk.bf16.gmra.mxu1 %vm457_vm2, %v1379_v3  ;;  %v1834_v3 = vshll.u32 %v5921_v10, 16 }
  0xb1   : > { %5112 = vmatmul.mubr.msk.bf16.gmra.mxu0 %vm457_vm2, %v1766_v16  ;;  %5081 = vmatprep.mubr.msk.bf16.mxu1 %vm457_vm2, %v1381_v38  ;;  %v1811_v16 = vsel %vm1668_vm5, %v1801_v1, %v1810_v46  ;;  %v1828_v38 = vor.u32 %v1827_v27, %v1824_v32 }
  0xb2   : > { %5115 = vmatprep.mubr.msk.bf16.mxu0 %vm457_vm2, %v1775_v2  ;;  %v1387_v2 = vsel %vm915_vm3, %v1384_v42, %v1386_v21  ;;  %v1836_v43 = vrot.slane %v1834_v3, 2  ;;  %v1391_v42 = vsel %vm915_vm3, %v1388_v17, %v1390_v39  ;;  %v2568_v17 = vrot.slane %v6106_v28, 2 }
  0xb3   : > { %v1829_v49 = vsel %vm1668_vm5, %v1819_v18, %v1828_v38 }
  0xb4   : > { %v1837_v10 = vor.u32 %v1836_v43, %v1833_v40 }
  0xb6   : > { %v1838_v63 = vsel %vm1668_vm5, %v1828_v38, %v1837_v10 }
  0xb8   : > { %5082 = vmatmul.mubr.msk.bf16.gmra.mxu1 %vm457_vm2, %v1383_v52  ;;  %v2559_v52 = vsel %vm2115_vm4, %v2556_v48, %v2558_v51 }
  0xb9   : > { %5116 = vmatmul.mubr.msk.bf16.gmra.mxu0 %vm457_vm2, %v1784_v45  ;;  %5085 = vmatprep.mubr.msk.bf16.mxu1 %vm457_vm2, %v1385_v58  ;;  %v2555_v45 = vrot.slane %v6057_v36, 2  ;;  %v6084_v58 = vld [vmem:[%s5480_s19 + $0x30] sm:$0xff]  }
  0xba   : > { %5119 = vmatprep.mubr.msk.bf16.mxu0 %vm457_vm2, %v1793_v0  ;;  %v6070_v0 = vld [vmem:[%s5480_s19 + $0x28] sm:$0xff]  }
  0xbb   : > { %v2557_v61 = vsel %vm2115_vm4, %v2555_v45, %v2556_v48 }
  0xc0   : > { %5086 = vmatmul.mubr.msk.bf16.gmra.mxu1 %vm457_vm2, %v1387_v2  ;;  %v6136_v2 = vld [vmem:[%s5480_s19 + $0x58] sm:$0xff]  }
  0xc1   : > { %5120 = vmatmul.mubr.msk.bf16.gmra.mxu0 %vm457_vm2, %v1802_v54  ;;  %5089 = vmatprep.mubr.msk.bf16.mxu1 %vm457_vm2, %v1389_v23  ;;  %v2572_v3 = vrot.slane %v6136_v2, 2 }
  0xc2   : > { %5123 = vmatprep.mubr.msk.bf16.mxu0 %vm457_vm2, %v1811_v16  ;;  %v6128_v16 = vld [vmem:[%s5480_s19 + $0x50] sm:$0xff]  }
  0xc3   : > { %v2570_v23 = vrot.slane %v6128_v16, 2 }
  0xc5   : > { %v2571_v34 = vsel %vm2115_vm4, %v2568_v17, %v2570_v23 }
  0xc8   : > { %5090 = vmatmul.mubr.msk.bf16.gmra.mxu1 %vm457_vm2, %v1391_v42 }
  0xc9   : > { %5124 = vmatmul.mubr.msk.bf16.gmra.mxu0 %vm457_vm2, %v1820_v50  ;;  %5133 = vmatprep.mubr.msk.bf16.mxu1 %vm457_vm2, %v5742_v56  ;;  %v2560_v56 = vrot.slane %v6070_v0, 2  ;;  %v6160_v50 = vld [vmem:[%s5480_s19 + $0x60] sm:$0xff]  }
  0xca   : > { %5127 = vmatprep.mubr.msk.bf16.mxu0 %vm457_vm2, %v1829_v49  ;;  %v6168_v49 = vld [vmem:[%s5480_s19 + $0x68] sm:$0xff]   ;;  %v2574_v10 = vrot.slane %v6160_v50, 2 }
  0xcb   : > { %v2561_v1 = vsel %vm2115_vm4, %v2558_v51, %v2560_v56 }
  0xcc   : > { %v2575_v51 = vsel %vm2115_vm4, %v2572_v3, %v2574_v10 }
  0xd0   : > { %5134 = vmatmul.mubr.msk.bf16.vlgmr.msra.gmra.mxu1 %vm457_vm2, %v5751_v60  ;;  %v2562_v60 = vrot.slane %v6084_v58, 2 }
  0xd1   : > { %5128 = vmatmul.mubr.msk.bf16.gmra.mxu0 %vm457_vm2, %v1838_v63  ;;  %5208 = vmatpush3.bf16.msra.mxu1 %v3094_v47  ;;  %v2576_v63 = vrot.slane %v6168_v49, 2 }
  0xd2   : > { %5171 = vmatprep.mubr.msk.bf16.mxu0 %vm457_vm2, %v2557_v61  ;;  %5137 = vmatprep.mubr.msk.bf16.mxu1 %vm457_vm2, %v5757_v37  ;;  %v2564_v37 = vrot.slane %v6090_v53, 2  ;;  %v2563_v15 = vsel %vm2115_vm4, %v2560_v56, %v2562_v60  ;;  %v6192_v56 = vld [vmem:[%s5480_s19 + $0x70] sm:$0xff]  }
  0xd4   : > { %v2565_v46 = vsel %vm2115_vm4, %v2562_v60, %v2564_v37 }
  0xd8   : > { %5138 = vmatmul.mubr.msk.bf16.gmra.mxu1 %vm457_vm2, %v5770_v4  ;;  %v2566_v4 = vrot.slane %v6102_v29, 2 }
  0xd9   : > { %5172 = vmatmul.mubr.msk.bf16.vlgmr.msra.gmra.mxu0 %vm457_vm2, %v2559_v52  ;;  %5141 = vmatprep.mubr.msk.bf16.mxu1 %vm457_vm2, %v5774_v9 }
  0xda   : > { %5246 = vmatpush3.bf16.msra.mxu0 %v3408_v5  ;;  %5175 = vmatprep.mubr.msk.bf16.mxu0 %vm457_vm2, %v2561_v1  ;;  %v2567_v7 = vsel %vm2115_vm4, %v2564_v37, %v2566_v4  ;;  %v6200_v1 = vld [vmem:[%s5480_s19 + $0x78] sm:$0xff]   ;;  %v2578_v37 = vrot.slane %v6192_v56, 2 }
  0xe0   : > { %v6113_v21 = vpop.f32.mrf.mxu1  ;;  %5142 = vmatmul.mubr.msk.bf16.gmra.mxu1 %vm457_vm2, %v5778_v11  ;;  %v2569_v11 = vsel %vm2115_vm4, %v2566_v4, %v2568_v17  ;;  %v2580_v4 = vrot.slane %v6200_v1, 2 }
  0xe1   : > { %v6108_v33 = vpop.f32.mrf.mxu0  ;;  %5176 = vmatmul.mubr.msk.bf16.gmra.mxu0 %vm457_vm2, %v2563_v15  ;;  %5145 = vmatprep.mubr.msk.bf16.mxu1 %vm457_vm2, %v5788_v20 }
  0xe2   : > { %5179 = vmatprep.mubr.msk.bf16.mxu0 %vm457_vm2, %v2565_v46  ;;  %v6122_v54 = vpop.f32.mrf.mxu1 }
  0xe3   : > { %v6117_v9 = vpop.f32.mrf.mxu0 }
  0xe4   : > { %v6130_v32 = vpop.f32.mrf.mxu1 }
  0xe5   : > { %v6124_v62 = vpop.f32.mrf.mxu0 }
  0xe6   : > { %v6138_v24 = vpop.f32.mrf.mxu1 }
  0xe7   : > { %v6132_v27 = vpop.f32.mrf.mxu0 }
  0xe8   : > { %v6145_v18 = vpop.f32.mrf.mxu1  ;;  %5146 = vmatmul.mubr.msk.bf16.gmra.mxu1 %vm457_vm2, %v5791_v22  ;;  %v2573_v22 = vsel %vm2115_vm4, %v2570_v23, %v2572_v3  ;;  %v6224_v23 = vld [vmem:[%s5480_s19 + $0x80] sm:$0xff]  }
  0xe9   : > { %v6140_v20 = vpop.f32.mrf.mxu0  ;;  %5180 = vmatmul.mubr.msk.bf16.gmra.mxu0 %vm457_vm2, %v2567_v7  ;;  %5149 = vmatprep.mubr.msk.bf16.mxu1 %vm457_vm2, %v5807_v30  ;;  %8292 = vst [vmem:[#allocation10_spill] sm:$0xff] %v6224_v23 }
  0xea   : > { %5183 = vmatprep.mubr.msk.bf16.mxu0 %vm457_vm2, %v2569_v11  ;;  %v6154_v38 = vpop.f32.mrf.mxu1  ;;  %v2579_v11 = vsel %vm2115_vm4, %v2576_v63, %v2578_v37 }
  0xeb   : > { %v6149_v57 = vpop.f32.mrf.mxu0 }
  0xec   : > { %v6162_v40 = vpop.f32.mrf.mxu1 }
  0xed   : > { %v6156_v39 = vpop.f32.mrf.mxu0  ;;  %8284 = vst [vmem:[#allocation2_spill] sm:$0xff] %v6162_v40 }
  0xee   : > { %v6170_v42 = vpop.f32.mrf.mxu1 }
  0xef   : > { %v6164_v43 = vpop.f32.mrf.mxu0  ;;  %8285 = vst [vmem:[#allocation3_spill] sm:$0xff] %v6170_v42 }
  0xf0   : > { %v6177_v45 = vpop.f32.mrf.mxu1  ;;  %5150 = vmatmul.mubr.msk.bf16.gmra.mxu1 %vm457_vm2, %v5812_v31  ;;  %v2577_v31 = vsel %vm2115_vm4, %v2574_v10, %v2576_v63 }
  0xf1   : > { %v6172_v30 = vpop.f32.mrf.mxu0  ;;  %5184 = vmatmul.mubr.msk.bf16.gmra.mxu0 %vm457_vm2, %v2571_v34  ;;  %8286 = vst [vmem:[#allocation4_spill] sm:$0xff] %v6177_v45  ;;  %5153 = vmatprep.mubr.msk.bf16.mxu1 %vm457_vm2, %v5833_v44 }
  0xf2   : > { %5187 = vmatprep.mubr.msk.bf16.mxu0 %vm457_vm2, %v2573_v22  ;;  %v6186_v61 = vpop.f32.mrf.mxu1  ;;  %v6232_v22 = vld [vmem:[%s5480_s19 + $0x88] sm:$0xff]  }
  0xf3   : > { %v6181_v48 = vpop.f32.mrf.mxu0  ;;  %8287 = vst [vmem:[#allocation5_spill] sm:$0xff] %v6186_v61  ;;  %8294 = vst [vmem:[#allocation12_spill] sm:$0xff] %v6232_v22  ;;  %v6264_v61 = vld [vmem:[%s5480_s19 + $0x98] sm:$0xff]  }
  0xf4   : > { %v6194_v52 = vpop.f32.mrf.mxu1  ;;  %8296 = vst [vmem:[#allocation14_spill] sm:$0xff] %v6264_v61 }
  0xf5   : > { %v6188_v47 = vpop.f32.mrf.mxu0  ;;  %8288 = vst [vmem:[#allocation6_spill] sm:$0xff] %v6194_v52  ;;  %v6258_v52 = vld [vmem:[%s5480_s19 + $0x90] sm:$0xff]  }
  0xf6   : > { %v6202_v60 = vpop.f32.mrf.mxu1 }
  0xf7   : > { %v6196_v5 = vpop.f32.mrf.mxu0  ;;  %8289 = vst [vmem:[#allocation7_spill] sm:$0xff] %v6202_v60 }
  0xf8   : > { %v6209_v15 = vpop.f32.mrf.mxu1  ;;  %5154 = vmatmul.mubr.msk.bf16.gmra.mxu1 %vm457_vm2, %v5838_v8  ;;  %v2581_v8 = vsel %vm2115_vm4, %v2578_v37, %v2580_v4  ;;  %v2584_v37 = vrot.slane %v6232_v22, 2 }
  0xf9   : > { %v6204_v44 = vpop.f32.mrf.mxu0  ;;  %5188 = vmatmul.mubr.msk.bf16.gmra.mxu0 %vm457_vm2, %v2575_v51  ;;  %8290 = vst [vmem:[#allocation8_spill] sm:$0xff] %v6209_v15  ;;  %5157 = vmatprep.mubr.msk.bf16.mxu1 %vm457_vm2, %v5862_v12  ;;  %v2582_v12 = vrot.slane %v6224_v23, 2 }
  0xfa   : > { %5191 = vmatprep.mubr.msk.bf16.mxu0 %vm457_vm2, %v2577_v31  ;;  %v6218_v17 = vpop.f32.mrf.mxu1 }
  0xfb   : > { %v6213_v46 = vpop.f32.mrf.mxu0  ;;  %8291 = vst [vmem:[#allocation9_spill] sm:$0xff] %v6218_v17  ;;  %v2878_v17 = vshrl.u32 %v5971_v59, 16  ;;  %v2583_v60 = vsel %vm2115_vm4, %v2580_v4, %v2582_v12 }
  0xfc   : > { %v6226_v3 = vpop.f32.mrf.mxu1 }
  0xfd   : > { %v6220_v7 = vpop.f32.mrf.mxu0  ;;  %8293 = vst [vmem:[#allocation11_spill] sm:$0xff] %v6226_v3  ;;  %v2873_v3 = vshll.u32 %v6057_v36, 16 }
  0xfe   : > { %v6234_v10 = vpop.f32.mrf.mxu1 }
  0xff   : > { %v6228_v34 = vpop.f32.mrf.mxu0  ;;  %8295 = vst [vmem:[#allocation13_spill] sm:$0xff] %v6234_v10  ;;  %v2875_v22 = vrot.slane %v2873_v3, 3 }
 0x100   : > { %v4983_v63 = vpop.f32.mrf.mxu1  ;;  %5158 = vmatmul.mubr.msk.bf16.gmra.mxu1 %vm457_vm2, %v5868_v14  ;;  %v2881_v14 = vshll.u32 %v5971_v59, 16 }
 0x101   : > { %v6236_v51 = vpop.f32.mrf.mxu0  ;;  %5192 = vmatmul.mubr.msk.bf16.gmra.mxu0 %vm457_vm2, %v2579_v11  ;;  %v775_v26 = vadd.f32 %v4983_v63, %v6108_v33  ;;  %5161 = vmatprep.mubr.msk.bf16.mxu1 %vm457_vm2, %v5893_v41  ;;  %v2585_v41 = vsel %vm2115_vm4, %v2582_v12, %v2584_v37  ;;  %v2586_v12 = vrot.slane %v6258_v52, 2 }
 0x102   : > { %5195 = vmatprep.mubr.msk.bf16.mxu0 %vm457_vm2, %v2581_v8  ;;  %v766_v11 = vpop.f32.mrf.mxu1  ;;  %v2870_v8 = vshrl.u32 %v6057_v36, 16 }
 0x103   : > { %v6243_v31 = vpop.f32.mrf.mxu0  ;;  %v767_v15 = vadd.f32 %v766_v11, %v6117_v9  ;;  %v2880_v9 = vrot.slane %v2878_v17, 2  ;;  %v2883_v11 = vrot.slane %v2881_v14, 3 }
 0x104   : > { %v4984_v33 = vpop.f32.mrf.mxu1  ;;  %v2872_v59 = vrot.slane %v2870_v8, 2 }
 0x105   : > { %v6249_v10 = vpop.f32.mrf.mxu0  ;;  %v778_v45 = vadd.f32 %v4984_v33, %v6124_v62  ;;  %v2588_v33 = vrot.slane %v6264_v61, 2  ;;  %v2884_v14 = vor.u32 %v2883_v11, %v2880_v9 }
 0x106   : > { %v769_v36 = vpop.f32.mrf.mxu1  ;;  %v2876_v8 = vor.u32 %v2875_v22, %v2872_v59 }
 0x107   : > { %v6260_v63 = vpop.f32.mrf.mxu0  ;;  %v770_v4 = vadd.f32 %v769_v36, %v6132_v27  ;;  %v2890_v27 = vshll.u32 %v5976_v13, 16 }
 0x108   : > { %v4987_v40 = vpop.f32.mrf.mxu1  ;;  %5162 = vmatmul.mubr.msk.bf16.gmra.mxu1 %vm457_vm2, %v5904_v6  ;;  %v2896_v6 = vshrl.u32 %v6070_v0, 16 }
 0x109   : > { %v5021_v42 = vpop.f32.mrf.mxu0  ;;  %5196 = vmatmul.mubr.msk.bf16.gmra.mxu0 %vm457_vm2, %v2583_v60  ;;  %v791_v60 = vadd.f32 %v4987_v40, %v6140_v20  ;;  %5165 = vmatprep.mubr.msk.bf16.mxu1 %vm457_vm2, %v5935_v19  ;;  %v2587_v40 = vsel %vm2115_vm4, %v2584_v37, %v2586_v12  ;;  %v5437_v19 = vld [vmem:[%s5480_s19 + $0xa0] ss:$0 sps:$4 sm:$0x33]   ;;  %v2892_v9 = vrot.slane %v2890_v27, 3  ;;  %v2908_v27 = vshll.u32 %v6084_v58, 16 }
 0x10a   : > { %v6269_v23 = vadd.f32 %v5021_v42, %v775_v26  ;;  %5199 = vmatprep.mubr.msk.bf16.mxu0 %vm457_vm2, %v2585_v41  ;;  %v2887_v26 = vshrl.u32 %v5976_v13, 16  ;;  %v782_v42 = vpop.f32.mrf.mxu1  ;;  %v2899_v41 = vshll.u32 %v6070_v0, 16 }
 0x10b   : > { %v1044_v62 = vpop.f32.mrf.mxu0  ;;  %v783_v36 = vadd.f32 %v782_v42, %v6149_v57  ;;  %v2885_v57 = vsel %vm2868_vm7, %v2876_v8, %v2884_v14 }
 0x10c   : > { %8297 = vst [vmem:[#allocation15_spill] sm:$0xff] %v6269_v23  ;;  %v6277_v17 = vadd.f32 %v1044_v62, %v767_v15  ;;  %v4988_v15 = vpop.f32.mrf.mxu1  ;;  %v2889_v59 = vrot.slane %v2887_v26, 2  ;;  %v2901_v37 = vrot.slane %v2899_v41, 3  ;;  %v2905_v26 = vshrl.u32 %v6084_v58, 16 }
 0x10d   : > { %v5022_v3 = vpop.f32.mrf.mxu0  ;;  %v794_v23 = vadd.f32 %v4988_v15, %v6156_v39  ;;  %v2914_v41 = vshrl.u32 %v6090_v53, 16 }
 0x10e   : > { %8298 = vst [vmem:[#allocation16_spill] sm:$0xff] %v6277_v17  ;;  %v6286_v20 = vadd.f32 %v5022_v3, %v778_v45  ;;  %v2589_v17 = vsel %vm2115_vm4, %v2586_v12, %v2588_v33  ;;  %v785_v11 = vpop.f32.mrf.mxu1  ;;  %v2898_v45 = vrot.slane %v2896_v6, 2  ;;  %v2590_v12 = vrot.slane %v5437_v19, 2 }
 0x10f   : > { %v1047_v62 = vpop.f32.mrf.mxu0  ;;  %v786_v42 = vadd.f32 %v785_v11, %v6164_v43  ;;  %v2893_v43 = vor.u32 %v2892_v9, %v2889_v59  ;;  %v2910_v11 = vrot.slane %v2908_v27, 3 }
 0x110   : > { %v6292_v22 = vadd.f32 %v1047_v62, %v770_v4  ;;  %v4991_v39 = vpop.f32.mrf.mxu1  ;;  %5166 = vmatmul.mubr.msk.bf16.gmra.mxu1 %vm457_vm2, %v5941_v25  ;;  %v2591_v15 = vsel %vm2115_vm4, %v2588_v33, %v2590_v12 }
 0x111   : > { %v5025_v61 = vpop.f32.mrf.mxu0  ;;  %5200 = vmatmul.mubr.msk.bf16.gmra.mxu0 %vm457_vm2, %v2587_v40  ;;  %v807_v8 = vadd.f32 %v4991_v39, %v6172_v30  ;;  %5209 = vmatprep.mubr.msk.bf16.mxu1 %vm457_vm2, %v2885_v57  ;;  %v2917_v40 = vshll.u32 %v6090_v53, 16  ;;  %v2894_v9 = vsel %vm2868_vm7, %v2884_v14, %v2893_v43 }
 0x112   : > { %v6297_v3 = vadd.f32 %v5025_v61, %v791_v60  ;;  %5203 = vmatprep.mubr.msk.bf16.mxu0 %vm457_vm2, %v2589_v17  ;;  %v798_v61 = vpop.f32.mrf.mxu1  ;;  %v2902_v17 = vor.u32 %v2901_v37, %v2898_v45 }
 0x113   : > { %v1060_v4 = vpop.f32.mrf.mxu0  ;;  %v799_v25 = vadd.f32 %v798_v61, %v6181_v48  ;;  %v2919_v39 = vrot.slane %v2917_v40, 3 }
 0x114   : > { %v6305_v6 = vadd.f32 %v1060_v4, %v783_v36  ;;  %v4992_v62 = vpop.f32.mrf.mxu1  ;;  %v2907_v36 = vrot.slane %v2905_v26, 2  ;;  %v2903_v48 = vsel %vm2868_vm7, %v2893_v43, %v2902_v17  ;;  %v3321_v4 = vrot.slane %v6070_v0, 3 }
 0x115   : > { %v5026_v60 = vpop.f32.mrf.mxu0  ;;  %v810_v57 = vadd.f32 %v4992_v62, %v6188_v47  ;;  %v8299_v62 = vrot.slane %v5976_v13, 3 }
 0x116   : > { %v6311_v19 = vadd.f32 %v5026_v60, %v794_v23  ;;  %v801_v45 = vpop.f32.mrf.mxu1  ;;  %v2916_v23 = vrot.slane %v2914_v41, 2  ;;  %v2911_v14 = vor.u32 %v2910_v11, %v2907_v36  ;;  %v2932_v60 = vshrl.u32 %v6106_v28, 16 }
 0x117   : > { %v1063_v30 = vpop.f32.mrf.mxu0  ;;  %v802_v33 = vadd.f32 %v801_v45, %v6196_v5  ;;  %v2923_v5 = vshrl.u32 %v6102_v29, 16  ;;  %v2935_v41 = vshll.u32 %v6106_v28, 16 }
 0x118   : > { %v6315_v59 = vadd.f32 %v1063_v30, %v786_v42  ;;  %v4995_v47 = vpop.f32.mrf.mxu1  ;;  %5210 = vmatmul.mubr.msk.bf16.vlgmr.msra.gmra.mxu1 %vm457_vm2, %v2894_v9  ;;  %v3322_v30 = vsel %vm3315_vm6, %v8299_v62, %v3321_v4 }
 0x119   : > { %v5029_v37 = vpop.f32.mrf.mxu0  ;;  %5204 = vmatmul.mubr.msk.bf16.gmra.mxu0 %vm457_vm2, %v2591_v15  ;;  %v823_v26 = vadd.f32 %v4995_v47, %v6204_v44  ;;  %5213 = vmatprep.mubr.msk.bf16.mxu1 %vm457_vm2, %v2903_v48  ;;  %v2912_v15 = vsel %vm2868_vm7, %v2902_v17, %v2911_v14  ;;  %v2925_v9 = vrot.slane %v2923_v5, 2  ;;  %v3325_v47 = vrot.slane %v6090_v53, 3 }
 0x11a   : > { %v6321_v12 = vadd.f32 %v5029_v37, %v807_v8  ;;  %5247 = vmatprep.mubr.msk.bf16.mxu0 %vm457_vm2, %v5987_v35  ;;  %v2926_v8 = vshll.u32 %v6102_v29, 16  ;;  %v814_v43 = vpop.f32.mrf.mxu1  ;;  %v2920_v35 = vor.u32 %v2919_v39, %v2916_v23  ;;  %v2937_v23 = vrot.slane %v2935_v41, 3 }
 0x11b   : > { %v1076_v42 = vpop.f32.mrf.mxu0  ;;  %v815_v40 = vadd.f32 %v814_v43, %v6213_v46  ;;  %v2950_v43 = vshrl.u32 %v6136_v2, 16 }
 0x11c   : > { %v6328_v27 = vadd.f32 %v1076_v42, %v799_v25  ;;  %v4996_v44 = vpop.f32.mrf.mxu1  ;;  %v2928_v45 = vrot.slane %v2926_v8, 3  ;;  %v2921_v46 = vsel %vm2868_vm7, %v2911_v14, %v2920_v35  ;;  %v2944_v42 = vshll.u32 %v6128_v16, 16 }
 0x11d   : > { %v5030_v61 = vpop.f32.mrf.mxu0  ;;  %v826_v36 = vadd.f32 %v4996_v44, %v6220_v7  ;;  %v3323_v7 = vrot.slane %v6084_v58, 3 }
 0x11e   : > { %v6336_v0 = vadd.f32 %v5030_v61, %v810_v57  ;;  %v817_v37 = vpop.f32.mrf.mxu1  ;;  %v2934_v57 = vrot.slane %v2932_v60, 2  ;;  %v2953_v61 = vshll.u32 %v6136_v2, 16 }
 0x11f   : > { %v1079_v25 = vpop.f32.mrf.mxu0  ;;  %v818_v17 = vadd.f32 %v817_v37, %v6228_v34  ;;  %v2929_v34 = vor.u32 %v2928_v45, %v2925_v9  ;;  %v3324_v41 = vsel %vm3315_vm6, %v3321_v4, %v3323_v7 }
 0x120   : > { %v6343_v11 = vadd.f32 %v1079_v25, %v802_v33  ;;  %v4999_v39 = vpop.f32.mrf.mxu1  ;;  %5214 = vmatmul.mubr.msk.bf16.gmra.mxu1 %vm457_vm2, %v2912_v15  ;;  %v2938_v58 = vor.u32 %v2937_v23, %v2934_v57  ;;  %v2946_v15 = vrot.slane %v2944_v42, 3  ;;  %v2955_v4 = vrot.slane %v2953_v61, 3 }
 0x121   : > { %v5033_v48 = vpop.f32.mrf.mxu0  ;;  %5248 = vmatmul.mubr.msk.bf16.vlgmr.msra.gmra.mxu0 %vm457_vm2, %v5995_v55  ;;  %v2941_v55 = vshrl.u32 %v6128_v16, 16  ;;  %v839_v14 = vadd.f32 %v4999_v39, %v6236_v51  ;;  %5217 = vmatprep.mubr.msk.bf16.mxu1 %vm457_vm2, %v2921_v46  ;;  %v2930_v9 = vsel %vm2868_vm7, %v2920_v35, %v2929_v34  ;;  %v2959_v39 = vshrl.u32 %v6160_v50, 16 }
 0x122   : > { %v6349_v13 = vadd.f32 %v5033_v48, %v823_v26  ;;  %5251 = vmatprep.mubr.msk.bf16.mxu0 %vm457_vm2, %v3322_v30  ;;  %v830_v26 = vpop.f32.mrf.mxu1 }
 0x123   : > { %v1092_v33 = vpop.f32.mrf.mxu0  ;;  %v831_v53 = vadd.f32 %v830_v26, %v6243_v31  ;;  %v2943_v25 = vrot.slane %v2941_v55, 2  ;;  %v2939_v31 = vsel %vm2868_vm7, %v2929_v34, %v2938_v58 }
 0x124   : > { %v6358_v5 = vadd.f32 %v1092_v33, %v815_v40  ;;  %v5000_v44 = vpop.f32.mrf.mxu1  ;;  %v3326_v40 = vsel %vm3315_vm6, %v3323_v7, %v3325_v47 }
 0x125   : > { %v5034_v8 = vpop.f32.mrf.mxu0  ;;  %v842_v62 = vadd.f32 %v5000_v44, %v6249_v10  ;;  %v3327_v10 = vrot.slane %v6102_v29, 3  ;;  %v2947_v23 = vor.u32 %v2946_v15, %v2943_v25  ;;  %v2968_v29 = vshrl.u32 %v6168_v49, 16 }
 0x126   : > { %v6364_v60 = vadd.f32 %v5034_v8, %v826_v36  ;;  %v833_v45 = vpop.f32.mrf.mxu1  ;;  %v2952_v36 = vrot.slane %v2950_v43, 2  ;;  %v2961_v44 = vrot.slane %v2959_v39, 2  ;;  %v2989_v39 = vshll.u32 %v6200_v1, 16 }
 0x127   : > { %v1095_v51 = vpop.f32.mrf.mxu0  ;;  %v834_v48 = vadd.f32 %v833_v45, %v6260_v63  ;;  %v2962_v63 = vshll.u32 %v6160_v50, 16  ;;  %v3328_v26 = vsel %vm3315_vm6, %v3325_v47, %v3327_v10  ;;  %v2948_v43 = vsel %vm2868_vm7, %v2938_v58, %v2947_v23 }
 0x128   : > { %v6369_v30 = vadd.f32 %v1095_v51, %v818_v17  ;;  %v5003_v57 = vpop.f32.mrf.mxu1  ;;  %5218 = vmatmul.mubr.msk.bf16.gmra.mxu1 %vm457_vm2, %v2930_v9  ;;  %v3329_v17 = vrot.slane %v6106_v28, 3  ;;  %v2956_v42 = vor.u32 %v2955_v4, %v2952_v36  ;;  %v2977_v36 = vshrl.u32 %v6192_v56, 16 }
 0x129   : > { %v5037_v37 = vpop.f32.mrf.mxu0  ;;  %5252 = vmatmul.mubr.msk.bf16.gmra.mxu0 %vm457_vm2, %v3324_v41  ;;  %5221 = vmatprep.mubr.msk.bf16.mxu1 %vm457_vm2, %v2939_v31  ;;  %v2964_v51 = vrot.slane %v2962_v63, 3  ;;  %v3333_v31 = vrot.slane %v6136_v2, 3  ;;  %v2980_v4 = vshll.u32 %v6192_v56, 16 }
 0x12a   : > { %v6375_v46 = vadd.f32 %v5037_v37, %v839_v14  ;;  %5255 = vmatprep.mubr.msk.bf16.mxu0 %vm457_vm2, %v3326_v40  ;;  %v846_v33 = vpop.f32.mrf.mxu1  ;;  %v2971_v14 = vshll.u32 %v6168_v49, 16  ;;  %v3330_v61 = vsel %vm3315_vm6, %v3327_v10, %v3329_v17  ;;  %v2957_v15 = vsel %vm2868_vm7, %v2947_v23, %v2956_v42 }
 0x12b   : > { %v1108_v35 = vpop.f32.mrf.mxu0  ;;  %v847_v9 = vadd.f32 %v846_v33, %v6122_v54  ;;  %v2965_v54 = vor.u32 %v2964_v51, %v2961_v44  ;;  %v2986_v23 = vshrl.u32 %v6200_v1, 16 }
 0x12c   : > { %v6381_v7 = vadd.f32 %v1108_v35, %v831_v53  ;;  %v5004_v28 = vpop.f32.mrf.mxu1  ;;  %v855_v53 = vadd.f32 %v5003_v57, %v6113_v21  ;;  %v2973_v47 = vrot.slane %v2971_v14, 3  ;;  %v3331_v21 = vrot.slane %v6128_v16, 3 }
 0x12d   : > { %v5038_v55 = vpop.f32.mrf.mxu0  ;;  %v2979_v14 = vrot.slane %v2977_v36, 2  ;;  %v2988_v44 = vrot.slane %v2986_v23, 2 }
 0x12e   : > { %v6388_v34 = vadd.f32 %v5038_v55, %v842_v62  ;;  %v849_v40 = vpop.f32.mrf.mxu1  ;;  %v2970_v62 = vrot.slane %v2968_v29, 2  ;;  %v3332_v33 = vsel %vm3315_vm6, %v3329_v17, %v3331_v21  ;;  %v3334_v29 = vsel %vm3315_vm6, %v3331_v21, %v3333_v31 }
 0x12f   : > { %v1111_v8 = vpop.f32.mrf.mxu0  ;;  %v850_v2 = vadd.f32 %v849_v40, %v6138_v24  ;;  %v2991_v17 = vrot.slane %v2989_v39, 3 }
 0x130   : > { %v6394_v41 = vadd.f32 %v1111_v8, %v834_v48  ;;  %v5007_v58 = vpop.f32.mrf.mxu1  ;;  %5222 = vmatmul.mubr.msk.bf16.gmra.mxu1 %vm457_vm2, %v2948_v43  ;;  %v858_v48 = vadd.f32 %v5004_v28, %v6130_v32  ;;  %v2974_v16 = vor.u32 %v2973_v47, %v2970_v62  ;;  %v2966_v43 = vsel %vm2868_vm7, %v2956_v42, %v2965_v54  ;;  %v8300_v47 = vld [vmem:[#allocation2_spill] sm:$0xff] }
 0x131   : > { %v5041_v25 = vpop.f32.mrf.mxu0  ;;  %5256 = vmatmul.mubr.msk.bf16.gmra.mxu0 %vm457_vm2, %v3328_v26  ;;  %5225 = vmatprep.mubr.msk.bf16.mxu1 %vm457_vm2, %v2957_v15  ;;  %v2982_v26 = vrot.slane %v2980_v4, 3  ;;  %v871_v28 = vadd.f32 %v5007_v58, %v6145_v18  ;;  %v3335_v18 = vrot.slane %v6160_v50, 3  ;;  %v3337_v62 = vrot.slane %v6168_v49, 3 }
 0x132   : > { %v6399_v45 = vadd.f32 %v5041_v25, %v855_v53  ;;  %5259 = vmatprep.mubr.msk.bf16.mxu0 %vm457_vm2, %v3330_v61  ;;  %v862_v57 = vpop.f32.mrf.mxu1  ;;  %v2975_v24 = vsel %vm2868_vm7, %v2965_v54, %v2974_v16  ;;  %v2992_v50 = vor.u32 %v2991_v17, %v2988_v44  ;;  %v8305_v17 = vld [vmem:[#allocation5_spill] sm:$0xff] }
 0x133   : > { %v1124_v37 = vpop.f32.mrf.mxu0  ;;  %v863_v51 = vadd.f32 %v862_v57, %v6154_v38  ;;  %v2983_v15 = vor.u32 %v2982_v26, %v2979_v14  ;;  %v8301_v38 = vld [vmem:[#allocation10_spill] sm:$0xff]  ;;  %v3336_v39 = vsel %vm3315_vm6, %v3333_v31, %v3335_v18 }
 0x134   : > { %v6408_v10 = vadd.f32 %v1124_v37, %v847_v9  ;;  %v5008_v55 = vpop.f32.mrf.mxu1  ;;  %v2995_v58 = vshrl.u32 %v8301_v38, 16  ;;  %v2998_v37 = vshll.u32 %v8301_v38, 16 }
 0x135   : > { %v5042_v35 = vpop.f32.mrf.mxu0  ;;  %v874_v9 = vadd.f32 %v5008_v55, %v8300_v47  ;;  %v2984_v55 = vsel %vm2868_vm7, %v2974_v16, %v2983_v15  ;;  %v3339_v16 = vrot.slane %v6192_v56, 3  ;;  %v3341_v47 = vrot.slane %v6200_v1, 3  ;;  %v8308_v1 = vld [vmem:[#allocation7_spill] sm:$0xff] }
 0x136   : > { %v6414_v63 = vadd.f32 %v5042_v35, %v858_v48  ;;  %v865_v61 = vpop.f32.mrf.mxu1  ;;  %v8302_v48 = vld [vmem:[#allocation12_spill] sm:$0xff]  ;;  %v8303_v35 = vld [vmem:[#allocation3_spill] sm:$0xff] }
 0x137   : > { %v1127_v32 = vpop.f32.mrf.mxu0  ;;  %v3004_v54 = vshrl.u32 %v8302_v48, 16  ;;  %v3007_v57 = vshll.u32 %v8302_v48, 16  ;;  %v866_v23 = vadd.f32 %v865_v61, %v8303_v35  ;;  %v2993_v61 = vsel %vm2868_vm7, %v2983_v15, %v2992_v50  ;;  %v8307_v35 = vld [vmem:[#allocation14_spill] sm:$0xff] }
 0x138   : > { %v6419_v8 = vadd.f32 %v1127_v32, %v850_v2  ;;  %v5011_v25 = vpop.f32.mrf.mxu1  ;;  %5226 = vmatmul.mubr.msk.bf16.gmra.mxu1 %vm457_vm2, %v2966_v43  ;;  %v3338_v32 = vsel %vm3315_vm6, %v3335_v18, %v3337_v62  ;;  %v3000_v43 = vrot.slane %v2998_v37, 3  ;;  %v3016_v15 = vshll.u32 %v6258_v52, 16 }
 0x139   : > { %v5045_v53 = vpop.f32.mrf.mxu0  ;;  %5260 = vmatmul.mubr.msk.bf16.gmra.mxu0 %vm457_vm2, %v3332_v33  ;;  %5229 = vmatprep.mubr.msk.bf16.mxu1 %vm457_vm2, %v2975_v24  ;;  %v3006_v44 = vrot.slane %v3004_v54, 2  ;;  %v3009_v31 = vrot.slane %v3007_v57, 3 }
 0x13a   : > { %v6425_v40 = vadd.f32 %v5045_v53, %v871_v28  ;;  %5263 = vmatprep.mubr.msk.bf16.mxu0 %vm457_vm2, %v3334_v29  ;;  %v878_v36 = vpop.f32.mrf.mxu1  ;;  %v8304_v29 = vld [vmem:[#allocation4_spill] sm:$0xff]  ;;  %v2997_v28 = vrot.slane %v2995_v58, 2  ;;  %v8306_v58 = vld [vmem:[#allocation6_spill] sm:$0xff] }
 0x13b   : > { %v1140_v42 = vpop.f32.mrf.mxu0  ;;  %v887_v14 = vadd.f32 %v5011_v25, %v8304_v29  ;;  %v3010_v57 = vor.u32 %v3009_v31, %v3006_v44 }
 0x13c   : > { %v6432_v21 = vadd.f32 %v1140_v42, %v863_v51  ;;  %v5012_v2 = vpop.f32.mrf.mxu1  ;;  %v879_v51 = vadd.f32 %v878_v36, %v8305_v17  ;;  %v3001_v36 = vor.u32 %v3000_v43, %v2997_v28  ;;  %v6471_v28 = vld [vmem:[%s5480_s19 + $0xa0] ss:$0 sps:$4 sm:$0x77]   ;;  %v8309_v43 = vld [vmem:[#allocation8_spill] sm:$0xff] }
 0x13d   : > { %v5046_v4 = vpop.f32.mrf.mxu0  ;;  %v890_v37 = vadd.f32 %v5012_v2, %v8306_v58 }
 0x13e   : > { %v6440_v49 = vadd.f32 %v5046_v4, %v874_v9  ;;  %v881_v53 = vpop.f32.mrf.mxu1  ;;  %v3013_v9 = vshrl.u32 %v6258_v52, 16  ;;  %v3002_v17 = vsel %vm2868_vm7, %v2992_v50, %v3001_v36 }
 0x13f   : > { %v1143_v33 = vpop.f32.mrf.mxu0 }
 0x140   : > { %v6446_v26 = vadd.f32 %v1143_v33, %v866_v23  ;;  %v5015_v18 = vpop.f32.mrf.mxu1  ;;  %5230 = vmatmul.mubr.msk.bf16.gmra.mxu1 %vm457_vm2, %v2984_v55  ;;  %v3022_v23 = vshrl.u32 %v8307_v35, 16  ;;  %v882_v33 = vadd.f32 %v881_v53, %v8308_v1  ;;  %v3345_v1 = vrot.slane %v8302_v48, 3 }
 0x141   : > { %v5049_v24 = vpop.f32.mrf.mxu0  ;;  %5264 = vmatmul.mubr.msk.bf16.gmra.mxu0 %vm457_vm2, %v3336_v39  ;;  %5233 = vmatprep.mubr.msk.bf16.mxu1 %vm457_vm2, %v2993_v61  ;;  %v3025_v39 = vshll.u32 %v8307_v35, 16  ;;  %v3018_v61 = vrot.slane %v3016_v15, 3  ;;  %v903_v44 = vadd.f32 %v5015_v18, %v8309_v43  ;;  %v3343_v18 = vrot.slane %v8301_v38, 3 }
 0x142   : > { %v6451_v42 = vadd.f32 %v5049_v24, %v887_v14  ;;  %5267 = vmatprep.mubr.msk.bf16.mxu0 %vm457_vm2, %v3338_v32  ;;  %v894_v54 = vpop.f32.mrf.mxu1  ;;  %v3340_v32 = vsel %vm3315_vm6, %v3337_v62, %v3339_v16  ;;  %v3342_v14 = vsel %vm3315_vm6, %v3339_v16, %v3341_v47  ;;  %v3015_v24 = vrot.slane %v3013_v9, 2 }
 0x143   : > { %v1156_v25 = vpop.f32.mrf.mxu0  ;;  %v3011_v62 = vsel %vm2868_vm7, %v3001_v36, %v3010_v57  ;;  %v3027_v58 = vrot.slane %v3025_v39, 3  ;;  %v8311_v36 = vld [vmem:[#allocation11_spill] sm:$0xff] }
 0x144   : > { %v6460_v4 = vadd.f32 %v1156_v25, %v879_v51  ;;  %v5016_v2 = vpop.f32.mrf.mxu1  ;;  %v3024_v25 = vrot.slane %v3022_v23, 2  ;;  %v8312_v39 = vld [vmem:[#allocation15_spill] sm:$0xff] }
 0x145   : > { %v5050_v56 = vpop.f32.mrf.mxu0  ;;  %v906_v23 = vadd.f32 %v5016_v2, %v8311_v36 }
 0x146   : > { %v6466_v55 = vadd.f32 %v5050_v56, %v890_v37  ;;  %v897_v51 = vpop.f32.mrf.mxu1  ;;  %v8310_v37 = vld [vmem:[#allocation9_spill] sm:$0xff]  ;;  %v3019_v56 = vor.u32 %v3018_v61, %v3015_v24  ;;  %v3028_v43 = vor.u32 %v3027_v58, %v3024_v25  ;;  %v8314_v24 = vld [vmem:[#allocation16_spill] sm:$0xff] }
 0x147   : > { %v1159_v29 = vpop.f32.mrf.mxu0  ;;  %v895_v16 = vadd.f32 %v894_v54, %v8310_v37 }
 0x148   : > { %v6474_v31 = vadd.f32 %v1159_v29, %v882_v33  ;;  %v5059_v15 = vpop.f32.mrf.mxu1  ;;  %5234 = vmatmul.mubr.msk.bf16.gmra.mxu1 %vm457_vm2, %v3002_v17  ;;  %v3031_v33 = vshrl.u32 %v6471_v28, 16  ;;  %v3034_v29 = vshll.u32 %v6471_v28, 16 }
 0x149   : > { %v5053_v53 = vpop.f32.mrf.mxu0  ;;  %5268 = vmatmul.mubr.msk.bf16.gmra.mxu0 %vm457_vm2, %v3340_v32  ;;  %v1628_v32 = vadd.f32 %v5059_v15, %v8312_v39  ;;  %5237 = vmatprep.mubr.msk.bf16.mxu1 %vm457_vm2, %v3011_v62  ;;  %v3346_v15 = vsel %vm3315_vm6, %v3343_v18, %v3345_v1 }
 0x14a   : > { %v6480_v9 = vadd.f32 %v5053_v53, %v903_v44  ;;  %5271 = vmatprep.mubr.msk.bf16.mxu0 %vm457_vm2, %v3342_v14  ;;  %v1483_v38 = vpop.f32.mrf.mxu1  ;;  %v8313_v44 = vld [vmem:[#allocation13_spill] sm:$0xff]  ;;  %v3344_v53 = vsel %vm3315_vm6, %v3341_v47, %v3343_v18  ;;  %v3033_v36 = vrot.slane %v3031_v33, 2  ;;  %v3036_v25 = vrot.slane %v3034_v29, 3 }
 0x14b   : > { %v1172_v50 = vpop.f32.mrf.mxu0  ;;  %v898_v17 = vadd.f32 %v897_v51, %v8313_v44  ;;  %v1626_v61 = vadd.f32 %v1483_v38, %v8314_v24  ;;  %v3349_v33 = vrot.slane %v8307_v35, 3 }
 0x14c   : > { %v6489_v54 = vadd.f32 %v1172_v50, %v895_v16  ;;  %v5060_v2 = vpop.f32.mrf.mxu1  ;;  %v3020_v16 = vsel %vm2868_vm7, %v3010_v57, %v3019_v56  ;;  %v3347_v57 = vrot.slane %v6258_v52, 3 }
 0x14d   : > { %v5054_v14 = vpop.f32.mrf.mxu0  ;;  %v1629_v62 = vadd.f32 %v5060_v2, %v6286_v20 }
 0x14e   : > { %v6495_v48 = vadd.f32 %v5054_v14, %v906_v23  ;;  %v1486_v58 = vpop.f32.mrf.mxu1  ;;  %v3029_v23 = vsel %vm2868_vm7, %v3019_v56, %v3028_v43  ;;  %v3037_v56 = vor.u32 %v3036_v25, %v3033_v36  ;;  %v3348_v52 = vsel %vm3315_vm6, %v3345_v1, %v3347_v57 }
 0x14f   : > { %v1175_v37 = vpop.f32.mrf.mxu0  ;;  %v1627_v47 = vadd.f32 %v1486_v58, %v6292_v22  ;;  %v3351_v1 = vrot.slane %v6471_v28, 3 }
 0x150   : > { %v6501_v50 = vadd.f32 %v1175_v37, %v898_v17  ;;  %v5063_v18 = vpop.f32.mrf.mxu1  ;;  %5238 = vmatmul.mubr.msk.bf16.gmra.mxu1 %vm457_vm2, %v3020_v16 }
 0x151   : > { %v5097_v51 = vpop.f32.mrf.mxu0  ;;  %5272 = vmatmul.mubr.msk.bf16.gmra.mxu0 %vm457_vm2, %v3344_v53  ;;  %v1632_v29 = vadd.f32 %v5063_v18, %v6297_v3  ;;  %5241 = vmatprep.mubr.msk.bf16.mxu1 %vm457_vm2, %v3029_v23  ;;  %v3350_v53 = vsel %vm3315_vm6, %v3347_v57, %v3349_v33 }
 0x152   : > { %v6506_v39 = vadd.f32 %v5097_v51, %v1628_v32  ;;  %5275 = vmatprep.mubr.msk.bf16.mxu0 %vm457_vm2, %v3346_v15  ;;  %v1499_v22 = vpop.f32.mrf.mxu1 }
 0x153   : > { %v1930_v20 = vpop.f32.mrf.mxu0  ;;  %v1630_v14 = vadd.f32 %v1499_v22, %v6305_v6 }
 0x154   : > { %v6513_v38 = vadd.f32 %v1930_v20, %v1626_v61  ;;  %v5064_v17 = vpop.f32.mrf.mxu1  ;;  %v3038_v61 = vsel %vm2868_vm7, %v3028_v43, %v3037_v56 }
 0x155   : > { %v5098_v32 = vpop.f32.mrf.mxu0  ;;  %v1633_v35 = vadd.f32 %v5064_v17, %v6311_v19 }
 0x156   : > { %v6517_v44 = vadd.f32 %v5098_v32, %v1629_v62  ;;  %v1502_v2 = vpop.f32.mrf.mxu1 }
 0x157   : > { %v1933_v24 = vpop.f32.mrf.mxu0  ;;  %v1631_v6 = vadd.f32 %v1502_v2, %v6315_v59  ;;  %v3352_v59 = vsel %vm3315_vm6, %v3349_v33, %v3351_v1 }
 0x158   : > { %v6522_v3 = vadd.f32 %v1933_v24, %v1627_v47  ;;  %v5067_v15 = vpop.f32.mrf.mxu1  ;;  %5242 = vmatmul.mubr.msk.bf16.gmra.mxu1 %vm457_vm2, %v3038_v61 }
 0x159   : > { %v5101_v37 = vpop.f32.mrf.mxu0  ;;  %5276 = vmatmul.mubr.msk.bf16.gmra.mxu0 %vm457_vm2, %v3348_v52  ;;  %v1636_v62 = vadd.f32 %v5067_v15, %v6321_v12 }
 0x15a   : > { %v6527_v16 = vadd.f32 %v5101_v37, %v1632_v29  ;;  %5279 = vmatprep.mubr.msk.bf16.mxu0 %vm457_vm2, %v3350_v53  ;;  %v1515_v43 = vpop.f32.mrf.mxu1 }
 0x15b   : > { %v1946_v19 = vpop.f32.mrf.mxu0  ;;  %v1634_v58 = vadd.f32 %v1515_v43, %v6328_v27 }
 0x15c   : > { %v6533_v36 = vadd.f32 %v1946_v19, %v1630_v14  ;;  %v5068_v23 = vpop.f32.mrf.mxu1 }
 0x15d   : > { %v5102_v25 = vpop.f32.mrf.mxu0  ;;  %v1637_v28 = vadd.f32 %v5068_v23, %v6336_v0 }
 0x15e   : > { %v6536_v51 = vadd.f32 %v5102_v25, %v1633_v35  ;;  %v1518_v18 = vpop.f32.mrf.mxu1 }
 0x15f   : > { %v1949_v47 = vpop.f32.mrf.mxu0  ;;  %v1635_v12 = vadd.f32 %v1518_v18, %v6343_v11 }
 0x160   : > { %v6540_v57 = vadd.f32 %v1949_v47, %v1631_v6  ;;  %v5071_v56 = vpop.f32.mrf.mxu1 }
 0x161   : > { %v5105_v20 = vpop.f32.mrf.mxu0  ;;  %5280 = vmatmul.mubr.msk.bf16.gmra.mxu0 %vm457_vm2, %v3352_v59  ;;  %v1640_v22 = vadd.f32 %v5071_v56, %v6349_v13 }
 0x162   : > { %v6544_v29 = vadd.f32 %v5105_v20, %v1636_v62  ;;  %v1531_v33 = vpop.f32.mrf.mxu1 }
 0x163   : > { %v1962_v27 = vpop.f32.mrf.mxu0  ;;  %v1638_v0 = vadd.f32 %v1531_v33, %v6358_v5 }
 0x164   : > { %v6547_v32 = vadd.f32 %v1962_v27, %v1634_v58  ;;  %v5072_v17 = vpop.f32.mrf.mxu1 }
 0x165   : > { %v5106_v14 = vpop.f32.mrf.mxu0  ;;  %v1641_v53 = vadd.f32 %v5072_v17, %v6364_v60  ;;  %v3659_v60 = vlaneseq }
 0x166   : > { %v6550_v52 = vadd.f32 %v5106_v14, %v1637_v28  ;;  %v1534_v11 = vpop.f32.mrf.mxu1 }
 0x167   : > { %v1965_v24 = vpop.f32.mrf.mxu0  ;;  %v1639_v2 = vadd.f32 %v1534_v11, %v6369_v30  ;;  %v6570_v18 = vshrl.u32 %v3659_v60, 7 }
 0x168   : > { %v6553_v35 = vadd.f32 %v1965_v24, %v1635_v12  ;;  %v5075_v13 = vpop.f32.mrf.mxu1 }
 0x169   : > { %v5109_v61 = vpop.f32.mrf.mxu0  ;;  %v1644_v1 = vadd.f32 %v5075_v13, %v6375_v46  ;;  %v3662_v14 = vadd.s32 16, %v6570_v18 }
 0x16a   : > { %v6556_v37 = vadd.f32 %v5109_v61, %v1640_v22  ;;  %v1547_v5 = vpop.f32.mrf.mxu1 }
 0x16b   : > { %v1978_v6 = vpop.f32.mrf.mxu0  ;;  %v1642_v62 = vadd.f32 %v1547_v5, %v6381_v7 }
 0x16c   : > { %v6559_v15 = vadd.f32 %v1978_v6, %v1638_v0  ;;  %v5076_v25 = vpop.f32.mrf.mxu1 }
 0x16d   : > { %v5110_v19 = vpop.f32.mrf.mxu0  ;;  %v1645_v59 = vadd.f32 %v5076_v25, %v6388_v34 }
 0x16e   : > { %v6562_v43 = vadd.f32 %v5110_v19, %v1641_v53  ;;  %v1550_v23 = vpop.f32.mrf.mxu1 }
 0x16f   : > { %v1981_v58 = vpop.f32.mrf.mxu0  ;;  %v1643_v28 = vadd.f32 %v1550_v23, %v6394_v41  ;;  %v6599_v23 = vadd.s32 24, %v6570_v18 }
 0x170   : > { %v6565_v30 = vadd.f32 %v1981_v58, %v1639_v2  ;;  %v5079_v20 = vpop.f32.mrf.mxu1  ;;  %v6585_v2 = vmul.u32.u64.low 3817748708, %v3662_v14  ;;  %v6586_v13 = vmul.u32.u64.high 3817748708, %v3662_v14, %v6585_v2 }
 0x171   : > { %v5113_v47 = vpop.f32.mrf.mxu0  ;;  %v1648_v7 = vadd.f32 %v5079_v20, %v6399_v45  ;;  %v6623_v2 = vadd.s32 32, %v6570_v18 }
 0x172   : > { %v6568_v46 = vadd.f32 %v5113_v47, %v1644_v1  ;;  %v1563_v27 = vpop.f32.mrf.mxu1  ;;  %v6589_v1 = vmul.u32.u64.low 3817748708, %v6570_v18  ;;  %v6590_v5 = vmul.u32.u64.high 3817748708, %v6570_v18, %v6589_v1 }
 0x173   : > { %v1994_v12 = vpop.f32.mrf.mxu0  ;;  %v1646_v34 = vadd.f32 %v1563_v27, %v6408_v10  ;;  %v3724_v27 = vshrl.u32 %v6586_v13, 4 }
 0x174   : > { %v6573_v56 = vadd.f32 %v1994_v12, %v1642_v62  ;;  %v5080_v0 = vpop.f32.mrf.mxu1 }
 0x175   : > { %v5114_v22 = vpop.f32.mrf.mxu0  ;;  %v1649_v17 = vadd.f32 %v5080_v0, %v6414_v63 }
 0x176   : > { %v6576_v33 = vadd.f32 %v5114_v22, %v1645_v59  ;;  %v1566_v53 = vpop.f32.mrf.mxu1 }
 0x177   : > { %v1997_v41 = vpop.f32.mrf.mxu0  ;;  %v1647_v45 = vadd.f32 %v1566_v53, %v6419_v8 }
 0x178   : > { %v6580_v24 = vadd.f32 %v1997_v41, %v1643_v28  ;;  %v5083_v10 = vpop.f32.mrf.mxu1  ;;  %v6610_v0 = vmul.u32.u64.low 3817748708, %v6599_v23  ;;  %v6611_v41 = vmul.u32.u64.high 3817748708, %v6599_v23, %v6610_v0 }
 0x179   : > { %v5117_v11 = vpop.f32.mrf.mxu0  ;;  %v1652_v19 = vadd.f32 %v5083_v10, %v6425_v40 }
 0x17a   : > { %v6583_v61 = vadd.f32 %v5117_v11, %v1648_v7  ;;  %v1579_v62 = vpop.f32.mrf.mxu1  ;;  %v3735_v0 = vshrl.u32 %v6611_v41, 4 }
 0x17b   : > { %v2010_v6 = vpop.f32.mrf.mxu0  ;;  %v1650_v25 = vadd.f32 %v1579_v62, %v6432_v21 }
 0x17c   : > { %v6593_v63 = vadd.f32 %v2010_v6, %v1646_v34  ;;  %v5084_v58 = vpop.f32.mrf.mxu1  ;;  %v3702_v34 = vshrl.u32 %v6590_v5, 4  ;;  %v3725_v6 = vmul.u32 18, %v3724_v27 }
 0x17d   : > { %v5118_v60 = vpop.f32.mrf.mxu0  ;;  %v1653_v47 = vadd.f32 %v5084_v58, %v6440_v49  ;;  %v6614_v49 = vadd.s32 8, %v6570_v18 }
 0x17e   : > { %v6596_v8 = vadd.f32 %v5118_v60, %v1649_v17  ;;  %v1582_v20 = vpop.f32.mrf.mxu1 }
 0x17f   : > { %v2013_v59 = vpop.f32.mrf.mxu0  ;;  %v1651_v40 = vadd.f32 %v1582_v20, %v6446_v26  ;;  %v6620_v26 = vadd.s32 48, %v6570_v18 }
 0x180   : > { %v6602_v28 = vadd.f32 %v2013_v59, %v1647_v45  ;;  %v5087_v21 = vpop.f32.mrf.mxu1 }
 0x181   : > { %v5121_v12 = vpop.f32.mrf.mxu0  ;;  %v1656_v17 = vadd.f32 %v5087_v21, %v6451_v42  ;;  %v6629_v42 = vmul.u32.u64.low 3817748708, %v6614_v49  ;;  %v6630_v62 = vmul.u32.u64.high 3817748708, %v6614_v49, %v6629_v42 }
 0x182   : > { %v6605_v7 = vadd.f32 %v5121_v12, %v1652_v19  ;;  %v1595_v11 = vpop.f32.mrf.mxu1  ;;  %v3703_v19 = vmul.u32 18, %v3702_v34  ;;  %v6636_v58 = vmul.u32.u64.low 3817748708, %v6620_v26  ;;  %v6637_v59 = vmul.u32.u64.high 3817748708, %v6620_v26, %v6636_v58 }
 0x183   : > { %v2026_v22 = vpop.f32.mrf.mxu0  ;;  %v1654_v13 = vadd.f32 %v1595_v11, %v6460_v4  ;;  %v6656_v42 = vadd.s32 56, %v6570_v18  ;;  %v3713_v41 = vshrl.u32 %v6630_v62, 4  ;;  %v6679_v62 = vadd.s32 80, %v6570_v18 }
 0x184   : > { %v6617_v53 = vadd.f32 %v2026_v22, %v1650_v25  ;;  %v5088_v1 = vpop.f32.mrf.mxu1  ;;  %v6646_v22 = vsub.s32 %v3662_v14, %v3725_v6 }
 0x185   : > { %v5122_v45 = vpop.f32.mrf.mxu0  ;;  %v1657_v60 = vadd.f32 %v5088_v1, %v6466_v55 }
 0x186   : > { %v6626_v10 = vadd.f32 %v5122_v45, %v1653_v47  ;;  %v1598_v20 = vpop.f32.mrf.mxu1  ;;  %v6640_v47 = vmul.u32.u64.low 3817748708, %v6623_v2  ;;  %v6641_v12 = vmul.u32.u64.high 3817748708, %v6623_v2, %v6640_v47  ;;  %8315 = vst [vmem:[#allocation2_spill] sm:$0xff] %v6646_v22  ;;  %vm4094_vm8 = vcmp.ne.s32.totalorder %v6646_v22, 0 }
 0x187   : > { %v2029_v5 = vpop.f32.mrf.mxu0  ;;  %v1655_v27 = vadd.f32 %v1598_v20, %v6474_v31  ;;  %vm4130_vm9 = vcmp.lt.s32.totalorder %v6646_v22, 0 }
 0x188   : > { %v6633_v25 = vadd.f32 %v2029_v5, %v1651_v40  ;;  %v5091_v34 = vpop.f32.mrf.mxu1  ;;  %v6649_v40 = vsub.s32 %v6570_v18, %v3703_v19  ;;  %vm6694_vm12 = vmand %vm4130_vm9, %vm4094_vm8 }
 0x189   : > { %v5125_v4 = vpop.f32.mrf.mxu0  ;;  %v1660_v11 = vadd.f32 %v5091_v34, %v6480_v9  ;;  %v3736_v9 = vmul.u32 18, %v3735_v0  ;;  %v6675_v47 = vmul.u32.u64.low 3817748708, %v6656_v42  ;;  %v6676_v34 = vmul.u32.u64.high 3817748708, %v6656_v42, %v6675_v47 }
 0x18a   : > { %v6644_v21 = vadd.f32 %v5125_v4, %v1656_v17  ;;  %8316 = vst [vmem:[#allocation10_spill] sm:$0xff] %v6649_v40  ;;  %v1611_v1 = vpop.f32.mrf.mxu1  ;;  %vm4092_vm10 = vcmp.ne.s32.totalorder %v6649_v40, 0  ;;  %vm4128_vm11 = vcmp.lt.s32.totalorder %v6649_v40, 0  ;;  %v3746_v4 = vshrl.u32 %v6641_v12, 4 }
 0x18b   : > { %v2042_v55 = vpop.f32.mrf.mxu0  ;;  %v1658_v31 = vadd.f32 %v1611_v1, %v6489_v54  ;;  %v3768_v54 = vshrl.u32 %v6637_v59, 4  ;;  %v6688_v59 = vadd.s32 18, %v6649_v40  ;;  %v8320_v12 = vmov 0  ;;  %vm6712_vm13 = vmand %vm4128_vm11, %vm4092_vm10 }
 0x18c   : > { %v6653_v45 = vadd.f32 %v2042_v55, %v1654_v13  ;;  %v5092_v17 = vpop.f32.mrf.mxu1  ;;  %v6666_v13 = vadd.s32 40, %v6570_v18  ;;  %v8321_v12 = vsel %vm6694_vm12, 4294967295, %v8320_v12 }
 0x18d   : > { %v5126_v5 = vpop.f32.mrf.mxu0  ;;  %v1661_v19 = vadd.f32 %v5092_v17, %v6495_v48  ;;  %8322 = vst [vmem:[#allocation5_spill] sm:$0xff] %v8321_v12  ;;  %v3769_v47 = vmul.u32 18, %v3768_v54 }
 0x18e   : > { %v6659_v14 = vadd.f32 %v5126_v5, %v1657_v60  ;;  %v1614_v60 = vpop.f32.mrf.mxu1  ;;  %v6702_v5 = vmul.u32.u64.low 3817748708, %v6666_v13  ;;  %v6703_v17 = vmul.u32.u64.high 3817748708, %v6666_v13, %v6702_v5 }
 0x18f   : > { %v2045_v6 = vpop.f32.mrf.mxu0  ;;  %v1659_v55 = vadd.f32 %v1614_v60, %v6501_v50  ;;  %v6699_v50 = vsub.s32 %v6599_v23, %v3736_v9  ;;  %v6717_v23 = vadd.s32 64, %v6570_v18 }
 0x190   : > { %v6669_v58 = vadd.f32 %v2045_v6, %v1655_v27  ;;  %v6685_v27 = vadd.s32 18, %v6646_v22  ;;  %v5135_v0 = vpop.f32.mrf.mxu1  ;;  %v6750_v22 = vsub.s32 %v6620_v26, %v3769_v47  ;;  %v3757_v26 = vshrl.u32 %v6703_v17, 4 }
 0x191   : > { %v5129_v20 = vpop.f32.mrf.mxu0  ;;  %8323 = vst [vmem:[#allocation6_spill] sm:$0xff] %v6699_v50  ;;  %v2389_v6 = vadd.f32 %v5135_v0, %v6506_v39  ;;  %v6720_v5 = vmul.u32.u64.low 3817748708, %v6679_v62  ;;  %v6721_v39 = vmul.u32.u64.high 3817748708, %v6679_v62, %v6720_v5  ;;  %vm4095_vm14 = vcmp.ne.s32.totalorder %v6699_v50, 0 }
 0x192   : > { %8317 = vst [vmem:[#allocation12_spill] sm:$0xff] %v6669_v58  ;;  %v6682_v48 = vadd.f32 %v5129_v20, %v1660_v11  ;;  %8319 = vst [vmem:[#allocation4_spill] sm:$0xff] %v6685_v27  ;;  %v3714_v11 = vmul.u32 18, %v3713_v41  ;;  %v2244_v9 = vpop.f32.mrf.mxu1  ;;  %vm4131_vm15 = vcmp.lt.s32.totalorder %v6699_v50, 0  ;;  %v6764_v27 = vadd.s32 18, %v6699_v50 }
 0x193   : > { %v2058_v1 = vpop.f32.mrf.mxu0  ;;  %8327 = vst [vmem:[#allocation7_spill] sm:$0xff] %v6750_v22  ;;  %vm4098_vm2 = vcmp.ne.s32.totalorder %v6750_v22, 0  ;;  %vm4134_vm3 = vcmp.lt.s32.totalorder %v6750_v22, 0  ;;  %v3812_v17 = vshrl.u32 %v6721_v39, 4  ;;  %vm6788_vm4 = vmand %vm4131_vm15, %vm4095_vm14 }
 0x194   : > { %8318 = vst [vmem:[#allocation3_spill] sm:$0xff] %v6682_v48  ;;  %v6706_v60 = vadd.f32 %v2058_v1, %v1658_v31  ;;  %v3747_v48 = vmul.u32 18, %v3746_v4  ;;  %v2387_v31 = vadd.f32 %v2244_v9, %v6513_v38  ;;  %v6727_v1 = vadd.s32 88, %v6570_v18  ;;  %8329 = vst [vmem:[#allocation9_spill] sm:$0xff] %v6764_v27 }
 0x195   : > { %v5130_v41 = vpop.f32.mrf.mxu0  ;;  %v6739_v38 = vsub.s32 %v6614_v49, %v3714_v11  ;;  %v3779_v49 = vshrl.u32 %v6676_v34, 4  ;;  %vm6824_vm8 = vmand %vm4134_vm3, %vm4098_vm2 }
 0x196   : > { %8324 = vst [vmem:[#allocation14_spill] sm:$0xff] %v6706_v60  ;;  %v6724_v0 = vadd.f32 %v5130_v41, %v1661_v19  ;;  %v5136_v60 = vpop.f32.mrf.mxu1  ;;  %v6745_v41 = vmul.u32.u64.low 3817748708, %v6717_v23  ;;  %v6746_v5 = vmul.u32.u64.high 3817748708, %v6717_v23, %v6745_v41  ;;  %v6753_v4 = vsub.s32 %v6623_v2, %v3747_v48 }
 0x197   : > { %v2061_v58 = vpop.f32.mrf.mxu0  ;;  %v2390_v19 = vadd.f32 %v5136_v60, %v6517_v44  ;;  %vm4093_vm0 = vcmp.ne.s32.totalorder %v6739_v38, 0  ;;  %v6769_v2 = vadd.s32 72, %v6570_v18  ;;  %vm4129_vm1 = vcmp.lt.s32.totalorder %v6739_v38, 0 }
 0x198   : > { %v6742_v9 = vadd.f32 %v2061_v58, %v1659_v55  ;;  %v2247_v12 = vpop.f32.mrf.mxu1  ;;  %v6760_v55 = vmul.u32.u64.low 3817748708, %v6727_v1  ;;  %v6761_v11 = vmul.u32.u64.high 3817748708, %v6727_v1, %v6760_v55  ;;  %v6776_v48 = vadd.s32 18, %v6739_v38  ;;  %vm6808_vm7 = vmand %vm4129_vm1, %vm4093_vm0 }
 0x199   : > { %v5173_v54 = vpop.f32.mrf.mxu0  ;;  %v2388_v44 = vadd.f32 %v2247_v12, %v6522_v3  ;;  %v3780_v47 = vmul.u32 18, %v3779_v49  ;;  %vm4096_vm5 = vcmp.ne.s32.totalorder %v6753_v4, 0  ;;  %vm4132_vm6 = vcmp.lt.s32.totalorder %v6753_v4, 0 }
 0x19a   : > { %v6757_v58 = vadd.f32 %v5173_v54, %v2389_v6  ;;  %v5139_v60 = vpop.f32.mrf.mxu1  ;;  %vm6841_vm9 = vmand %vm4132_vm6, %vm4096_vm5 }
 0x19b   : > { %v2683_v41 = vpop.f32.mrf.mxu0  ;;  %v2393_v3 = vadd.f32 %v5139_v60, %v6527_v16  ;;  %v8332_v16 = vmov 0  ;;  %v3758_v60 = vmul.u32 18, %v3757_v26  ;;  %v6813_v26 = vadd.s32 18, %v6750_v22 }
 0x19c   : > { %8328 = vst [vmem:[#allocation8_spill] sm:$0xff] %v6757_v58  ;;  %v6772_v34 = vadd.f32 %v2683_v41, %v2387_v31  ;;  %v2260_v12 = vpop.f32.mrf.mxu1  ;;  %v8333_v16 = vsel %vm6788_vm4, 4294967295, %v8332_v16  ;;  %v6846_v50 = vsub.s32 %v6656_v42, %v3780_v47 }
 0x19d   : > { %v5174_v6 = vpop.f32.mrf.mxu0  ;;  %v2391_v54 = vadd.f32 %v2260_v12, %v6533_v36  ;;  %8334 = vst [vmem:[#allocation13_spill] sm:$0xff] %v8333_v16  ;;  %v6795_v39 = vmul.u32.u64.low 3817748708, %v6769_v2  ;;  %v6796_v36 = vmul.u32.u64.high 3817748708, %v6769_v2, %v6795_v39 }
 0x19e   : > { %8330 = vst [vmem:[#allocation11_spill] sm:$0xff] %v6772_v34  ;;  %v6782_v55 = vadd.f32 %v5174_v6, %v2390_v19  ;;  %v5140_v31 = vpop.f32.mrf.mxu1  ;;  %v6799_v19 = vadd.s32 112, %v6570_v18  ;;  %v8336_v6 = vmov 0  ;;  %v3790_v39 = vshrl.u32 %v6746_v5, 4  ;;  %8344 = vst [vmem:[#allocation19_spill] sm:$0xff] %v6846_v50 }
 0x19f   : > { %v2686_v49 = vpop.f32.mrf.mxu0  ;;  %v2394_v41 = vadd.f32 %v5140_v31, %v6536_v51  ;;  %v8337_v6 = vsel %vm6808_vm7, 4294967295, %v8336_v6  ;;  %v6829_v31 = vadd.s32 18, %v6753_v4  ;;  %v6832_v5 = vadd.s32 96, %v6570_v18 }
 0x1a0   : > { %8331 = vst [vmem:[#allocation15_spill] sm:$0xff] %v6782_v55  ;;  %v6802_v12 = vadd.f32 %v2686_v49, %v2388_v44  ;;  %8338 = vst [vmem:[#allocation17_spill] sm:$0xff] %v8337_v6  ;;  %v2263_v55 = vpop.f32.mrf.mxu1  ;;  %v3813_v49 = vmul.u32 18, %v3812_v17  ;;  %v3823_v17 = vshrl.u32 %v6761_v11, 4  ;;  %v3791_v47 = vmul.u32 18, %v3790_v39 }
 0x1a1   : > { %v5177_v34 = vpop.f32.mrf.mxu0  ;;  %vm4099_vm10 = vcmp.ne.s32.totalorder %v6846_v50, 0  ;;  %vm4135_vm11 = vcmp.lt.s32.totalorder %v6846_v50, 0 }
 0x1a2   : > { %8335 = vst [vmem:[#allocation16_spill] sm:$0xff] %v6802_v12  ;;  %v2392_v12 = vadd.f32 %v2263_v55, %v6540_v57  ;;  %v6835_v58 = vadd.f32 %v5177_v34, %v2393_v3  ;;  %v5143_v27 = vpop.f32.mrf.mxu1  ;;  %v6854_v3 = vsub.s32 %v6666_v13, %v3758_v60  ;;  %v6872_v60 = vsub.s32 %v6679_v62, %v3813_v49  ;;  %vm6939_vm5 = vmand %vm4135_vm11, %vm4099_vm10 }
 0x1a3   : > { %v2699_v16 = vpop.f32.mrf.mxu0  ;;  %v6857_v34 = vmul.u32.u64.low 3817748708, %v6799_v19  ;;  %v6858_v55 = vmul.u32.u64.high 3817748708, %v6799_v19, %v6857_v34  ;;  %v3824_v39 = vmul.u32 18, %v3823_v17  ;;  %v6884_v13 = vadd.s32 18, %v6846_v50 }
 0x1a4   : > { %8341 = vst [vmem:[#allocation18_spill] sm:$0xff] %v6835_v58  ;;  %v2397_v58 = vadd.f32 %v5143_v27, %v6544_v29  ;;  %v6861_v42 = vadd.f32 %v2699_v16, %v2391_v54  ;;  %v2276_v40 = vpop.f32.mrf.mxu1  ;;  %8346 = vst [vmem:[#allocation21_spill] sm:$0xff] %v6872_v60  ;;  %v6875_v29 = vmul.u32.u64.low 3817748708, %v6832_v5  ;;  %v6876_v27 = vmul.u32.u64.high 3817748708, %v6832_v5, %v6875_v29 }
 0x1a5   : > { %v5178_v6 = vpop.f32.mrf.mxu0  ;;  %v2395_v54 = vadd.f32 %v2276_v40, %v6547_v32  ;;  %vm4097_vm14 = vcmp.ne.s32.totalorder %v6854_v3, 0  ;;  %v3801_v62 = vshrl.u32 %v6796_v36, 4  ;;  %vm4133_vm15 = vcmp.lt.s32.totalorder %v6854_v3, 0 }
 0x1a6   : > { %8345 = vst [vmem:[#allocation20_spill] sm:$0xff] %v6861_v42  ;;  %v6879_v16 = vadd.f32 %v5178_v6, %v2394_v41  ;;  %v5144_v34 = vpop.f32.mrf.mxu1  ;;  %v6893_v32 = vsub.s32 %v6717_v23, %v3791_v47  ;;  %v6896_v6 = vadd.s32 18, %v6854_v3  ;;  %vm4102_vm0 = vcmp.ne.s32.totalorder %v6872_v60, 0  ;;  %vm6949_vm2 = vmand %vm4133_vm15, %vm4097_vm14 }
 0x1a7   : > { %v2702_v11 = vpop.f32.mrf.mxu0  ;;  %v2398_v49 = vadd.f32 %v5144_v34, %v6550_v52  ;;  %v6900_v17 = vadd.s32 120, %v6570_v18  ;;  %v6903_v36 = vadd.s32 104, %v6570_v18  ;;  %vm4138_vm1 = vcmp.lt.s32.totalorder %v6872_v60, 0 }
 0x1a8   : > { %8347 = vst [vmem:[#allocation22_spill] sm:$0xff] %v6879_v16  ;;  %v6889_v29 = vadd.f32 %v2702_v11, %v2392_v12  ;;  %8349 = vst [vmem:[#allocation24_spill] sm:$0xff] %v6893_v32  ;;  %v2279_v40 = vpop.f32.mrf.mxu1  ;;  %v6910_v23 = vsub.s32 %v6727_v1, %v3824_v39  ;;  %v6913_v34 = vadd.s32 18, %v6872_v60  ;;  %v3802_v57 = vmul.u32 18, %v3801_v62 }
 0x1a9   : > { %v5181_v41 = vpop.f32.mrf.mxu0  ;;  %v2396_v52 = vadd.f32 %v2279_v40, %v6553_v35  ;;  %v6917_v16 = vadd.s32 144, %v6570_v18  ;;  %v3834_v40 = vshrl.u32 %v6876_v27, 4  ;;  %vm6967_vm10 = vmand %vm4138_vm1, %vm4102_vm0  ;;  %vm8366_vm11 = vcmp.ne.s32.totalorder %v6893_v32, 0 }
 0x1aa   : > { %8348 = vst [vmem:[#allocation23_spill] sm:$0xff] %v6889_v29  ;;  %v6906_v12 = vadd.f32 %v5181_v41, %v2397_v58  ;;  %8351 = vst [vmem:[#allocation26_spill] sm:$0xff] %v6910_v23  ;;  %v5147_v11 = vpop.f32.mrf.mxu1  ;;  %v3856_v29 = vshrl.u32 %v6858_v55, 4  ;;  %v6926_v41 = vmul.u32.u64.low 3817748708, %v6900_v17  ;;  %v6927_v62 = vmul.u32.u64.high 3817748708, %v6900_v17, %v6926_v41 }
 0x1ab   : > { %v2715_v47 = vpop.f32.mrf.mxu0  ;;  %8352 = vst [vmem:[#allocation27_spill] sm:$0xff] %v6913_v34  ;;  %v2401_v35 = vadd.f32 %v5147_v11, %v6556_v37  ;;  %v6930_v55 = vadd.s32 128, %v6570_v18  ;;  %vm4103_vm6 = vcmp.ne.s32.totalorder %v6910_v23, 0  ;;  %vm4139_vm3 = vcmp.lt.s32.totalorder %v6910_v23, 0 }
 0x1ac   : > { %8350 = vst [vmem:[#allocation25_spill] sm:$0xff] %v6906_v12  ;;  %v6920_v58 = vadd.f32 %v2715_v47, %v2395_v54  ;;  %v2292_v1 = vpop.f32.mrf.mxu1  ;;  %v8355_v54 = vmov 0  ;;  %v3857_v47 = vmul.u32 18, %v3856_v29  ;;  %vm8367_vm14 = vcmp.lt.s32.totalorder %v6893_v32, 0  ;;  %vm7012_vm0 = vmand %vm4139_vm3, %vm4103_vm6 }
 0x1ad   : > { %v5182_v39 = vpop.f32.mrf.mxu0  ;;  %v2399_v12 = vadd.f32 %v2292_v1, %v6559_v15  ;;  %v8356_v54 = vsel %vm6939_vm5, 4294967295, %v8355_v54  ;;  %v8357_v15 = vmov 0  ;;  %vm6993_vm15 = vmand %vm8367_vm14, %vm8366_vm11 }
 0x1ae   : > { %8353 = vst [vmem:[#allocation28_spill] sm:$0xff] %v6920_v58  ;;  %v6933_v37 = vadd.f32 %v5182_v39, %v2398_v49  ;;  %v5148_v27 = vpop.f32.mrf.mxu1  ;;  %v8358_v15 = vsel %vm6949_vm2, 4294967295, %v8357_v15  ;;  %v6954_v49 = vsub.s32 %v6769_v2, %v3802_v57  ;;  %v8361_v58 = vmov 0 }
 0x1af   : > { %v2718_v11 = vpop.f32.mrf.mxu0  ;;  %v6957_v1 = vmul.u32.u64.low 3817748708, %v6903_v36  ;;  %v6958_v39 = vmul.u32.u64.high 3817748708, %v6903_v36, %v6957_v1  ;;  %v2402_v41 = vadd.f32 %v5148_v27, %v6562_v43  ;;  %v8362_v58 = vsel %vm6967_vm10, 4294967295, %v8361_v58 }
 0x1b0   : > { %8354 = vst [vmem:[#allocation29_spill] sm:$0xff] %v6933_v37  ;;  %8359 = vst [vmem:[#allocation30_spill] sm:$0xff] %v6954_v49  ;;  %v6961_v37 = vadd.f32 %v2718_v11, %v2396_v52  ;;  %v6972_v2 = vmul.u32.u64.low 3817748708, %v6917_v16  ;;  %v6973_v57 = vmul.u32.u64.high 3817748708, %v6917_v16, %v6972_v2  ;;  %v2295_v29 = vpop.f32.mrf.mxu1  ;;  %v6976_v1 = vadd.s32 18, %v6893_v32 }
 0x1b1   : > { %8363 = vst [vmem:[#allocation32_spill] sm:$0xff] %v8362_v58  ;;  %v5185_v42 = vpop.f32.mrf.mxu0  ;;  %v3835_v43 = vmul.u32 18, %v3834_v40  ;;  %v6979_v52 = vmul.u32.u64.low 3817748708, %v6930_v55  ;;  %v6980_v27 = vmul.u32.u64.high 3817748708, %v6930_v55, %v6979_v52  ;;  %v2400_v11 = vadd.f32 %v2295_v29, %v6565_v30 }
 0x1b2   : > { %8360 = vst [vmem:[#allocation31_spill] sm:$0xff] %v6961_v37  ;;  %8364 = vst [vmem:[#allocation33_spill] sm:$0xff] %v6976_v1  ;;  %v6983_v37 = vadd.f32 %v5185_v42, %v2401_v35  ;;  %v8368_v2 = vmov 0  ;;  %v6998_v40 = vadd.s32 18, %v6910_v23  ;;  %v5151_v52 = vpop.f32.mrf.mxu1  ;;  %v8371_v29 = vmov 0 }
 0x1b3   : > { %v8369_v2 = vsel %vm6993_vm15, 4294967295, %v8368_v2  ;;  %v2731_v30 = vpop.f32.mrf.mxu0  ;;  %v8372_v29 = vsel %vm7012_vm0, 4294967295, %v8371_v29  ;;  %v7017_v22 = vsub.s32 %v6799_v19, %v3857_v47  ;;  %v2405_v42 = vadd.f32 %v5151_v52, %v6568_v46 }
 0x1b4   : > { %8365 = vst [vmem:[#allocation34_spill] sm:$0xff] %v6983_v37  ;;  %8370 = vst [vmem:[#allocation35_spill] sm:$0xff] %v6998_v40  ;;  %v7020_v37 = vadd.s32 152, %v6570_v18  ;;  %v7023_v50 = vadd.f32 %v2731_v30, %v2399_v12  ;;  %vm4101_vm1 = vcmp.ne.s32.totalorder %v6954_v49, 0  ;;  %vm4137_vm11 = vcmp.lt.s32.totalorder %v6954_v49, 0  ;;  %v2308_v35 = vpop.f32.mrf.mxu1 }
 0x1b5   : > { %8373 = vst [vmem:[#allocation36_spill] sm:$0xff] %v8372_v29  ;;  %8374 = vst [vmem:[#allocation37_spill] sm:$0xff] %v7017_v22  ;;  %v5186_v60 = vpop.f32.mrf.mxu0  ;;  %v7032_v19 = vsub.s32 %v6832_v5, %v3835_v43  ;;  %v3867_v47 = vshrl.u32 %v6927_v62, 4  ;;  %v7036_v46 = vadd.s32 136, %v6570_v18  ;;  %v2403_v12 = vadd.f32 %v2308_v35, %v6573_v56 }
 0x1b6   : > { %8375 = vst [vmem:[#allocation38_spill] sm:$0xff] %v7023_v50  ;;  %v7039_v52 = vadd.f32 %v5186_v60, %v2402_v41  ;;  %v7046_v50 = vadd.s32 18, %v6954_v49  ;;  %v5152_v34 = vpop.f32.mrf.mxu1  ;;  %vm7052_vm3 = vmand %vm4137_vm11, %vm4101_vm1  ;;  %v8379_v62 = vmov 0  ;;  %vm4106_vm6 = vcmp.ne.s32.totalorder %v7017_v22, 0 }
 0x1b7   : > { %8376 = vst [vmem:[#allocation39_spill] sm:$0xff] %v7032_v19  ;;  %v2734_v5 = vpop.f32.mrf.mxu0  ;;  %v8380_v62 = vsel %vm7052_vm3, 4294967295, %v8379_v62  ;;  %v3845_v56 = vshrl.u32 %v6958_v39, 4  ;;  %v7059_v60 = vadd.s32 176, %v6570_v18  ;;  %v7062_v41 = vadd.s32 160, %v6570_v18 }
 0x1b8   : > { %8377 = vst [vmem:[#allocation40_spill] sm:$0xff] %v7039_v52  ;;  %8378 = vst [vmem:[#allocation41_spill] sm:$0xff] %v7046_v50  ;;  %v2406_v43 = vadd.f32 %v5152_v34, %v6576_v33  ;;  %v7065_v35 = vadd.f32 %v2734_v5, %v2400_v11  ;;  %vm4142_vm14 = vcmp.lt.s32.totalorder %v7017_v22, 0  ;;  %v3900_v30 = vshrl.u32 %v6973_v57, 4  ;;  %v2311_v52 = vpop.f32.mrf.mxu1 }
 0x1b9   : > { %8381 = vst [vmem:[#allocation42_spill] sm:$0xff] %v8380_v62  ;;  %v5189_v23 = vpop.f32.mrf.mxu0  ;;  %vm4104_vm1 = vcmp.ne.s32.totalorder %v7032_v19, 0  ;;  %v3868_v39 = vmul.u32 18, %v3867_v47  ;;  %v3878_v40 = vshrl.u32 %v6980_v27, 4  ;;  %v2404_v29 = vadd.f32 %v2311_v52, %v6580_v24  ;;  %vm7084_vm11 = vmand %vm4142_vm14, %vm4106_vm6 }
 0x1ba   : > { %8382 = vst [vmem:[#allocation43_spill] sm:$0xff] %v7065_v35  ;;  %v7073_v58 = vadd.f32 %v5189_v23, %v2405_v42  ;;  %v7080_v34 = vadd.s32 184, %v6570_v18  ;;  %v5155_v57 = vpop.f32.mrf.mxu1  ;;  %v8384_v47 = vmov 0  ;;  %v7089_v24 = vadd.s32 18, %v7017_v22 }
 0x1bb   : > { %v2747_v11 = vpop.f32.mrf.mxu0  ;;  %v8385_v47 = vsel %vm7084_vm11, 4294967295, %v8384_v47  ;;  %v7092_v23 = vadd.s32 18, %v7032_v19  ;;  %v3846_v27 = vmul.u32 18, %v3845_v56  ;;  %v7095_v42 = vadd.s32 168, %v6570_v18 }
 0x1bc   : > { %8383 = vst [vmem:[#allocation44_spill] sm:$0xff] %v7073_v58  ;;  %8386 = vst [vmem:[#allocation45_spill] sm:$0xff] %v8385_v47  ;;  %v2409_v52 = vadd.f32 %v5155_v57, %v6583_v61  ;;  %v7098_v5 = vadd.f32 %v2747_v11, %v2403_v12  ;;  %vm8390_vm6 = vcmp.lt.s32.totalorder %v7032_v19, 0  ;;  %v8391_v33 = vmov 0  ;;  %v2324_v56 = vpop.f32.mrf.mxu1 }
 0x1bd   : > { %8387 = vst [vmem:[#allocation46_spill] sm:$0xff] %v7089_v24  ;;  %8388 = vst [vmem:[#allocation47_spill] sm:$0xff] %v7092_v23  ;;  %v3901_v58 = vmul.u32 18, %v3900_v30  ;;  %v7109_v35 = vadd.s32 208, %v6570_v18  ;;  %v5190_v49 = vpop.f32.mrf.mxu0  ;;  %v7112_v50 = vsub.s32 %v6900_v17, %v3868_v39  ;;  %v3879_v61 = vmul.u32 18, %v3878_v40 }
 0x1be   : > { %8389 = vst [vmem:[#allocation48_spill] sm:$0xff] %v7098_v5  ;;  %vm7104_vm14 = vmand %vm8390_vm6, %vm4104_vm1  ;;  %v7115_v12 = vmul.u32.u64.low 3817748708, %v7020_v37  ;;  %v7116_v57 = vmul.u32.u64.high 3817748708, %v7020_v37, %v7115_v12  ;;  %v2407_v11 = vadd.f32 %v2324_v56, %v6593_v63  ;;  %v7119_v5 = vadd.f32 %v5190_v49, %v2406_v43  ;;  %v5156_v32 = vpop.f32.mrf.mxu1 }
 0x1bf   : > { %v8392_v33 = vsel %vm7104_vm14, 4294967295, %v8391_v33  ;;  %8393 = vst [vmem:[#allocation49_spill] sm:$0xff] %v7112_v50  ;;  %v7122_v62 = vmul.u32.u64.low 3817748708, %v7036_v46  ;;  %v7123_v30 = vmul.u32.u64.high 3817748708, %v7036_v46, %v7122_v62  ;;  %v2750_v1 = vpop.f32.mrf.mxu0  ;;  %v7134_v63 = vsub.s32 %v6903_v36, %v3846_v27 }
 0x1c0   : > { %8394 = vst [vmem:[#allocation50_spill] sm:$0xff] %v7119_v5  ;;  %v7137_v49 = vadd.s32 192, %v6570_v18  ;;  %v2410_v62 = vadd.f32 %v5156_v32, %v6596_v8  ;;  %v7140_v43 = vadd.f32 %v2750_v1, %v2404_v29  ;;  %v7143_v39 = vsub.s32 %v6917_v16, %v3901_v58  ;;  %v2327_v12 = vpop.f32.mrf.mxu1 }
 0x1c1   : > { %v7146_v56 = vadd.s32 216, %v6570_v18  ;;  %v5193_v17 = vpop.f32.mrf.mxu0  ;;  %v7151_v36 = vsub.s32 %v6930_v55, %v3879_v61  ;;  %v7154_v27 = vadd.s32 200, %v6570_v18  ;;  %v2408_v8 = vadd.f32 %v2327_v12, %v6602_v28 }
 0x1c2   : > { %8395 = vst [vmem:[#allocation51_spill] sm:$0xff] %v7140_v43  ;;  %8396 = vst [vmem:[#allocation52_spill] sm:$0xff] %v7143_v39  ;;  %v7157_v32 = vadd.f32 %v5193_v17, %v2409_v52  ;;  %v7160_v16 = vadd.s32 18, %v7112_v50  ;;  %v7163_v58 = vadd.s32 240, %v6570_v18  ;;  %v5159_v1 = vpop.f32.mrf.mxu1  ;;  %v7175_v17 = vadd.s32 18, %v7134_v63 }
 0x1c3   : > { %8397 = vst [vmem:[#allocation53_spill] sm:$0xff] %v7151_v36  ;;  %v2763_v29 = vpop.f32.mrf.mxu0  ;;  %v7168_v55 = vmul.u32.u64.low 3817748708, %v7059_v60  ;;  %v7169_v61 = vmul.u32.u64.high 3817748708, %v7059_v60, %v7168_v55  ;;  %v2413_v28 = vadd.f32 %v5159_v1, %v6605_v7  ;;  %v3889_v1 = vshrl.u32 %v7123_v30, 4 }
 0x1c4   : > { %8398 = vst [vmem:[#allocation54_spill] sm:$0xff] %v7157_v32  ;;  %8399 = vst [vmem:[#allocation55_spill] sm:$0xff] %v7160_v16  ;;  %v7172_v52 = vadd.f32 %v2763_v29, %v2407_v11  ;;  %v2340_v12 = vpop.f32.mrf.mxu1  ;;  %v7180_v32 = vadd.s32 18, %v7143_v39  ;;  %v3911_v55 = vshrl.u32 %v7116_v57, 4  ;;  %vm8403_vm11 = vcmp.ne.s32.totalorder %v7112_v50, 0 }
 0x1c5   : > { %v5194_v40 = vpop.f32.mrf.mxu0  ;;  %v2411_v7 = vadd.f32 %v2340_v12, %v6617_v53  ;;  %vm8404_vm14 = vcmp.lt.s32.totalorder %v7112_v50, 0  ;;  %v8405_v43 = vmov 0  ;;  %vm8420_vm3 = vcmp.ne.s32.totalorder %v7151_v36, 0 }
 0x1c6   : > { %8400 = vst [vmem:[#allocation56_spill] sm:$0xff] %v7172_v52  ;;  %8401 = vst [vmem:[#allocation57_spill] sm:$0xff] %v7180_v32  ;;  %v7185_v11 = vadd.f32 %v5194_v40, %v2410_v62  ;;  %v5160_v29 = vpop.f32.mrf.mxu1  ;;  %v7198_v57 = vmul.u32.u64.low 3817748708, %v7062_v41  ;;  %v7199_v5 = vmul.u32.u64.high 3817748708, %v7062_v41, %v7198_v57  ;;  %vm8421_vm10 = vcmp.lt.s32.totalorder %v7151_v36, 0 }
 0x1c7   : > { %v2766_v52 = vpop.f32.mrf.mxu0  ;;  %vm7193_vm0 = vmand %vm8404_vm14, %vm8403_vm11  ;;  %v7202_v53 = vmul.u32.u64.low 3817748708, %v7080_v34  ;;  %v7203_v40 = vmul.u32.u64.high 3817748708, %v7080_v34, %v7202_v53  ;;  %v2414_v30 = vadd.f32 %v5160_v29, %v6626_v10  ;;  %vm8409_vm11 = vcmp.ne.s32.totalorder %v7134_v63, 0 }
 0x1c8   : > { %8402 = vst [vmem:[#allocation58_spill] sm:$0xff] %v7185_v11  ;;  %v8406_v43 = vsel %vm7193_vm0, 4294967295, %v8405_v43  ;;  %v7206_v62 = vadd.f32 %v2766_v52, %v2408_v8  ;;  %v7209_v12 = vmul.u32.u64.low 3817748708, %v7095_v42  ;;  %v7210_v11 = vmul.u32.u64.high 3817748708, %v7095_v42, %v7209_v12  ;;  %v2343_v22 = vpop.f32.mrf.mxu1  ;;  %vm7250_vm15 = vmand %vm8421_vm10, %vm8420_vm3 }
 0x1c9   : > { %8407 = vst [vmem:[#allocation59_spill] sm:$0xff] %v8406_v43  ;;  %v5197_v24 = vpop.f32.mrf.mxu0  ;;  %vm8410_vm14 = vcmp.lt.s32.totalorder %v7134_v63, 0  ;;  %v8411_v57 = vmov 0  ;;  %v7221_v53 = vmul.u32.u64.low 3817748708, %v7109_v35  ;;  %v7222_v47 = vmul.u32.u64.high 3817748708, %v7109_v35, %v7221_v53 }
 0x1ca   : > { %8408 = vst [vmem:[#allocation60_spill] sm:$0xff] %v7206_v62  ;;  %vm7216_vm6 = vmand %vm8410_vm14, %vm8409_vm11  ;;  %v7225_v10 = vmul.u32.u64.low 3817748708, %v7137_v49  ;;  %v7226_v8 = vmul.u32.u64.high 3817748708, %v7137_v49, %v7225_v10  ;;  %v2412_v52 = vadd.f32 %v2343_v22, %v6633_v25  ;;  %v7229_v29 = vadd.f32 %v5197_v24, %v2413_v28 }
 0x1cb   : > { %v8412_v57 = vsel %vm7216_vm6, 4294967295, %v8411_v57  ;;  %vm8414_vm11 = vcmp.ne.s32.totalorder %v7143_v39, 0  ;;  %vm8415_vm14 = vcmp.lt.s32.totalorder %v7143_v39, 0  ;;  %v8416_v62 = vmov 0  ;;  %v5163_v10 = vpop.f32.mrf.mxu1  ;;  %v2779_v25 = vpop.f32.mrf.mxu0 }
 0x1cc   : > { %8413 = vst [vmem:[#allocation61_spill] sm:$0xff] %v7229_v29  ;;  %vm7239_vm1 = vmand %vm8415_vm14, %vm8414_vm11  ;;  %v7244_v53 = vadd.s32 18, %v7151_v36  ;;  %v8422_v22 = vmov 0  ;;  %v3912_v24 = vmul.u32 18, %v3911_v55  ;;  %v3890_v28 = vmul.u32 18, %v3889_v1 }
 0x1cd   : > { %v8417_v62 = vsel %vm7239_vm1, 4294967295, %v8416_v62  ;;  %v8423_v22 = vsel %vm7250_vm15, 4294967295, %v8422_v22  ;;  %v3944_v12 = vshrl.u32 %v7169_v61, 4  ;;  %v7256_v29 = vadd.s32 224, %v6570_v18  ;;  %v2356_v23 = vpop.f32.mrf.mxu1  ;;  %v5198_v55 = vpop.f32.mrf.mxu0 }
 0x1ce   : > { %8418 = vst [vmem:[#allocation62_spill] sm:$0xff] %v8417_v62  ;;  %8419 = vst [vmem:[#allocation63_spill] sm:$0xff] %v7244_v53  ;;  %v2417_v50 = vadd.f32 %v5163_v10, %v6644_v21  ;;  %v7259_v16 = vadd.f32 %v2779_v25, %v2411_v7  ;;  %v7266_v19 = vadd.s32 248, %v6570_v18  ;;  %v7273_v1 = vadd.s32 232, %v6570_v18 }
 0x1cf   : > { %v7276_v21 = vadd.s32 272, %v6570_v18  ;;  %v7279_v7 = vadd.s32 256, %v6570_v18  ;;  %v2415_v10 = vadd.f32 %v2356_v23, %v6653_v45  ;;  %v7282_v25 = vadd.f32 %v5198_v55, %v2414_v30  ;;  %v2782_v39 = vpop.f32.mrf.mxu0 }
 0x1d0   : > { %8424 = vst [vmem:[#allocation64_spill] sm:$0xff] %v7259_v16  ;;  %v7289_v61 = vadd.s32 280, %v6570_v18  ;;  %v5164_v16 = vpop.f32.mrf.mxu1  ;;  %v7292_v32 = vsub.s32 %v7020_v37, %v3912_v24  ;;  %v7295_v62 = vsub.s32 %v7036_v46, %v3890_v28  ;;  %v3922_v45 = vshrl.u32 %v7199_v5, 4 }
 0x1d1   : > { %8425 = vst [vmem:[#allocation65_spill] sm:$0xff] %v7279_v7  ;;  %8426 = vst [vmem:[#allocation66_spill] sm:$0xff] %v7282_v25  ;;  %v3945_v7 = vmul.u32 18, %v3944_v12  ;;  %v2418_v23 = vadd.f32 %v5164_v16, %v6659_v14  ;;  %v7299_v30 = vadd.f32 %v2782_v39, %v2412_v52  ;;  %v3955_v55 = vshrl.u32 %v7203_v40, 4  ;;  %v8430_v12 = vld [vmem:[#allocation12_spill] sm:$0xff] }
 0x1d2   : > { %8427 = vst [vmem:[#allocation67_spill] sm:$0xff] %v7289_v61  ;;  %8428 = vst [vmem:[#allocation68_spill] sm:$0xff] %v7292_v32  ;;  %v3933_v43 = vshrl.u32 %v7210_v11, 4  ;;  %v2359_v25 = vpop.f32.mrf.mxu1  ;;  %v5201_v61 = vpop.f32.mrf.mxu0  ;;  %v3988_v36 = vshrl.u32 %v7222_v47, 4  ;;  %v3966_v37 = vshrl.u32 %v7226_v8, 4  ;;  %v3923_v47 = vmul.u32 18, %v3922_v45 }
 0x1d3   : > { %8429 = vst [vmem:[#allocation69_spill] sm:$0xff] %v7299_v30  ;;  %v7306_v46 = vmul.u32.u64.low 3817748708, %v7146_v56  ;;  %v7307_v24 = vmul.u32.u64.high 3817748708, %v7146_v56, %v7306_v46  ;;  %v2416_v5 = vadd.f32 %v2359_v25, %v8430_v12  ;;  %v7310_v28 = vadd.f32 %v5201_v61, %v2417_v50  ;;  %v8432_v30 = vld [vmem:[#allocation3_spill] sm:$0xff]  ;;  %v8435_v45 = vld [vmem:[#allocation14_spill] sm:$0xff] }
 0x1d4   : > { %v7313_v14 = vmul.u32.u64.low 3817748708, %v7154_v27  ;;  %v7314_v39 = vmul.u32.u64.high 3817748708, %v7154_v27, %v7313_v14  ;;  %v5167_v16 = vpop.f32.mrf.mxu1  ;;  %v2795_v11 = vpop.f32.mrf.mxu0  ;;  %v7317_v40 = vsub.s32 %v7059_v60, %v3945_v7  ;;  %v3956_v50 = vmul.u32 18, %v3955_v55 }
 0x1d5   : > { %8431 = vst [vmem:[#allocation12_spill] sm:$0xff] %v7310_v28  ;;  %v7320_v8 = vmul.u32.u64.low 3817748708, %v7163_v58  ;;  %v7321_v52 = vmul.u32.u64.high 3817748708, %v7163_v58, %v7320_v8  ;;  %v2421_v46 = vadd.f32 %v5167_v16, %v8432_v30  ;;  %v7324_v53 = vadd.f32 %v2795_v11, %v2415_v10 }
 0x1d6   : > { %v2372_v61 = vpop.f32.mrf.mxu1  ;;  %v5202_v25 = vpop.f32.mrf.mxu0  ;;  %v7329_v12 = vadd.s32 18, %v7292_v32  ;;  %v3934_v60 = vmul.u32 18, %v3933_v43  ;;  %v3989_v7 = vmul.u32 18, %v3988_v36  ;;  %v7337_v55 = vadd.s32 18, %v7295_v62 }
 0x1d7   : > { %8433 = vst [vmem:[#allocation3_spill] sm:$0xff] %v7324_v53  ;;  %v2419_v14 = vadd.f32 %v2372_v61, %v8435_v45  ;;  %v7332_v28 = vadd.f32 %v5202_v25, %v2418_v23  ;;  %v3967_v10 = vmul.u32 18, %v3966_v37  ;;  %v7341_v11 = vsub.s32 %v7062_v41, %v3923_v47 }
 0x1d8   : > { %8434 = vst [vmem:[#allocation70_spill] sm:$0xff] %v7329_v12  ;;  %v5168_v30 = vpop.f32.mrf.mxu1  ;;  %v2798_v16 = vpop.f32.mrf.mxu0  ;;  %v7348_v23 = vsub.s32 %v7080_v34, %v3956_v50  ;;  %v7351_v61 = vadd.s32 18, %v7317_v40  ;;  %v7354_v25 = vsub.s32 %v7095_v42, %v3934_v60  ;;  %v7357_v41 = vsub.s32 %v7109_v35, %v3989_v7 }
 0x1d9   : > { %8436 = vst [vmem:[#allocation14_spill] sm:$0xff] %v7332_v28  ;;  %v2422_v43 = vadd.f32 %v5168_v30, %v6724_v0  ;;  %v7344_v36 = vadd.f32 %v2798_v16, %v2416_v5  ;;  %v3999_v0 = vshrl.u32 %v7307_v24, 4  ;;  %v7364_v34 = vsub.s32 %v7137_v49, %v3967_v10  ;;  %v8639_v10 = vld [vmem:[#allocation54_spill] sm:$0xff] }
 0x1da   : > { %8438 = vst [vmem:[#allocation72_spill] sm:$0xff] %v7348_v23  ;;  %v2375_v37 = vpop.f32.mrf.mxu1  ;;  %v5205_v8 = vpop.f32.mrf.mxu0  ;;  %8439 = vst [vmem:[#allocation73_spill] sm:$0xff] %v7357_v41  ;;  %v3977_v50 = vshrl.u32 %v7314_v39, 4  ;;  %vm8442_vm10 = vcmp.ne.s32.totalorder %v7292_v32, 0  ;;  %vm8443_vm3 = vcmp.lt.s32.totalorder %v7292_v32, 0  ;;  %v8444_v35 = vmov 0 }
 0x1db   : > { %8437 = vst [vmem:[#allocation71_spill] sm:$0xff] %v7344_v36  ;;  %v2420_v5 = vadd.f32 %v2375_v37, %v6742_v9  ;;  %v7361_v47 = vadd.f32 %v5205_v8, %v2421_v46  ;;  %8441 = vst [vmem:[#allocation75_spill] sm:$0xff] %v7364_v34  ;;  %v7378_v9 = vadd.s32 18, %v7341_v11  ;;  %v4032_v42 = vshrl.u32 %v7321_v52, 4  ;;  %v8453_v52 = vld [vmem:[#allocation10_spill] sm:$0xff] }
 0x1dc   : > { %v5211_v45 = vpop.f32.mrf.mxu1  ;;  %v2811_v30 = vpop.f32.mrf.mxu0  ;;  %vm7371_vm14 = vmand %vm8443_vm3, %vm8442_vm10  ;;  %vm8448_vm15 = vcmp.ne.s32.totalorder %v7295_v62, 0  ;;  %vm8449_vm0 = vcmp.lt.s32.totalorder %v7295_v62, 0  ;;  %v7394_v39 = vadd.s32 18, %v7348_v23  ;;  %v8454_v7 = vsel %vm6712_vm13, %v6688_v59, %v8453_v52 }
 0x1dd   : > { %8440 = vst [vmem:[#allocation74_spill] sm:$0xff] %v7361_v47  ;;  %v8445_v35 = vsel %vm7371_vm14, 4294967295, %v8444_v35  ;;  %v7381_v49 = vadd.f32 %v2811_v30, %v2419_v14  ;;  %vm7387_vm6 = vmand %vm8449_vm0, %vm8448_vm15  ;;  %vm7401_vm1 = vcmp.lt.s32.totalorder %v8454_v7, 16  ;;  %v8455_v14 = vmov 0  ;;  %v8535_v47 = vld [vmem:[#allocation24_spill] sm:$0xff] }
 0x1de   : > { %8446 = vst [vmem:[#allocation76_spill] sm:$0xff] %v8445_v35  ;;  %8452 = vst [vmem:[#allocation78_spill] sm:$0xff] %v7394_v39  ;;  %v3130_v46 = vpop.f32.mrf.mxu1  ;;  %v5206_v60 = vpop.f32.mrf.mxu0  ;;  %v8456_v14 = vsel %vm7401_vm1, 4294967295, %v8455_v14  ;;  %vm8457_vm15 = vcmp.ne.s32.totalorder %v7317_v40, 0  ;;  %vm8458_vm0 = vcmp.lt.s32.totalorder %v7317_v40, 0  ;;  %vm4113_vm3 = vcmp.ne.s32.totalorder %v7354_v25, 0 }
 0x1df   : > { %8447 = vst [vmem:[#allocation77_spill] sm:$0xff] %v7381_v49  ;;  %vm7409_vm10 = vmand %vm8458_vm0, %vm8457_vm15  ;;  %vm4149_vm11 = vcmp.lt.s32.totalorder %v7354_v25, 0  ;;  %v4000_v20 = vmul.u32 18, %v3999_v0  ;;  %v7416_v59 = vadd.f32 %v5206_v60, %v2422_v43  ;;  %vm8462_vm13 = vcmp.ne.s32.totalorder %v7341_v11, 0  ;;  %v8467_v0 = vld [vmem:[#allocation4_spill] sm:$0xff]  ;;  %v8468_v43 = vld [vmem:[#allocation2_spill] sm:$0xff] }
 0x1e0   : > { %vm8463_vm1 = vcmp.lt.s32.totalorder %v7341_v11, 0  ;;  %v3978_v37 = vmul.u32 18, %v3977_v50  ;;  %v5212_v8 = vpop.f32.mrf.mxu1  ;;  %v2814_v30 = vpop.f32.mrf.mxu0  ;;  %v8469_v60 = vsel %vm6694_vm12, %v8467_v0, %v8468_v43  ;;  %v8473_v49 = vsel %vm6808_vm7, %v6776_v48, %v6739_v38  ;;  %v8480_v38 = vld [vmem:[#allocation8_spill] sm:$0xff]  ;;  %vm7466_vm7 = vmand %vm4149_vm11, %vm4113_vm3 }
 0x1e1   : > { %8461 = vst [vmem:[#allocation10_spill] sm:$0xff] %v7416_v59  ;;  %vm7422_vm2 = vmand %vm8463_vm1, %vm8462_vm13  ;;  %vm7433_vm5 = vcmp.lt.s32.totalorder %v8469_v60, 16  ;;  %vm7442_vm1 = vcmp.lt.s32.totalorder %v8473_v49, 16  ;;  %vm8476_vm13 = vcmp.ne.s32.totalorder %v7348_v23, 0  ;;  %vm8477_vm0 = vcmp.lt.s32.totalorder %v7348_v23, 0 }
 0x1e2   : > { %vm7450_vm15 = vmand %vm8477_vm0, %vm8476_vm13  ;;  %v8478_v50 = vmov 0  ;;  %vm4152_vm12 = vcmp.lt.s32.totalorder %v7364_v34, 0  ;;  %v4033_v52 = vmul.u32 18, %v4032_v42  ;;  %v3275_v48 = vadd.f32 %v5211_v45, %v8480_v38  ;;  %v3133_v36 = vpop.f32.mrf.mxu1  ;;  %v8487_v45 = vld [vmem:[#allocation6_spill] sm:$0xff]  ;;  %v8547_v38 = vld [vmem:[#allocation27_spill] sm:$0xff] }
 0x1e3   : > { %v8479_v50 = vsel %vm7450_vm15, 4294967295, %v8478_v50  ;;  %v7456_v59 = vmul.u32.u64.low 3817748708, %v7256_v29  ;;  %v7457_v0 = vmul.u32.u64.high 3817748708, %v7256_v29, %v7456_v59  ;;  %v7460_v49 = vadd.f32 %v2814_v30, %v2420_v5  ;;  %v8486_v5 = vld [vmem:[#allocation9_spill] sm:$0xff] }
 0x1e4   : > { %v8482_v43 = vmov 0  ;;  %v7471_v60 = vadd.s32 18, %v7354_v25  ;;  %v7474_v42 = vadd.s32 18, %v7357_v41  ;;  %v5249_v59 = vpop.f32.mrf.mxu0  ;;  %v8488_v30 = vsel %vm6788_vm4, %v8486_v5, %v8487_v45 }
 0x1e5   : > { %8481 = vst [vmem:[#allocation5_spill] sm:$0xff] %v7460_v49  ;;  %v8483_v43 = vsel %vm7466_vm7, 4294967295, %v8482_v43  ;;  %vm7481_vm0 = vcmp.lt.s32.totalorder %v8488_v30, 16  ;;  %vm8491_vm11 = vcmp.ne.s32.totalorder %v7357_v41, 0  ;;  %vm8492_vm3 = vcmp.lt.s32.totalorder %v7357_v41, 0  ;;  %v8498_v30 = vld [vmem:[#allocation11_spill] sm:$0xff] }
 0x1e6   : > { %8484 = vst [vmem:[#allocation4_spill] sm:$0xff] %v7474_v42  ;;  %vm7493_vm13 = vmand %vm8492_vm3, %vm8491_vm11  ;;  %v8493_v53 = vmov 0  ;;  %v7498_v28 = vadd.s32 18, %v7364_v34  ;;  %v7501_v5 = vsub.s32 %v7146_v56, %v4000_v20  ;;  %v7504_v45 = vadd.s32 264, %v6570_v18  ;;  %v5215_v56 = vpop.f32.mrf.mxu1 }
 0x1e7   : > { %v8494_v53 = vsel %vm7493_vm13, 4294967295, %v8493_v53  ;;  %v3273_v49 = vadd.f32 %v3130_v46, %v8498_v30  ;;  %v7507_v32 = vadd.f32 %v5249_v59, %v3275_v48  ;;  %vm8499_vm4 = vcmp.ne.s32.totalorder %v7364_v34, 0  ;;  %v3444_v46 = vpop.f32.mrf.mxu0  ;;  %v8554_v48 = vld [vmem:[#allocation41_spill] sm:$0xff] }
 0x1e8   : > { %8495 = vst [vmem:[#allocation2_spill] sm:$0xff] %v8494_v53  ;;  %8496 = vst [vmem:[#allocation17_spill] sm:$0xff] %v7498_v28  ;;  %v8500_v35 = vmov 0  ;;  %v7522_v18 = vsub.s32 %v7154_v27, %v3978_v37  ;;  %v8503_v20 = vsel %vm6841_vm9, %v6829_v31, %v6753_v4  ;;  %v7546_v51 = vsub.s32 %v7163_v58, %v4033_v52  ;;  %v8507_v31 = vld [vmem:[#allocation15_spill] sm:$0xff]  ;;  %v3146_v27 = vpop.f32.mrf.mxu1  ;;  %v8508_v52 = vld [vmem:[#allocation16_spill] sm:$0xff] }
 0x1e9   : > { %8497 = vst [vmem:[#allocation8_spill] sm:$0xff] %v7501_v5  ;;  %vm7517_vm11 = vmand %vm4152_vm12, %vm8499_vm4  ;;  %vm7529_vm3 = vcmp.lt.s32.totalorder %v8503_v20, 16  ;;  %v3276_v37 = vadd.f32 %v5212_v8, %v8507_v31  ;;  %v3587_v30 = vadd.f32 %v3444_v46, %v3273_v49  ;;  %v5250_v4 = vpop.f32.mrf.mxu0  ;;  %v7566_v8 = vadd.s32 18, %v7501_v5  ;;  %v8509_v58 = vld [vmem:[#allocation7_spill] sm:$0xff] }
 0x1ea   : > { %v8501_v35 = vsel %vm7517_vm11, 4294967295, %v8500_v35  ;;  %8506 = vst [vmem:[#allocation9_spill] sm:$0xff] %v7546_v51  ;;  %3625 = vst [vmem:[%s5485_s22 + $0x10] sm:$0xff] %v7507_v32  ;;  %v3274_v49 = vadd.f32 %v3133_v36, %v8508_v52  ;;  %v5216_v31 = vpop.f32.mrf.mxu1  ;;  %v8510_v20 = vsel %vm6824_vm8, %v6813_v26, %v8509_v58  ;;  %vm8513_vm9 = vnez %v8358_v15 }
 0x1eb   : > { %8502 = vst [vmem:[#allocation13_spill] sm:$0xff] %v8501_v35  ;;  %3623 = vst [vmem:[%s5485_s22] sm:$0xff] %v3587_v30  ;;  %v3590_v46 = vadd.f32 %v5250_v4, %v3276_v37  ;;  %v3447_v59 = vpop.f32.mrf.mxu0  ;;  %vm7577_vm12 = vcmp.lt.s32.totalorder %v8510_v20, 16  ;;  %v8514_v36 = vsel %vm8513_vm9, %v6896_v6, %v6854_v3  ;;  %v4010_v44 = vshrl.u32 %v7457_v0, 4  ;;  %v8517_v20 = vld [vmem:[#allocation18_spill] sm:$0xff]  ;;  %v8520_v0 = vld [vmem:[#allocation19_spill] sm:$0xff] }
 0x1ec   : > { %vm7586_vm11 = vcmp.lt.s32.totalorder %v8514_v36, 16  ;;  %v7593_v26 = vmul.u32.u64.low 3817748708, %v7266_v19  ;;  %v7594_v37 = vmul.u32.u64.high 3817748708, %v7266_v19, %v7593_v26  ;;  %v3279_v58 = vadd.f32 %v5215_v56, %v8517_v20  ;;  %v3149_v6 = vpop.f32.mrf.mxu1 }
 0x1ed   : > { %vm8518_vm8 = vnez %v8456_v14  ;;  %3626 = vst [vmem:[%s5485_s22 + $0x18] sm:$0xff] %v3590_v46  ;;  %v3588_v3 = vadd.f32 %v3447_v59, %v3274_v49  ;;  %vm4158_vm9 = vcmp.lt.s32.totalorder %v7546_v51, 0  ;;  %v5253_v52 = vpop.f32.mrf.mxu0  ;;  %vm8519_vm13 = vnez %v8356_v54  ;;  %v8528_v26 = vld [vmem:[#allocation20_spill] sm:$0xff] }
 0x1ee   : > { %v4308_v15 = vsel %vm8518_vm8, %v3587_v30, 0.0  ;;  %v8521_v36 = vsel %vm8519_vm13, %v6884_v13, %v8520_v0  ;;  %vm8524_vm15 = vcmp.ne.s32.totalorder %v7501_v5, 0  ;;  %vm8525_vm7 = vcmp.lt.s32.totalorder %v7501_v5, 0  ;;  %v5219_v34 = vpop.f32.mrf.mxu1  ;;  %v8548_v5 = vld [vmem:[#allocation21_spill] sm:$0xff] }
 0x1ef   : > { %vm7606_vm4 = vcmp.lt.s32.totalorder %v8521_v36, 16  ;;  %vm7614_vm8 = vmand %vm8525_vm7, %vm8524_vm15  ;;  %v8526_v14 = vmov 0  ;;  %v7619_v56 = vadd.s32 18, %v7522_v18  ;;  %v7622_v54 = vadd.s32 18, %v7546_v51  ;;  %3624 = vst [vmem:[%s5485_s22 + $0x8] sm:$0xff] %v3588_v3  ;;  %v3460_v28 = vpop.f32.mrf.mxu0 }
 0x1f0   : > { %v8527_v14 = vsel %vm7614_vm8, 4294967295, %v8526_v14  ;;  %v7625_v13 = vmul.u32.u64.low 3817748708, %v7273_v1  ;;  %v7626_v59 = vmul.u32.u64.high 3817748708, %v7273_v1, %v7625_v13  ;;  %v4310_v49 = vsel %vm7433_vm5, %v7507_v32, 0.0  ;;  %v3162_v23 = vpop.f32.mrf.mxu1 }
 0x1f1   : > { %v3277_v20 = vadd.f32 %v3146_v27, %v8528_v26  ;;  %v4309_v0 = vsel %vm7442_vm1, %v3588_v3, 0.0  ;;  %v7636_v36 = vadd.f32 %v5253_v52, %v3279_v58  ;;  %vm8529_vm15 = vcmp.ne.s32.totalorder %v7522_v18, 0  ;;  %v8534_v27 = vld [vmem:[#allocation33_spill] sm:$0xff]  ;;  %v5254_v39 = vpop.f32.mrf.mxu0 }
 0x1f2   : > { %vm8530_vm7 = vcmp.lt.s32.totalorder %v7522_v18, 0  ;;  %v4386_v13 = vmul.f32 %v4308_v15, %v3587_v30  ;;  %v4345_v7 = vadd.f32 %v4309_v0, %v4308_v15  ;;  %v4387_v53 = vmul.f32 %v4309_v0, %v3588_v3  ;;  %v8543_v3 = vld [vmem:[#allocation22_spill] sm:$0xff] }
 0x1f3   : > { %vm7642_vm13 = vmand %vm8530_vm7, %vm8529_vm15  ;;  %vm8533_vm5 = vnez %v8369_v2  ;;  %vm8539_vm15 = vcmp.ne.s32.totalorder %v7546_v51, 0  ;;  %v8540_v30 = vmov 0  ;;  %v4011_v15 = vmul.u32 18, %v4010_v44  ;;  %3629 = vst [vmem:[%s5485_s22 + $0x30] sm:$0xff] %v7636_v36  ;;  %v8563_v51 = vld [vmem:[#allocation26_spill] sm:$0xff] }
 0x1f4   : > { %v8536_v26 = vsel %vm8533_vm5, %v8534_v27, %v8535_v47  ;;  %vm7659_vm7 = vmand %vm4158_vm9, %vm8539_vm15  ;;  %v3280_v52 = vadd.f32 %v5216_v31, %v8543_v3  ;;  %v4311_v2 = vsel %vm7481_vm0, %v3590_v46, 0.0  ;;  %v3591_v0 = vadd.f32 %v3460_v28, %v3277_v20  ;;  %v8544_v31 = vld [vmem:[#allocation23_spill] sm:$0xff]  ;;  %v3463_v3 = vpop.f32.mrf.mxu0  ;;  %v8545_v27 = vld [vmem:[#allocation32_spill] sm:$0xff] }
 0x1f5   : > { %vm7651_vm1 = vcmp.lt.s32.totalorder %v8536_v26, 16  ;;  %v8541_v30 = vsel %vm7659_vm7, 4294967295, %v8540_v30  ;;  %v4388_v47 = vmul.f32 %v4310_v49, %v7507_v32  ;;  %v4346_v26 = vadd.f32 %v4345_v7, %v4310_v49  ;;  %v5220_v7 = vpop.f32.mrf.mxu1  ;;  %v8562_v32 = vld [vmem:[#allocation35_spill] sm:$0xff] }
 0x1f6   : > { %8542 = vst [vmem:[#allocation6_spill] sm:$0xff] %v8541_v30  ;;  %v4422_v35 = vadd.f32 %v4387_v53, %v4386_v13  ;;  %v3278_v44 = vadd.f32 %v3149_v6, %v8544_v31  ;;  %3627 = vst [vmem:[%s5485_s22 + $0x20] sm:$0xff] %v3591_v0  ;;  %v4312_v28 = vsel %vm7529_vm3, %v3591_v0, 0.0  ;;  %v3594_v20 = vadd.f32 %v5254_v39, %v3280_v52  ;;  %v8552_v39 = vld [vmem:[#allocation42_spill] sm:$0xff] }
 0x1f7   : > { %v4389_v53 = vmul.f32 %v4311_v2, %v3590_v46  ;;  %v4347_v13 = vadd.f32 %v4346_v26, %v4311_v2  ;;  %vm8546_vm0 = vnez %v8545_v27  ;;  %vm8553_vm3 = vnez %v8552_v39  ;;  %v8555_v52 = vld [vmem:[#allocation30_spill] sm:$0xff]  ;;  %v8559_v2 = vld [vmem:[#allocation25_spill] sm:$0xff] }
 0x1f8   : > { %v4423_v49 = vadd.f32 %v4422_v35, %v4388_v47  ;;  %v8549_v6 = vsel %vm8546_vm0, %v8547_v38, %v8548_v5  ;;  %v8556_v30 = vsel %vm8553_vm3, %v8554_v48, %v8555_v52  ;;  %v7704_v46 = vsub.s32 %v7256_v29, %v4011_v15  ;;  %3630 = vst [vmem:[%s5485_s22 + $0x38] sm:$0xff] %v3594_v20  ;;  %v3165_v48 = vpop.f32.mrf.mxu1  ;;  %v8560_v52 = vld [vmem:[#allocation36_spill] sm:$0xff]  ;;  %v8607_v15 = vld [vmem:[#allocation43_spill] sm:$0xff] }
 0x1f9   : > { %vm7690_vm9 = vcmp.lt.s32.totalorder %v8549_v6, 16  ;;  %vm7699_vm5 = vcmp.lt.s32.totalorder %v8556_v30, 16  ;;  %v3283_v27 = vadd.f32 %v5219_v34, %v8559_v2  ;;  %v3592_v5 = vadd.f32 %v3463_v3, %v3278_v44  ;;  %v5257_v30 = vpop.f32.mrf.mxu0  ;;  %v8606_v35 = vld [vmem:[#allocation40_spill] sm:$0xff] }
 0x1fa   : > { %v7709_v47 = vmul.u32.u64.low 3817748708, %v7276_v21  ;;  %v7710_v26 = vmul.u32.u64.high 3817748708, %v7276_v21, %v7709_v47  ;;  %v4348_v38 = vadd.f32 %v4347_v13, %v4312_v28  ;;  %v4390_v6 = vmul.f32 %v4312_v28, %v3591_v0  ;;  %v8567_v0 = vld [vmem:[#allocation28_spill] sm:$0xff]  ;;  %v5223_v3 = vpop.f32.mrf.mxu1 }
 0x1fb   : > { %v4424_v39 = vadd.f32 %v4423_v49, %v4389_v53  ;;  %vm8561_vm15 = vnez %v8560_v52  ;;  %v4043_v34 = vshrl.u32 %v7594_v37, 4  ;;  %v4314_v44 = vsel %vm7577_vm12, %v7636_v36, 0.0  ;;  %3628 = vst [vmem:[%s5485_s22 + $0x28] sm:$0xff] %v3592_v5  ;;  %v3476_v2 = vpop.f32.mrf.mxu0  ;;  %v8569_v37 = vld [vmem:[#allocation47_spill] sm:$0xff] }
 0x1fc   : > { %v8564_v29 = vsel %vm8561_vm15, %v8562_v32, %v8563_v51  ;;  %v3281_v28 = vadd.f32 %v3162_v23, %v8567_v0  ;;  %v4313_v53 = vsel %vm7586_vm11, %v3592_v5, 0.0  ;;  %v7730_v49 = vadd.f32 %v5257_v30, %v3283_v27  ;;  %v8570_v47 = vld [vmem:[#allocation39_spill] sm:$0xff]  ;;  %v8574_v23 = vld [vmem:[#allocation29_spill] sm:$0xff] }
 0x1fd   : > { %vm7718_vm0 = vcmp.lt.s32.totalorder %v8564_v29, 16  ;;  %v4425_v51 = vadd.f32 %v4424_v39, %v4390_v6  ;;  %v4349_v32 = vadd.f32 %v4348_v38, %v4313_v53  ;;  %v4391_v13 = vmul.f32 %v4313_v53, %v3592_v5  ;;  %v3178_v39 = vpop.f32.mrf.mxu1  ;;  %v5258_v30 = vpop.f32.mrf.mxu0  ;;  %v8575_v0 = vld [vmem:[#allocation31_spill] sm:$0xff] }
 0x1fe   : > { %vm8568_vm3 = vnez %v8392_v33  ;;  %vm4120_vm15 = vcmp.ne.s32.totalorder %v7704_v46, 0  ;;  %v3284_v4 = vadd.f32 %v5220_v7, %v8574_v23  ;;  %v4315_v27 = vsel %vm7606_vm4, %v3594_v20, 0.0  ;;  %3633 = vst [vmem:[%s5485_s22 + $0x50] sm:$0xff] %v7730_v49  ;;  %v8587_v23 = vld [vmem:[#allocation34_spill] sm:$0xff] }
 0x1ff   : > { %v8571_v12 = vsel %vm8568_vm3, %v8569_v37, %v8570_v47  ;;  %v3595_v5 = vadd.f32 %v3476_v2, %v3281_v28  ;;  %v4392_v33 = vmul.f32 %v4314_v44, %v7636_v36  ;;  %v4350_v38 = vadd.f32 %v4349_v32, %v4314_v44  ;;  %v5224_v36 = vpop.f32.mrf.mxu1  ;;  %v3479_v44 = vpop.f32.mrf.mxu0  ;;  %v8578_v32 = vld [vmem:[#allocation46_spill] sm:$0xff] }
 0x200   : > { %vm7737_vm12 = vcmp.lt.s32.totalorder %v8571_v12, 16  ;;  %v4426_v6 = vadd.f32 %v4425_v51, %v4391_v13  ;;  %v4044_v29 = vmul.u32 18, %v4043_v34  ;;  %v3282_v53 = vadd.f32 %v3165_v48, %v8575_v0  ;;  %v8576_v51 = vld [vmem:[#allocation45_spill] sm:$0xff] }
 0x201   : > { %3631 = vst [vmem:[%s5485_s22 + $0x40] sm:$0xff] %v3595_v5  ;;  %v4316_v41 = vsel %vm7651_vm1, %v3595_v5, 0.0  ;;  %v3598_v7 = vadd.f32 %v5258_v30, %v3284_v4  ;;  %v7754_v37 = vadd.s32 18, %v7704_v46  ;;  %v4393_v28 = vmul.f32 %v4315_v27, %v3594_v20  ;;  %v8579_v13 = vld [vmem:[#allocation37_spill] sm:$0xff]  ;;  %v8630_v20 = vld [vmem:[#allocation50_spill] sm:$0xff] }
 0x202   : > { %v4427_v2 = vadd.f32 %v4426_v6, %v4392_v33  ;;  %v4351_v47 = vadd.f32 %v4350_v38, %v4315_v27  ;;  %vm8577_vm4 = vnez %v8576_v51  ;;  %vm8583_vm1 = vnez %v8412_v57  ;;  %v8588_v33 = vld [vmem:[#allocation65_spill] sm:$0xff]  ;;  %v8589_v51 = vld [vmem:[#allocation59_spill] sm:$0xff] }
 0x203   : > { %v8580_v34 = vsel %vm8577_vm4, %v8578_v32, %v8579_v13  ;;  %v8584_v58 = vsel %vm8583_vm1, %v7175_v17, %v7134_v63  ;;  %v4021_v12 = vshrl.u32 %v7626_v59, 4  ;;  %v3287_v4 = vadd.f32 %v5223_v3, %v8587_v23  ;;  %3634 = vst [vmem:[%s5485_s22 + $0x58] sm:$0xff] %v3598_v7  ;;  %v3181_v63 = vpop.f32.mrf.mxu1  ;;  %v5261_v17 = vpop.f32.mrf.mxu0  ;;  %v8591_v32 = vld [vmem:[#allocation55_spill] sm:$0xff]  ;;  %v8592_v13 = vld [vmem:[#allocation49_spill] sm:$0xff] }
 0x204   : > { %vm7761_vm3 = vcmp.lt.s32.totalorder %v8580_v34, 16  ;;  %vm7770_vm11 = vcmp.lt.s32.totalorder %v8584_v58, 16  ;;  %v3596_v27 = vadd.f32 %v3479_v44, %v3282_v53  ;;  %v4352_v57 = vadd.f32 %v4351_v47, %v4316_v41 }
 0x205   : > { %v7778_v38 = vmul.u32.u64.low 3817748708, %v8588_v33  ;;  %v7779_v6 = vmul.u32.u64.high 3817748708, %v8588_v33, %v7778_v38  ;;  %v4394_v30 = vmul.f32 %v4316_v41, %v3595_v5  ;;  %v4428_v0 = vadd.f32 %v4427_v2, %v4393_v28  ;;  %v8599_v41 = vld [vmem:[#allocation38_spill] sm:$0xff] }
 0x206   : > { %vm8590_vm4 = vnez %v8589_v51  ;;  %vm8596_vm7 = vcmp.lt.s32.totalorder %v7704_v46, 0  ;;  %v7800_v5 = vsub.s32 %v7266_v19, %v4044_v29  ;;  %v4318_v53 = vsel %vm7690_vm9, %v7730_v49, 0.0  ;;  %3632 = vst [vmem:[%s5485_s22 + $0x48] sm:$0xff] %v3596_v27  ;;  %v5227_v38 = vpop.f32.mrf.mxu1  ;;  %v3492_v51 = vpop.f32.mrf.mxu0  ;;  %v8601_v19 = vld [vmem:[#allocation63_spill] sm:$0xff]  ;;  %v8602_v29 = vld [vmem:[#allocation53_spill] sm:$0xff] }
 0x207   : > { %v8593_v34 = vsel %vm8590_vm4, %v8591_v32, %v8592_v13  ;;  %vm7795_vm8 = vmand %vm8596_vm7, %vm4120_vm15  ;;  %v3285_v28 = vadd.f32 %v3178_v39, %v8599_v41  ;;  %v4317_v2 = vsel %vm7699_vm5, %v3596_v27, 0.0  ;;  %v7809_v47 = vadd.f32 %v5261_v17, %v3287_v4 }
 0x208   : > { %vm7787_vm1 = vcmp.lt.s32.totalorder %v8593_v34, 16  ;;  %v4429_v44 = vadd.f32 %v4428_v0, %v4394_v30  ;;  %v4353_v58 = vadd.f32 %v4352_v57, %v4317_v2  ;;  %v4395_v23 = vmul.f32 %v4317_v2, %v3596_v27  ;;  %v3194_v17 = vpop.f32.mrf.mxu1  ;;  %v5262_v34 = vpop.f32.mrf.mxu0 }
 0x209   : > { %vm8600_vm7 = vnez %v8423_v22  ;;  %v4022_v39 = vmul.u32 18, %v4021_v12  ;;  %v3288_v13 = vadd.f32 %v5224_v36, %v8606_v35  ;;  %v4319_v4 = vsel %vm7718_vm0, %v3598_v7, 0.0  ;;  %3637 = vst [vmem:[%s5485_s22 + $0x70] sm:$0xff] %v7809_v47  ;;  %v8618_v35 = vld [vmem:[#allocation44_spill] sm:$0xff] }
 0x20a   : > { %v8603_v32 = vsel %vm8600_vm7, %v8601_v19, %v8602_v29  ;;  %v3599_v27 = vadd.f32 %v3492_v51, %v3285_v28  ;;  %v4264_v22 = vsel %vm7795_vm8, %v7754_v37, %v7704_v46  ;;  %v4396_v57 = vmul.f32 %v4318_v53, %v7730_v49  ;;  %v8610_v51 = vld [vmem:[#allocation57_spill] sm:$0xff]  ;;  %v8611_v19 = vld [vmem:[#allocation52_spill] sm:$0xff] }
 0x20b   : > { %vm7816_vm9 = vcmp.lt.s32.totalorder %v8603_v32, 16  ;;  %v4354_v30 = vadd.f32 %v4353_v58, %v4318_v53  ;;  %v4430_v0 = vadd.f32 %v4429_v44, %v4395_v23  ;;  %vm4123_vm5 = vcmp.ne.s32.totalorder %v7800_v5, 0  ;;  %v5228_v44 = vpop.f32.mrf.mxu1  ;;  %v3495_v58 = vpop.f32.mrf.mxu0  ;;  %v8608_v23 = vld [vmem:[#allocation62_spill] sm:$0xff] }
 0x20c   : > { %vm4159_vm15 = vcmp.lt.s32.totalorder %v7800_v5, 0  ;;  %v3286_v36 = vadd.f32 %v3181_v63, %v8607_v15  ;;  %3635 = vst [vmem:[%s5485_s22 + $0x60] sm:$0xff] %v3599_v27  ;;  %v4320_v12 = vsel %vm7737_vm12, %v3599_v27, 0.0  ;;  %v3602_v41 = vadd.f32 %v5262_v34, %v3288_v13 }
 0x20d   : > { %v7837_v28 = vadd.s32 18, %v7800_v5  ;;  %v4397_v49 = vmul.f32 %v4319_v4, %v3598_v7  ;;  %v4431_v53 = vadd.f32 %v4430_v0, %v4396_v57  ;;  %v4355_v2 = vadd.f32 %v4354_v30, %v4319_v4  ;;  %v8619_v57 = vld [vmem:[#allocation67_spill] sm:$0xff]  ;;  %v5265_v15 = vpop.f32.mrf.mxu0  ;;  %v8653_v7 = vld [vmem:[#allocation17_spill] sm:$0xff] }
 0x20e   : > { %vm8609_vm0 = vnez %v8608_v23  ;;  %v8615_v52 = vsel %vm7387_vm6, %v7337_v55, %v7295_v62  ;;  %v7858_v32 = vsub.s32 %v7273_v1, %v4022_v39  ;;  %v3291_v13 = vadd.f32 %v5227_v38, %v8618_v35  ;;  %3638 = vst [vmem:[%s5485_s22 + $0x78] sm:$0xff] %v3602_v41  ;;  %v3197_v55 = vpop.f32.mrf.mxu1 }
 0x20f   : > { %v8612_v29 = vsel %vm8609_vm0, %v8610_v51, %v8611_v19  ;;  %vm7853_vm12 = vcmp.lt.s32.totalorder %v8615_v52, 16  ;;  %v3600_v4 = vadd.f32 %v3495_v58, %v3286_v36  ;;  %v4356_v24 = vadd.f32 %v4355_v2, %v4320_v12  ;;  %v8621_v51 = vld [vmem:[#allocation70_spill] sm:$0xff]  ;;  %v8622_v19 = vld [vmem:[#allocation68_spill] sm:$0xff]  ;;  %v3508_v35 = vpop.f32.mrf.mxu0 }
 0x210   : > { %vm7844_vm4 = vcmp.lt.s32.totalorder %v8612_v29, 16  ;;  %v7863_v30 = vmul.u32.u64.low 3817748708, %v8619_v57  ;;  %v7864_v0 = vmul.u32.u64.high 3817748708, %v8619_v57, %v7863_v30  ;;  %v4398_v34 = vmul.f32 %v4320_v12, %v3599_v27  ;;  %v8626_v27 = vld [vmem:[#allocation48_spill] sm:$0xff]  ;;  %v5231_v52 = vpop.f32.mrf.mxu1 }
 0x211   : > { %v4432_v62 = vadd.f32 %v4431_v53, %v4397_v49  ;;  %v8623_v1 = vsel %vm7371_vm14, %v8621_v51, %v8622_v19  ;;  %v4076_v38 = vshrl.u32 %v7710_v26, 4  ;;  %v4322_v36 = vsel %vm7761_vm3, %v7809_v47, 0.0  ;;  %3636 = vst [vmem:[%s5485_s22 + $0x68] sm:$0xff] %v3600_v4 }
 0x212   : > { %vm7872_vm6 = vcmp.lt.s32.totalorder %v8623_v1, 16  ;;  %v3289_v12 = vadd.f32 %v3194_v17, %v8626_v27  ;;  %v4321_v49 = vsel %vm7770_vm11, %v3600_v4, 0.0  ;;  %v7884_v53 = vadd.f32 %v5265_v15, %v3291_v13 }
 0x213   : > { %v4433_v2 = vadd.f32 %v4432_v62, %v4398_v34  ;;  %v4357_v58 = vadd.f32 %v4356_v24, %v4321_v49  ;;  %v4399_v29 = vmul.f32 %v4321_v49, %v3600_v4  ;;  %v8627_v26 = vsel %vm7422_vm2, %v7378_v9, %v7341_v11  ;;  %v3210_v9 = vpop.f32.mrf.mxu1  ;;  %v5266_v24 = vpop.f32.mrf.mxu0  ;;  %v8631_v62 = vld [vmem:[#allocation51_spill] sm:$0xff] }
 0x214   : > { %vm7891_vm14 = vcmp.lt.s32.totalorder %v8627_v26, 16  ;;  %vm4121_vm3 = vcmp.ne.s32.totalorder %v7858_v32, 0  ;;  %v3292_v17 = vadd.f32 %v5228_v44, %v8630_v20  ;;  %v4323_v13 = vsel %vm7787_vm1, %v3602_v41, 0.0  ;;  %3641 = vst [vmem:[%s5485_s22 + $0x90] sm:$0xff] %v7884_v53 }
 0x215   : > { %v3603_v4 = vadd.f32 %v3508_v35, %v3289_v12  ;;  %vm4157_vm11 = vcmp.lt.s32.totalorder %v7858_v32, 0  ;;  %v4400_v16 = vmul.f32 %v4322_v36, %v7809_v47  ;;  %v4358_v30 = vadd.f32 %v4357_v58, %v4322_v36  ;;  %v5232_v47 = vpop.f32.mrf.mxu1  ;;  %v3511_v36 = vpop.f32.mrf.mxu0 }
 0x216   : > { %v4434_v11 = vadd.f32 %v4433_v2, %v4399_v29  ;;  %v4077_v34 = vmul.u32 18, %v4076_v38  ;;  %v3290_v15 = vadd.f32 %v3197_v55, %v8631_v62  ;;  %v3606_v44 = vadd.f32 %v5266_v24, %v3292_v17  ;;  %v8643_v29 = vld [vmem:[#allocation78_spill] sm:$0xff]  ;;  %v8654_v62 = vld [vmem:[#allocation75_spill] sm:$0xff] }
 0x217   : > { %3639 = vst [vmem:[%s5485_s22 + $0x80] sm:$0xff] %v3603_v4  ;;  %v4324_v59 = vsel %vm7816_vm9, %v3603_v4, 0.0  ;;  %v7908_v23 = vadd.s32 18, %v7858_v32  ;;  %v4401_v51 = vmul.f32 %v4323_v13, %v3602_v41  ;;  %v4359_v1 = vadd.f32 %v4358_v30, %v4323_v13  ;;  %v5269_v58 = vpop.f32.mrf.mxu0  ;;  %v8648_v13 = vld [vmem:[#allocation56_spill] sm:$0xff] }
 0x218   : > { %v4435_v19 = vadd.f32 %v4434_v11, %v4400_v16  ;;  %v8632_v38 = vsel %vm7409_vm10, %v7351_v61, %v7317_v40  ;;  %vm8635_vm1 = vnez %v8483_v43  ;;  %v4054_v27 = vshrl.u32 %v7779_v6, 4  ;;  %3642 = vst [vmem:[%s5485_s22 + $0x98] sm:$0xff] %v3606_v44  ;;  %vm7935_vm10 = vmand %vm4159_vm15, %vm4123_vm5  ;;  %v3213_v6 = vpop.f32.mrf.mxu1 }
 0x219   : > { %vm7915_vm2 = vcmp.lt.s32.totalorder %v8632_v38, 16  ;;  %v8636_v31 = vsel %vm8635_vm1, %v7471_v60, %v7354_v25  ;;  %v3295_v12 = vadd.f32 %v5231_v52, %v8639_v10  ;;  %v3604_v40 = vadd.f32 %v3511_v36, %v3290_v15  ;;  %v8644_v52 = vld [vmem:[#allocation72_spill] sm:$0xff]  ;;  %vm7968_vm5 = vmand %vm4157_vm11, %vm4121_vm3 }
 0x21a   : > { %vm7924_vm7 = vcmp.lt.s32.totalorder %v8636_v31, 16  ;;  %v7940_v25 = vmul.u32.u64.low 3817748708, %v7504_v45  ;;  %v7941_v43 = vmul.u32.u64.high 3817748708, %v7504_v45, %v7940_v25  ;;  %v4360_v60 = vadd.f32 %v4359_v1, %v4324_v59  ;;  %v5235_v24 = vpop.f32.mrf.mxu1 }
 0x21b   : > { %v4402_v49 = vmul.f32 %v4324_v59, %v3603_v4  ;;  %v4436_v2 = vadd.f32 %v4435_v19, %v4401_v51  ;;  %vm8642_vm9 = vnez %v8479_v50  ;;  %v7953_v20 = vsub.s32 %v7276_v21, %v4077_v34  ;;  %3640 = vst [vmem:[%s5485_s22 + $0x88] sm:$0xff] %v3604_v40  ;;  %v8651_v34 = vld [vmem:[#allocation13_spill] sm:$0xff]  ;;  %v8658_v19 = vld [vmem:[#allocation58_spill] sm:$0xff] }
 0x21c   : > { %v8645_v35 = vsel %vm8642_vm9, %v8643_v29, %v8644_v52  ;;  %v4326_v17 = vsel %vm7844_vm4, %v7884_v53, 0.0  ;;  %v3293_v4 = vadd.f32 %v3210_v9, %v8648_v13  ;;  %v4325_v50 = vsel %vm7853_vm12, %v3604_v40, 0.0  ;;  %v3524_v9 = vpop.f32.mrf.mxu0  ;;  %v3226_v25 = vpop.f32.mrf.mxu1  ;;  %v8662_v13 = vld [vmem:[#allocation4_spill] sm:$0xff] }
 0x21d   : > { %vm7948_vm0 = vcmp.lt.s32.totalorder %v8645_v35, 16  ;;  %v7962_v16 = vadd.f32 %v5269_v58, %v3295_v12  ;;  %v4437_v30 = vadd.f32 %v4436_v2, %v4402_v49  ;;  %v4361_v63 = vadd.f32 %v4360_v60, %v4325_v50 }
 0x21e   : > { %v4403_v11 = vmul.f32 %v4325_v50, %v3604_v40  ;;  %vm8652_vm15 = vnez %v8651_v34  ;;  %v4267_v51 = vsel %vm7935_vm10, %v7837_v28, %v7800_v5  ;;  %v3296_v1 = vadd.f32 %v5232_v47, %v8658_v19  ;;  %v5270_v60 = vpop.f32.mrf.mxu0  ;;  %v8659_v47 = vld [vmem:[#allocation60_spill] sm:$0xff]  ;;  %v5236_v52 = vpop.f32.mrf.mxu1  ;;  %v8696_v28 = vld [vmem:[#allocation3_spill] sm:$0xff] }
 0x21f   : > { %v8655_v15 = vsel %vm8652_vm15, %v8653_v7, %v8654_v62  ;;  %v4327_v36 = vsel %vm7872_vm6, %v3606_v44, 0.0  ;;  %3645 = vst [vmem:[%s5485_s22 + $0xb0] sm:$0xff] %v7962_v16  ;;  %v3607_v38 = vadd.f32 %v3524_v9, %v3293_v4  ;;  %v4055_v31 = vmul.u32 18, %v4054_v27  ;;  %v8663_v4 = vld [vmem:[#allocation73_spill] sm:$0xff]  ;;  %v8672_v34 = vld [vmem:[#allocation8_spill] sm:$0xff] }
 0x220   : > { %vm7977_vm4 = vcmp.lt.s32.totalorder %v8655_v15, 16  ;;  %v4404_v10 = vmul.f32 %v4326_v17, %v7884_v53  ;;  %v4362_v12 = vadd.f32 %v4361_v63, %v4326_v17  ;;  %v4438_v40 = vadd.f32 %v4437_v30, %v4403_v11  ;;  %v3527_v35 = vpop.f32.mrf.mxu0  ;;  %v8660_v17 = vld [vmem:[#allocation2_spill] sm:$0xff]  ;;  %v8676_v15 = vld [vmem:[#allocation64_spill] sm:$0xff] }
 0x221   : > { %v4265_v49 = vsel %vm7968_vm5, %v7908_v23, %v7858_v32  ;;  %v3294_v2 = vadd.f32 %v3213_v6, %v8659_v47  ;;  %3643 = vst [vmem:[%s5485_s22 + $0xa0] sm:$0xff] %v3607_v38  ;;  %v4328_v39 = vsel %vm7891_vm14, %v3607_v38, 0.0  ;;  %v3610_v58 = vadd.f32 %v5270_v60, %v3296_v1  ;;  %v8670_v23 = vld [vmem:[#allocation61_spill] sm:$0xff] }
 0x222   : > { %vm4126_vm12 = vcmp.ne.s32.totalorder %v7953_v20, 0  ;;  %v4405_v53 = vmul.f32 %v4327_v36, %v3606_v44  ;;  %v4439_v27 = vadd.f32 %v4438_v40, %v4404_v10  ;;  %v4363_v29 = vadd.f32 %v4362_v12, %v4327_v36  ;;  %v5273_v9 = vpop.f32.mrf.mxu0  ;;  %v8682_v47 = vld [vmem:[#allocation69_spill] sm:$0xff] }
 0x223   : > { %vm8661_vm6 = vnez %v8660_v17  ;;  %v8667_v48 = vsel %vm7642_vm13, %v7619_v56, %v7522_v18  ;;  %vm4162_vm11 = vcmp.lt.s32.totalorder %v7953_v20, 0  ;;  %v3299_v6 = vadd.f32 %v5235_v24, %v8670_v23  ;;  %3646 = vst [vmem:[%s5485_s22 + $0xb8] sm:$0xff] %v3610_v58  ;;  %v3229_v56 = vpop.f32.mrf.mxu1  ;;  %v8683_v17 = vld [vmem:[#allocation6_spill] sm:$0xff]  ;;  %v8691_v23 = vld [vmem:[#allocation12_spill] sm:$0xff] }
 0x224   : > { %v8664_v50 = vsel %vm8661_vm6, %v8662_v13, %v8663_v4  ;;  %vm8014_vm14 = vcmp.lt.s32.totalorder %v8667_v48, 16  ;;  %v3608_v21 = vadd.f32 %v3527_v35, %v3294_v2  ;;  %v8022_v30 = vadd.s32 18, %v7953_v20  ;;  %v3540_v10 = vpop.f32.mrf.mxu0  ;;  %vm8067_vm8 = vmand %vm4162_vm11, %vm4126_vm12  ;;  %v8685_v13 = vld [vmem:[#allocation9_spill] sm:$0xff] }
 0x225   : > { %vm8005_vm3 = vcmp.lt.s32.totalorder %v8664_v50, 16  ;;  %v8025_v63 = vsub.s32 %v8588_v33, %v4055_v31  ;;  %v4364_v42 = vadd.f32 %v4363_v29, %v4328_v39  ;;  %v4406_v11 = vmul.f32 %v4328_v39, %v3607_v38  ;;  %v5239_v31 = vpop.f32.mrf.mxu1 }
 0x226   : > { %v4440_v18 = vadd.f32 %v4439_v27, %v4405_v53  ;;  %vm8671_vm13 = vnez %v8527_v14  ;;  %v4065_v62 = vshrl.u32 %v7941_v43, 4  ;;  %v4330_v33 = vsel %vm7915_vm2, %v7962_v16, 0.0  ;;  %3644 = vst [vmem:[%s5485_s22 + $0xa8] sm:$0xff] %v3608_v21  ;;  %v8679_v43 = vld [vmem:[#allocation66_spill] sm:$0xff]  ;;  %v5274_v60 = vpop.f32.mrf.mxu0 }
 0x227   : > { %v8673_v7 = vsel %vm8671_vm13, %v7566_v8, %v8672_v34  ;;  %v3297_v19 = vadd.f32 %v3226_v25, %v8676_v15  ;;  %v4329_v14 = vsel %vm7924_vm7, %v3608_v21, 0.0  ;;  %v8044_v1 = vadd.f32 %v5273_v9, %v3299_v6 }
 0x228   : > { %vm8032_vm1 = vcmp.lt.s32.totalorder %v8673_v7, 16  ;;  %v4441_v8 = vadd.f32 %v4440_v18, %v4406_v11  ;;  %v4365_v36 = vadd.f32 %v4364_v42, %v4329_v14  ;;  %v4407_v38 = vmul.f32 %v4329_v14, %v3608_v21  ;;  %v3543_v35 = vpop.f32.mrf.mxu0 }
 0x229   : > { %vm8051_vm2 = vcmp.lt.s32.totalorder %v4264_v22, 16  ;;  %v4087_v41 = vshrl.u32 %v7864_v0, 4  ;;  %v3300_v12 = vadd.f32 %v5236_v52, %v8679_v43  ;;  %v4331_v40 = vsel %vm7948_vm0, %v3610_v58, 0.0  ;;  %3649 = vst [vmem:[%s5485_s22 + $0xd0] sm:$0xff] %v8044_v1  ;;  %v3242_v22 = vpop.f32.mrf.mxu1 }
 0x22a   : > { %v3611_v25 = vadd.f32 %v3540_v10, %v3297_v19  ;;  %vm4124_vm7 = vcmp.ne.s32.totalorder %v8025_v63, 0  ;;  %v4408_v3 = vmul.f32 %v4330_v33, %v7962_v16  ;;  %v4366_v46 = vadd.f32 %v4365_v36, %v4330_v33  ;;  %v8697_v36 = vld [vmem:[#allocation14_spill] sm:$0xff] }
 0x22b   : > { %v4442_v37 = vadd.f32 %v4441_v8, %v4407_v38  ;;  %v4066_v26 = vmul.u32 18, %v4065_v62  ;;  %v3298_v2 = vadd.f32 %v3229_v56, %v8682_v47  ;;  %v3614_v39 = vadd.f32 %v5274_v60, %v3300_v12  ;;  %v5240_v52 = vpop.f32.mrf.mxu1  ;;  %v5277_v56 = vpop.f32.mrf.mxu0  ;;  %v8699_v60 = vld [vmem:[#allocation74_spill] sm:$0xff] }
 0x22c   : > { %3647 = vst [vmem:[%s5485_s22 + $0xc0] sm:$0xff] %v3611_v25  ;;  %v4332_v16 = vsel %vm7977_vm4, %v3611_v25, 0.0  ;;  %vm4160_vm9 = vcmp.lt.s32.totalorder %v8025_v63, 0  ;;  %v4409_v53 = vmul.f32 %v4331_v40, %v3610_v58  ;;  %v4367_v29 = vadd.f32 %v4366_v46, %v4331_v40  ;;  %v8698_v40 = vld [vmem:[#allocation71_spill] sm:$0xff] }
 0x22d   : > { %v4443_v27 = vadd.f32 %v4442_v37, %v4408_v3  ;;  %vm8684_vm0 = vnez %v8683_v17  ;;  %vm8085_vm15 = vcmp.lt.s32.totalorder %v4265_v49, 16  ;;  %v4088_v48 = vmul.u32 18, %v4087_v41  ;;  %3650 = vst [vmem:[%s5485_s22 + $0xd8] sm:$0xff] %v3614_v39  ;;  %v3245_v18 = vpop.f32.mrf.mxu1  ;;  %vm8111_vm12 = vmand %vm4160_vm9, %vm4124_vm7  ;;  %v3556_v8 = vpop.f32.mrf.mxu0 }
 0x22e   : > { %v8686_v4 = vsel %vm8684_vm0, %v7622_v54, %v8685_v13  ;;  %v3303_v58 = vadd.f32 %v5239_v31, %v8691_v23  ;;  %v3612_v6 = vadd.f32 %v3543_v35, %v3298_v2  ;;  %v4270_v21 = vsel %vm8067_vm8, %v8022_v30, %v7953_v20  ;;  %v8702_v35 = vld [vmem:[#allocation77_spill] sm:$0xff] }
 0x22f   : > { %vm8081_vm5 = vcmp.lt.s32.totalorder %v8686_v4, 16  ;;  %v8096_v54 = vadd.s32 18, %v8025_v63  ;;  %v4368_v42 = vadd.f32 %v4367_v29, %v4332_v16  ;;  %v4410_v11 = vmul.f32 %v4332_v16, %v3611_v25  ;;  %v5243_v14 = vpop.f32.mrf.mxu1 }
 0x230   : > { %v4444_v49 = vadd.f32 %v4443_v27, %v4409_v53  ;;  %vm8103_vm4 = vcmp.lt.s32.totalorder %v4267_v51, 16  ;;  %v8116_v7 = vsub.s32 %v7504_v45, %v4066_v26  ;;  %v4334_v5 = vsel %vm8005_vm3, %v8044_v1, 0.0  ;;  %3648 = vst [vmem:[%s5485_s22 + $0xc8] sm:$0xff] %v3612_v6 }
 0x231   : > { %v3301_v61 = vadd.f32 %v3242_v22, %v8696_v28  ;;  %v4333_v51 = vsel %vm8014_vm14, %v3612_v6, 0.0  ;;  %v3617_v62 = vadd.f32 %v5277_v56, %v3303_v58  ;;  %v8126_v45 = vsub.s32 %v8619_v57, %v4088_v48  ;;  %v3258_v12 = vpop.f32.mrf.mxu1  ;;  %v5278_v57 = vpop.f32.mrf.mxu0 }
 0x232   : > { %v4445_v33 = vadd.f32 %v4444_v49, %v4410_v11  ;;  %v4369_v15 = vadd.f32 %v4368_v42, %v4333_v51  ;;  %v4411_v19 = vmul.f32 %v4333_v51, %v3612_v6  ;;  %v3304_v38 = vadd.f32 %v5240_v52, %v8697_v36  ;;  %v8705_v42 = vld [vmem:[#allocation10_spill] sm:$0xff] }
 0x233   : > { %v4335_v32 = vsel %vm8032_vm1, %v3614_v39, 0.0  ;;  %3653 = vst [vmem:[%s5485_s22 + $0xf0] sm:$0xff] %v3617_v62  ;;  %v3615_v31 = vadd.f32 %v3556_v8, %v3301_v61  ;;  %v4268_v44 = vsel %vm8111_vm12, %v8096_v54, %v8025_v63  ;;  %v4412_v10 = vmul.f32 %v4334_v5, %v8044_v1  ;;  %v5244_v1 = vpop.f32.mrf.mxu1  ;;  %v3559_v22 = vpop.f32.mrf.mxu0  ;;  %v8708_v61 = vld [vmem:[#allocation5_spill] sm:$0xff] }
 0x234   : > { %v4370_v41 = vadd.f32 %v4369_v15, %v4334_v5  ;;  %v4446_v43 = vadd.f32 %v4445_v33, %v4411_v19  ;;  %vm4125_vm10 = vcmp.ne.s32.totalorder %v8116_v7, 0  ;;  %v3302_v25 = vadd.f32 %v3245_v18, %v8698_v40 }
 0x235   : > { %3651 = vst [vmem:[%s5485_s22 + $0xe0] sm:$0xff] %v3615_v31  ;;  %v4336_v24 = vsel %vm8051_vm2, %v3615_v31, 0.0  ;;  %v3618_v3 = vadd.f32 %v5278_v57, %v3304_v38  ;;  %vm4161_vm6 = vcmp.lt.s32.totalorder %v8116_v7, 0  ;;  %v4413_v46 = vmul.f32 %v4335_v32, %v3614_v39  ;;  %v5281_v27 = vpop.f32.mrf.mxu0  ;;  %v3261_v23 = vpop.f32.mrf.mxu1 }
 0x236   : > { %v4447_v63 = vadd.f32 %v4446_v43, %v4412_v10  ;;  %v4371_v37 = vadd.f32 %v4370_v41, %v4335_v32  ;;  %vm4127_vm3 = vcmp.ne.s32.totalorder %v8126_v45, 0  ;;  %v3307_v26 = vadd.f32 %v5243_v14, %v8699_v60  ;;  %vm8153_vm11 = vmand %vm4161_vm6, %vm4125_vm10 }
 0x237   : > { %3654 = vst [vmem:[%s5485_s22 + $0xf8] sm:$0xff] %v3618_v3  ;;  %v3616_v47 = vadd.f32 %v3559_v22, %v3302_v25  ;;  %vm4163_vm14 = vcmp.lt.s32.totalorder %v8126_v45, 0  ;;  %v4233_v55 = vadd.s32 18, %v8116_v7  ;;  %v4414_v16 = vmul.f32 %v4336_v24, %v3615_v31  ;;  %v3572_v54 = vpop.f32.mrf.mxu0 }
 0x238   : > { %v4372_v2 = vadd.f32 %v4371_v37, %v4336_v24  ;;  %v4448_v53 = vadd.f32 %v4447_v63, %v4413_v46  ;;  %v4235_v39 = vadd.s32 18, %v8126_v45  ;;  %v4338_v52 = vsel %vm8081_vm5, %v3617_v62, 0.0  ;;  %vm8167_vm1 = vmand %vm4163_vm14, %vm4127_vm3 }
 0x239   : > { %v3305_v17 = vadd.f32 %v3258_v12, %v8702_v35  ;;  %3652 = vst [vmem:[%s5485_s22 + $0xe8] sm:$0xff] %v3616_v47  ;;  %v4337_v13 = vsel %vm8085_vm15, %v3616_v47, 0.0  ;;  %v3621_v4 = vadd.f32 %v5281_v27, %v3307_v26  ;;  %vm4304_vm13 = vcmp.lt.s32.totalorder %v4268_v44, 16  ;;  %v5282_v9 = vpop.f32.mrf.mxu0 }
 0x23a   : > { %v4449_v48 = vadd.f32 %v4448_v53, %v4414_v16  ;;  %v4373_v58 = vadd.f32 %v4372_v2, %v4337_v13  ;;  %v4415_v6 = vmul.f32 %v4337_v13, %v3616_v47  ;;  %v3308_v11 = vadd.f32 %v5244_v1, %v8705_v42 }
 0x23b   : > { %v4339_v59 = vsel %vm8103_vm4, %v3618_v3, 0.0  ;;  %3657 = vst [vmem:[%s5485_s22 + $0x110] sm:$0xff] %v3621_v4  ;;  %v3619_v49 = vadd.f32 %v3572_v54, %v3305_v17  ;;  %v4269_v18 = vsel %vm8153_vm11, %v4233_v55, %v8116_v7  ;;  %v4416_v56 = vmul.f32 %v4338_v52, %v3617_v62  ;;  %v3575_v14 = vpop.f32.mrf.mxu0  ;;  %v4344_v55 = vld [vmem:[%s8208_s3] sm:$0x3] }
 0x23c   : > { %v4374_v34 = vadd.f32 %v4373_v58, %v4338_v52  ;;  %v4450_v5 = vadd.f32 %v4449_v48, %v4415_v6  ;;  %vm8183_vm2 = vcmp.lt.s32.totalorder %v4270_v21, 16  ;;  %v3306_v51 = vadd.f32 %v3261_v23, %v8708_v61 }
 0x23d   : > { %3655 = vst [vmem:[%s5485_s22 + $0x100] sm:$0xff] %v3619_v49  ;;  %v4340_v33 = vsel %vm4304_vm13, %v3619_v49, 0.0  ;;  %v3622_v7 = vadd.f32 %v5282_v9, %v3308_v11  ;;  %v4271_v62 = vsel %vm8167_vm1, %v4235_v39, %v8126_v45  ;;  %v4417_v15 = vmul.f32 %v4339_v59, %v3618_v3 }
 0x23e   : > { %v4451_v0 = vadd.f32 %v4450_v5, %v4416_v56  ;;  %v4375_v19 = vadd.f32 %v4374_v34, %v4339_v59  ;;  %vm4305_vm7 = vcmp.lt.s32.totalorder %v4269_v18, 16  ;;  %v3620_v20 = vadd.f32 %v3575_v14, %v3306_v51 }
 0x23f   : > { %3658 = vst [vmem:[%s5485_s22 + $0x118] sm:$0xff] %v3622_v7  ;;  %v4418_v21 = vmul.f32 %v4340_v33, %v3619_v49  ;;  %vm4307_vm8 = vcmp.lt.s32.totalorder %v4271_v62, 16  ;;  %v4342_v36 = vsel %vm8183_vm2, %v3621_v4, 0.0  ;;  %vm4463_vm9 = vcmask 1040384  }
 0x240   : > { %v4376_v30 = vadd.f32 %v4375_v19, %v4340_v33  ;;  %v4452_v8 = vadd.f32 %v4451_v0, %v4417_v15  ;;  %3656 = vst [vmem:[%s5485_s22 + $0x108] sm:$0xff] %v3620_v20  ;;  %v4341_v38 = vsel %vm4305_vm7, %v3620_v20, 0.0  ;;  %v4343_v45 = vsel %vm4307_vm8, %v3622_v7, 0.0 }
 0x241   : > { %v4419_v44 = vmul.f32 %v4341_v38, %v3620_v20  ;;  %v4420_v10 = vmul.f32 %v4342_v36, %v3621_v4  ;;  %v4421_v12 = vmul.f32 %v4343_v45, %v3622_v7 }
 0x242   : > { %v4453_v32 = vadd.f32 %v4452_v8, %v4418_v21  ;;  %v4377_v31 = vadd.f32 %v4376_v30, %v4341_v38 }
 0x244   : > { %v4378_v41 = vadd.f32 %v4377_v31, %v4342_v36  ;;  %v4454_v43 = vadd.f32 %v4453_v32, %v4419_v44 }
 0x246   : > { %v4379_v57 = vadd.f32 %v4378_v41, %v4343_v45  ;;  %v4455_v40 = vadd.f32 %v4454_v43, %v4420_v10 }
 0x248   : > { %v4380_v25 = vrot.slane %v4379_v57, 4  ;;  %v4456_v24 = vadd.f32 %v4455_v40, %v4421_v12 }
 0x24a   : > { %v4381_v3 = vadd.f32 %v4380_v25, %v4379_v57  ;;  %v4457_v46 = vrot.slane %v4456_v24, 4 }
 0x24c   : > { %v4382_v63 = vrot.slane %v4381_v3, 2  ;;  %v4458_v37 = vadd.f32 %v4457_v46, %v4456_v24 }
 0x24e   : > { %v4383_v1 = vadd.f32 %v4382_v63, %v4381_v3  ;;  %v4459_v22 = vrot.slane %v4458_v37, 2 }
 0x250   : > { %v4384_v60 = vrot.slane %v4383_v1, 1  ;;  %v4460_v26 = vadd.f32 %v4459_v22, %v4458_v37 }
 0x252   : > { %v4461_v47 = vrot.slane %v4460_v26, 1  ;;  %v4385_v2 = vadd.f32 %v4384_v60, %v4383_v1 }
 0x254   : > { %v4462_v16 = vadd.f32 %v4461_v47, %v4460_v26 }
 0x256   : > { %v4464_v53 = vsel %vm4463_vm9, %v4385_v2, %v4462_v16 }
 0x257   : > { %v4465_v27 = vadd.f32 %v4464_v53, %v4344_v55 }
 0x259   : > { %4466 = vst [vmem:[%s8208_s3] sm:$0x3] %v4465_v27 }
 0x25a PF: > { %s14_s12 = sadd.s32 1, %s5446_s12  }
 0x25b   : > { %p11_p5 = scmp.ge.s32.totalorder %s14_s12, 4  }
 0x25d   :  { %13 = sbr.rel (!%p11_p5) target bundleno = 1 (0x1), region = 78 }

</bundles_post_ra>
